<compile_context>
chip_gen: v7x
topology: tpu7x:2x2x1
jax: 0.10.0
libtpu: 0.0.40
codegen_flags: <defaults>
</compile_context>

<pallas_src>
import functools
import math

import jax
import jax.numpy as jnp
from jax.experimental import pallas as pl
from jax.experimental.pallas import tpu as pltpu

EPS = 1e-5  # nn.BatchNorm2d default eps


def _pick_tile(m, candidates):
    for c in candidates:
        if c <= m and m % c == 0:
            return c
    return m


def _pick_th(ho, wo, cin, cout, taps=9, budget=24 * 1024 * 1024):
    """Largest H tile height whose in-kernel working set (packed bf16 LHS,
    window temporaries, f32 dot result) stays under `budget` bytes."""
    for th in (64, 48, 32, 16, 8, 4, 2, 1):
        if th <= ho and ho % th == 0:
            working = th * wo * (2 * taps * cin * 2 + 4 * cout)
            if working <= budget:
                return th
    return 1


# ---------------------------------------------------------------------------
# Kernel 1: direct stride-1 KxK conv, taps packed into the contraction dim.
#   grid = (N, Ho // TH); the whole padded image is resident in VMEM (fetched
#   once per image).  The kernel concatenates the kh*kw shifted windows along
#   channels -> (th*wo, kh*kw*cin) bf16 LHS and does a single MXU matmul with
#   K = kh*kw*cin into an f32 result, which is stored (bf16) together with the
#   per-tile BN partial statistics (sum, sum of squares).
# ---------------------------------------------------------------------------
def _make_direct_conv_kernel(kh, kw, dil, th, wo, cin, cout):
    taps = kh * kw

    def kernel(x_ref, w_ref, y_ref, s_ref):
        h0 = pl.multiple_of(pl.program_id(1) * th, th)
        wins = []
        for ki in range(kh):
            for kj in range(kw):
                wins.append(
                    x_ref[0, pl.ds(h0 + ki * dil, th),
                          kj * dil:kj * dil + wo, :])
        lhs = jnp.concatenate(wins, axis=-1).reshape(th * wo, taps * cin)
        acc = jnp.dot(lhs, w_ref[...], preferred_element_type=jnp.float32)
        y_ref[0] = acc.reshape(th, wo, cout).astype(y_ref.dtype)
        s_ref[0, 0, 0:1, :] = jnp.sum(acc, axis=0, keepdims=True)
        s_ref[0, 0, 1:2, :] = jnp.sum(acc * acc, axis=0, keepdims=True)

    return kernel


def _direct_conv_pallas(xp, w_flat, *, kh, kw, dil, ho, wo, th,
                        out_dtype=jnp.bfloat16):
    n, hp, wp, cin = xp.shape
    kc, cout = w_flat.shape          # kc = kh*kw*cin
    taps = kh * kw
    h_tiles = ho // th
    kernel = _make_direct_conv_kernel(kh, kw, dil, th, wo, cin, cout)

    flops = 2 * n * ho * wo * taps * cin * cout
    bytes_accessed = (xp.size * xp.dtype.itemsize
                      + w_flat.size * w_flat.dtype.itemsize
                      + n * ho * wo * cout * 2
                      + n * h_tiles * 2 * cout * 4)

    # Adaptive scoped-VMEM limit: double-buffered image/weights/output plus
    # the packed LHS (counted twice for window temporaries) and f32 result.
    x_b = hp * wp * cin * 2
    w_b = kc * cout * 2
    y_b = th * wo * cout * 2
    lhs_b = th * wo * kc * 2
    acc_b = th * wo * cout * 4
    est = 2 * x_b + 2 * w_b + 2 * y_b + 2 * lhs_b + acc_b + (2 << 20)
    vmem_limit = min(max(32 << 20, int(est * 1.3)), 100 * 1024 * 1024)

    y, stats = pl.pallas_call(
        kernel,
        out_shape=(jax.ShapeDtypeStruct((n, ho, wo, cout), out_dtype),
                   jax.ShapeDtypeStruct((n, h_tiles, 2, cout), jnp.float32)),
        grid=(n, h_tiles),
        in_specs=[
            pl.BlockSpec((1, hp, wp, cin), lambda i, j: (i, 0, 0, 0)),
            pl.BlockSpec((kc, cout), lambda i, j: (0, 0)),
        ],
        out_specs=(
            pl.BlockSpec((1, th, wo, cout), lambda i, j: (i, j, 0, 0)),
            pl.BlockSpec((1, 1, 2, cout), lambda i, j: (i, j, 0, 0)),
        ),
        compiler_params=pltpu.CompilerParams(
            dimension_semantics=("parallel", "parallel"),
            vmem_limit_bytes=vmem_limit),
        cost_estimate=pl.CostEstimate(flops=flops, transcendentals=0,
                                      bytes_accessed=bytes_accessed),
    )(xp, w_flat)
    return y, stats


# ---------------------------------------------------------------------------
# Kernel 2: tiled bf16 matmul with fused per-tile BN partial statistics.
# ---------------------------------------------------------------------------
def _mm_stats_kernel(a_ref, b_ref, y_ref, s_ref):
    y = jnp.dot(a_ref[...], b_ref[...], preferred_element_type=jnp.float32)
    y_ref[...] = y.astype(y_ref.dtype)
    s_ref[0, 0:1, :] = jnp.sum(y, axis=0, keepdims=True)
    s_ref[0, 1:2, :] = jnp.sum(y * y, axis=0, keepdims=True)


def _matmul_stats_pallas(a, b, out_dtype=jnp.bfloat16):
    m, k = a.shape
    ncol = b.shape[1]
    tm = _pick_tile(m, (1024, 512, 256, 128, 64, 32, 16, 8))
    mp = ((m + tm - 1) // tm) * tm
    if mp != m:
        a = jnp.pad(a, ((0, mp - m), (0, 0)))  # zero rows -> zero stat contrib
    nt = mp // tm
    flops = 2 * mp * k * ncol
    bytes_accessed = (a.size * a.dtype.itemsize + b.size * b.dtype.itemsize
                      + mp * ncol * 2 + nt * 2 * ncol * 4)
    y, stats = pl.pallas_call(
        _mm_stats_kernel,
        out_shape=(jax.ShapeDtypeStruct((mp, ncol), out_dtype),
                   jax.ShapeDtypeStruct((nt, 2, ncol), jnp.float32)),
        grid=(nt,),
        in_specs=[pl.BlockSpec((tm, k), lambda i: (i, 0)),
                  pl.BlockSpec((k, ncol), lambda i: (0, 0))],
        out_specs=(pl.BlockSpec((tm, ncol), lambda i: (i, 0)),
                   pl.BlockSpec((1, 2, ncol), lambda i: (i, 0, 0))),
        compiler_params=pltpu.CompilerParams(
            dimension_semantics=("parallel",)),
        cost_estimate=pl.CostEstimate(flops=flops, transcendentals=0,
                                      bytes_accessed=bytes_accessed),
    )(a, b)
    return y[:m], stats


# ---------------------------------------------------------------------------
# Kernel 3: fused BatchNorm affine + optional residual + optional ReLU
#           on a lane-dense (M/r, 128) repack of the (M, C) activation.
# ---------------------------------------------------------------------------
def _make_bn_kernel(relu, has_res):
    if has_res:
        def kernel(x_ref, sc_ref, sh_ref, r_ref, o_ref):
            y = (x_ref[...].astype(jnp.float32) * sc_ref[...] + sh_ref[...]
                 + r_ref[...].astype(jnp.float32))
            if relu:
                y = jnp.maximum(y, 0.0)
            o_ref[...] = y.astype(o_ref.dtype)
    else:
        def kernel(x_ref, sc_ref, sh_ref, o_ref):
            y = x_ref[...].astype(jnp.float32) * sc_ref[...] + sh_ref[...]
            if relu:
                y = jnp.maximum(y, 0.0)
            o_ref[...] = y.astype(o_ref.dtype)
    return kernel


def _bn_act_pallas(y, scale, shift, residual=None, *, relu,
                   out_dtype=jnp.bfloat16):
    m, c = y.shape
    r = 1
    if c < 128 and 128 % c == 0 and m % (128 // c) == 0:
        r = 128 // c                       # lane-dense repack (free, row-major)
    mp, cp = m // r, c * r
    y2 = y.reshape(mp, cp)
    res2 = None if residual is None else residual.reshape(mp, cp)
    sc = jnp.tile(scale.astype(jnp.float32), r).reshape(1, cp)
    sh = jnp.tile(shift.astype(jnp.float32), r).reshape(1, cp)
    tm = _pick_tile(mp, (2048, 1024, 512, 256, 128, 64, 32, 16, 8))
    kernel = _make_bn_kernel(relu, res2 is not None)
    row_spec = pl.BlockSpec((tm, cp), lambda i: (i, 0))
    vec_spec = pl.BlockSpec((1, cp), lambda i: (0, 0))
    in_specs = [row_spec, vec_spec, vec_spec]
    args = [y2, sc, sh]
    if res2 is not None:
        in_specs.append(row_spec)
        args.append(res2)
    out = pl.pallas_call(
        kernel,
        out_shape=jax.ShapeDtypeStruct((mp, cp), out_dtype),
        grid=(mp // tm,),
        in_specs=in_specs,
        out_specs=row_spec,
        compiler_params=pltpu.CompilerParams(
            dimension_semantics=("parallel",)),
    )(*args)
    return out.reshape(m, c)


# ---------------------------------------------------------------------------
# Conv + BN composites (training-mode batch statistics, bias-free convs)
# ---------------------------------------------------------------------------
def _bn_scale_shift(stat_sums, count, gamma, beta):
    mean = stat_sums[0] / count
    var = jnp.maximum(stat_sums[1] / count - mean * mean, 0.0)
    scale = gamma / jnp.sqrt(var + EPS)
    shift = beta - mean * scale
    return scale, shift


@functools.partial(jax.jit, static_argnames=("padding", "dilation", "relu"))
def _conv3x3_s1_bn(x, w, gamma, beta, residual, *, padding, dilation, relu):
    n, h, wd, cin = x.shape
    kh, kw, _, cout = w.shape
    ho = h + 2 * padding - dilation * (kh - 1)
    wo = wd + 2 * padding - dilation * (kw - 1)
    xp = jnp.pad(x.astype(jnp.bfloat16),
                 ((0, 0), (padding, padding), (padding, padding), (0, 0)))
    # Weight layout matches the in-kernel window concat order: (ki, kj, cin).
    w_flat = w.astype(jnp.bfloat16).reshape(kh * kw * cin, cout)
    th = _pick_th(ho, wo, cin, cout, taps=kh * kw)
    y, stats = _direct_conv_pallas(xp, w_flat, kh=kh, kw=kw, dil=dilation,
                                   ho=ho, wo=wo, th=th)
    m = n * ho * wo
    scale, shift = _bn_scale_shift(jnp.sum(stats, axis=(0, 1)), m, gamma, beta)
    res = None if residual is None else residual.reshape(m, cout)
    out = _bn_act_pallas(y.reshape(m, cout), scale, shift, res, relu=relu)
    return out.reshape(n, ho, wo, cout)


def _im2col(x, kh, kw, stride, padding, dilation):
    """x: (N, H, W, C) -> patches (N*Ho*Wo, kh*kw*C), ordered (ki, kj, cin)."""
    n, h, w, c = x.shape
    ho = (h + 2 * padding - dilation * (kh - 1) - 1) // stride + 1
    wo = (w + 2 * padding - dilation * (kw - 1) - 1) // stride + 1
    xp = jnp.pad(x, ((0, 0), (padding, padding), (padding, padding), (0, 0)))
    cols = []
    for i in range(kh):
        for j in range(kw):
            hi, wj = i * dilation, j * dilation
            cols.append(xp[:, hi:hi + stride * (ho - 1) + 1:stride,
                           wj:wj + stride * (wo - 1) + 1:stride, :])
    patches = jnp.concatenate(cols, axis=-1)
    return patches.reshape(n * ho * wo, kh * kw * c), (n, ho, wo)


@functools.partial(jax.jit,
                   static_argnames=("stride", "padding", "dilation", "relu"))
def _conv3x3_strided_bn(x, w, gamma, beta, *, stride, padding, dilation, relu):
    # Only 2 strided 3x3 convs exist in the network; im2col here is cheap.
    kh, kw, cin, cout = w.shape
    patches, (n, ho, wo) = _im2col(x.astype(jnp.bfloat16), kh, kw, stride,
                                   padding, dilation)
    wm = w.astype(jnp.bfloat16).reshape(kh * kw * cin, cout)
    k = patches.shape[1]
    kp = max(8, ((k + 7) // 8) * 8)        # K=27 (first conv) -> 32, zero-padded
    if kp != k:
        patches = jnp.pad(patches, ((0, 0), (0, kp - k)))
        wm = jnp.pad(wm, ((0, kp - k), (0, 0)))
    y, stats = _matmul_stats_pallas(patches, wm)
    m = n * ho * wo
    scale, shift = _bn_scale_shift(jnp.sum(stats, axis=0), m, gamma, beta)
    out = _bn_act_pallas(y, scale, shift, None, relu=relu)
    return out.reshape(n, ho, wo, cout)


@functools.partial(jax.jit, static_argnames=("stride", "relu"))
def _conv1x1_bn(x, w, gamma, beta, *, stride, relu):
    if stride != 1:
        x = x[:, ::stride, ::stride, :]
    n, h, wd, cin = x.shape
    cout = w.shape[-1]
    a = x.reshape(n * h * wd, cin).astype(jnp.bfloat16)
    y, stats = _matmul_stats_pallas(a, w.reshape(cin, cout).astype(jnp.bfloat16))
    m = n * h * wd
    scale, shift = _bn_scale_shift(jnp.sum(stats, axis=0), m, gamma, beta)
    out = _bn_act_pallas(y, scale, shift, None, relu=relu)
    return out.reshape(n, h, wd, cout)


@jax.jit
def _conv1x1_plain(x, w):
    """Raw nn.Conv2d(bias=False) -- no BN, no activation (final layer)."""
    n, h, wd, cin = x.shape
    cout = w.shape[-1]
    a = x.reshape(n * h * wd, cin).astype(jnp.bfloat16)
    y, _ = _matmul_stats_pallas(a, w.reshape(cin, cout).astype(jnp.bfloat16),
                                out_dtype=jnp.float32)
    return y.reshape(n, h, wd, cout)


def _conv_bn(x, cp, *, k, stride=1, padding=0, dilation=1, relu=True,
             residual=None):
    if k == 1:
        return _conv1x1_bn(x, cp["w"], cp["gamma"], cp["beta"],
                           stride=stride, relu=relu)
    if stride == 1:
        return _conv3x3_s1_bn(x, cp["w"], cp["gamma"], cp["beta"], residual,
                              padding=padding, dilation=dilation, relu=relu)
    return _conv3x3_strided_bn(x, cp["w"], cp["gamma"], cp["beta"],
                               stride=stride, padding=padding,
                               dilation=dilation, relu=relu)


# ---------------------------------------------------------------------------
# Small JAX glue: SPP pooling + align_corners=True bilinear upsampling.
# TODO(synk): pooling / bilinear / concat stay as tiny XLA ops (negligible).
# ---------------------------------------------------------------------------
def _avg_pool(x, k):
    n, h, w, c = x.shape
    return x.astype(jnp.float32).reshape(n, h // k, k, w // k, k, c).mean(
        axis=(2, 4))


def _bilinear_align_corners(x, out_h, out_w):
    n, h, w, c = x.shape

    def coords(in_s, out_s):
        if in_s == 1:
            src = jnp.zeros((out_s,), jnp.float32)
        else:
            src = jnp.arange(out_s, dtype=jnp.float32) * ((in_s - 1) / (out_s - 1))
        i0 = jnp.floor(src).astype(jnp.int32)
        i1 = jnp.minimum(i0 + 1, in_s - 1)
        return i0, i1, src - i0.astype(jnp.float32)

    y0, y1, fy = coords(h, out_h)
    x0, x1, fx = coords(w, out_w)
    rows = (x[:, y0, :, :] * (1.0 - fy)[None, :, None, None]
            + x[:, y1, :, :] * fy[None, :, None, None])
    out = (rows[:, :, x0, :] * (1.0 - fx)[None, None, :, None]
           + rows[:, :, x1, :] * fx[None, None, :, None])
    return out


# ---------------------------------------------------------------------------
# Parameter init (matches Feature.weight_init: conv ~ N(0, sqrt(2/(k*k*Cout))),
# BN gamma=1, beta=0).
# ---------------------------------------------------------------------------
class _Keys:
    def __init__(self, key):
        self._key = key

    def __call__(self):
        self._key, sub = jax.random.split(self._key)
        return sub


def _init_conv(kg, cin, cout, k):
    std = math.sqrt(2.0 / (k * k * cout))
    return std * jax.random.normal(kg(), (k, k, cin, cout), jnp.float32)


def _init_conv_bn(kg, cin, cout, k):
    return dict(w=_init_conv(kg, cin, cout, k),
                gamma=jnp.ones((cout,), jnp.float32),
                beta=jnp.zeros((cout,), jnp.float32))


def _init_basic_block(kg, cin, cout, has_down):
    return dict(conv1=_init_conv_bn(kg, cin, cout, 3),
                conv2=_init_conv_bn(kg, cout, cout, 3),
                down=_init_conv_bn(kg, cin, cout, 1) if has_down else None)


def _init_layer(kg, cin, cout, blocks, stride):
    has_down = (stride != 1) or (cin != cout)
    layer = [_init_basic_block(kg, cin, cout, has_down)]
    for _ in range(1, blocks):
        layer.append(_init_basic_block(kg, cout, cout, False))
    return layer


def init_feature_params(seed=0, in_planes=3):
    kg = _Keys(jax.random.PRNGKey(seed))
    p = {}
    p["firstconv"] = [_init_conv_bn(kg, in_planes, 32, 3),
                      _init_conv_bn(kg, 32, 32, 3),
                      _init_conv_bn(kg, 32, 32, 3)]
    p["layer1"] = _init_layer(kg, 32, 32, 3, 1)
    p["layer2"] = _init_layer(kg, 32, 64, 16, 2)
    p["layer3"] = _init_layer(kg, 64, 128, 3, 1)
    p["layer4"] = _init_layer(kg, 128, 128, 3, 1)
    for name in ("branch1", "branch2", "branch3", "branch4"):
        p[name] = _init_conv_bn(kg, 128, 32, 1)
    p["lastconv0"] = _init_conv_bn(kg, 320, 128, 1)
    p["lastconv1_w"] = _init_conv(kg, 128, 32, 1)
    return p


# ---------------------------------------------------------------------------
# Forward pass (matches Feature._forward / Feature.forward)
# ---------------------------------------------------------------------------
def _basic_block_forward(x, blk, *, stride, padding, dilation):
    out = _conv_bn(x, blk["conv1"], k=3, stride=stride, padding=padding,
                   dilation=dilation, relu=True)
    if blk["down"] is None:
        identity = x
    else:
        identity = _conv_bn(x, blk["down"], k=1, stride=stride, relu=False)
    # conv-bn (no relu) + residual add, no final activation (BasicBlock)
    return _conv_bn(out, blk["conv2"], k=3, stride=1, padding=padding,
                    dilation=dilation, relu=False, residual=identity)


def _layer_forward(x, layer, *, stride, padding, dilation):
    x = _basic_block_forward(x, layer[0], stride=stride, padding=padding,
                             dilation=dilation)
    for blk in layer[1:]:
        x = _basic_block_forward(x, blk, stride=1, padding=padding,
                                 dilation=dilation)
    return x


def _feature_single(x_nhwc, p):
    y = x_nhwc.astype(jnp.bfloat16)
    fc = p["firstconv"]
    y = _conv_bn(y, fc[0], k=3, stride=2, padding=1, relu=True)
    y = _conv_bn(y, fc[1], k=3, stride=1, padding=1, relu=True)
    y = _conv_bn(y, fc[2], k=3, stride=1, padding=1, relu=True)     # H/2, 32
    out_2_1 = _layer_forward(y, p["layer1"], stride=1, padding=1, dilation=1)
    out_4_0 = _layer_forward(out_2_1, p["layer2"], stride=2, padding=1,
                             dilation=1)                             # H/4, 64
    out_4_1 = _layer_forward(out_4_0, p["layer3"], stride=1, padding=1,
                             dilation=1)                             # H/4, 128
    out_8 = _layer_forward(out_4_1, p["layer4"], stride=1, padding=2,
                           dilation=2)                               # H/4, 128
    h8, w8 = out_8.shape[1], out_8.shape[2]

    branches = []
    for name, k in (("branch4", 8), ("branch3", 16),
                    ("branch2", 32), ("branch1", 64)):
        b = _avg_pool(out_8, k)
        b = _conv_bn(b, p[name], k=1, stride=1, relu=True)
        b = _bilinear_align_corners(b.astype(jnp.float32), h8, w8)
        branches.append(b.astype(jnp.bfloat16))

    # torch.cat((output_4_0, output_8, branch4, branch3, branch2, branch1), 1)
    feat = jnp.concatenate([out_4_0, out_8] + branches, axis=-1)     # 320 ch
    feat = _conv_bn(feat, p["lastconv0"], k=1, stride=1, relu=True)
    return _conv1x1_plain(feat, p["lastconv1_w"])


def feature_forward(l_img_nchw, r_img_nchw, params):
    """Matches Feature.forward: (l_img, r_img) NCHW in, (l_fms, r_fms) NCHW out.
    Left/right go through separate passes so training-mode BN statistics match
    the PyTorch module."""
    def run(x):
        x = jnp.transpose(x, (0, 2, 3, 1)).astype(jnp.float32)   # NCHW -> NHWC
        y = _feature_single(x, params)
        return jnp.transpose(y, (0, 3, 1, 2))                    # NHWC -> NCHW
    return run(l_img_nchw), run(r_img_nchw)


# ---------------------------------------------------------------------------
if __name__ == "__main__":
    # 256x256 is the smallest spatial size compatible with the fixed 64x64
    # AvgPool of branch1 (output_8 is H/4 x W/4 = 64x64); batch=2 keeps the
    # training-mode BatchNorm of the 1x1 branch outputs well defined.
    B, C, H, W = 2, 3, 256, 256
    key = jax.random.PRNGKey(0)
    kl, kr = jax.random.split(key)
    l_img = jax.random.normal(kl, (B, C, H, W), jnp.float32)
    r_img = jax.random.normal(kr, (B, C, H, W), jnp.float32)

    params = init_feature_params(seed=0, in_planes=C)

    l_fms, r_fms = feature_forward(l_img, r_img, params)
    jax.block_until_ready((l_fms, r_fms))

    assert l_fms.shape == (B, 32, H // 4, W // 4), l_fms.shape
    assert r_fms.shape == (B, 32, H // 4, W // 4), r_fms.shape
    assert l_fms.dtype == jnp.float32 and r_fms.dtype == jnp.float32
    assert bool(jnp.all(jnp.isfinite(l_fms))) and bool(jnp.all(jnp.isfinite(r_fms)))
    print("KERNEL_OK")
</pallas_src>

<mosaic_0001>
module attributes {stable_mosaic.version = 11 : i64} {
  func.func @_mm_stats_kernel(%arg0: i32, %arg1: memref<1024x32xbf16, #tpu.memory_space<vmem>>, %arg2: memref<32x32xbf16, #tpu.memory_space<vmem>>, %arg3: memref<1024x32xbf16, #tpu.memory_space<vmem>>, %arg4: memref<1x2x32xf32, #tpu.memory_space<vmem>>) attributes {dimension_semantics = [#tpu.dimension_semantics<parallel>], iteration_bounds = array<i64: 32>, scalar_prefetch = 0 : i64, scratch_operands = 0 : i64, tpu.core_type = #tpu.core_type<tc>, window_params = [{transform_indices = @transform_0, window_bounds = array<i64: 1024, 32>}, {pipeline_mode = #tpu.pipeline_mode<synchronous>, transform_indices = @transform_1, window_bounds = array<i64: 32, 32>}, {transform_indices = @transform_2, window_bounds = array<i64: 1024, 32>}, {transform_indices = @transform_3, window_bounds = array<i64: 1, 2, 32>}]} {
    %c0 = arith.constant 0 : index
    %c0_0 = arith.constant 0 : index
    %0 = vector.load %arg1[%c0, %c0_0] : memref<1024x32xbf16, #tpu.memory_space<vmem>>, vector<1024x32xbf16>
    %c0_1 = arith.constant 0 : index
    %c0_2 = arith.constant 0 : index
    %1 = vector.load %arg2[%c0_1, %c0_2] : memref<32x32xbf16, #tpu.memory_space<vmem>>, vector<32x32xbf16>
    %cst = arith.constant dense<0.000000e+00> : vector<1024x32xf32>
    %2 = tpu.matmul %0, %1, %cst {dimension_numbers = #tpu.dot_dimension_numbers<[1], [0], [0], [1], [0, 0, 1, 1], [], []>} : vector<1024x32xbf16>, vector<32x32xbf16>, vector<1024x32xf32> -> vector<1024x32xf32>
    %3 = arith.truncf %2 : vector<1024x32xf32> to vector<1024x32xbf16>
    %c0_3 = arith.constant 0 : index
    %c0_4 = arith.constant 0 : index
    %4 = vector.load %arg3[%c0_3, %c0_4] : memref<1024x32xbf16, #tpu.memory_space<vmem>>, vector<1024x32xbf16>
    tpu.vector_store %arg3[%c0_3, %c0_4], %3 {strides = array<i32>} : memref<1024x32xbf16, #tpu.memory_space<vmem>>, vector<1024x32xbf16>,
    %cst_5 = arith.constant dense<0.000000e+00> : vector<32xf32>
    %5 = vector.multi_reduction <add>, %2, %cst_5 [0] : vector<1024x32xf32> to vector<32xf32>
    %6 = vector.shape_cast %5 : vector<32xf32> to vector<1x32xf32>
    %c0_6 = arith.constant 0 : index
    %c0_7 = arith.constant 0 : index
    %c0_8 = arith.constant 0 : index
    %7 = vector.load %arg4[%c0_6, %c0_7, %c0_8] : memref<1x2x32xf32, #tpu.memory_space<vmem>>, vector<1x1x32xf32>
    %8 = vector.shape_cast %7 : vector<1x1x32xf32> to vector<1x32xf32>
    %9 = vector.shape_cast %6 : vector<1x32xf32> to vector<1x1x32xf32>
    tpu.vector_store %arg4[%c0_6, %c0_7, %c0_8], %9 {strides = array<i32>} : memref<1x2x32xf32, #tpu.memory_space<vmem>>, vector<1x1x32xf32>,
    %10 = arith.mulf %2, %2 : vector<1024x32xf32>
    %cst_9 = arith.constant dense<0.000000e+00> : vector<32xf32>
    %11 = vector.multi_reduction <add>, %10, %cst_9 [0] : vector<1024x32xf32> to vector<32xf32>
    %12 = vector.shape_cast %11 : vector<32xf32> to vector<1x32xf32>
    %c0_10 = arith.constant 0 : index
    %c1 = arith.constant 1 : index
    %c0_11 = arith.constant 0 : index
    %13 = vector.load %arg4[%c0_10, %c1, %c0_11] : memref<1x2x32xf32, #tpu.memory_space<vmem>>, vector<1x1x32xf32>
    %14 = vector.shape_cast %13 : vector<1x1x32xf32> to vector<1x32xf32>
    %15 = vector.shape_cast %12 : vector<1x32xf32> to vector<1x1x32xf32>
    tpu.vector_store %arg4[%c0_10, %c1, %c0_11], %15 {strides = array<i32>} : memref<1x2x32xf32, #tpu.memory_space<vmem>>, vector<1x1x32xf32>,
    return
  }
  func.func @transform_0(%arg0: i32) -> (i32, i32) {
    %c0_i32 = arith.constant 0 : i32
    %c0_i32_0 = arith.constant 0 : i32
    return %arg0, %c0_i32 : i32, i32
  }
  func.func @transform_1(%arg0: i32) -> (i32, i32) {
    %c0_i32 = arith.constant 0 : i32
    %c0_i32_0 = arith.constant 0 : i32
    %c0_i32_1 = arith.constant 0 : i32
    return %c0_i32, %c0_i32_0 : i32, i32
  }
  func.func @transform_2(%arg0: i32) -> (i32, i32) {
    %c0_i32 = arith.constant 0 : i32
    %c0_i32_0 = arith.constant 0 : i32
    return %arg0, %c0_i32 : i32, i32
  }
  func.func @transform_3(%arg0: i32) -> (i32, i32, i32) {
    %c0_i32 = arith.constant 0 : i32
    %c0_i32_0 = arith.constant 0 : i32
    %c0_i32_1 = arith.constant 0 : i32
    return %arg0, %c0_i32, %c0_i32_0 : i32, i32, i32
  }
}

module attributes {stable_mosaic.version = 11 : i64} {
  func.func @kernel(%arg0: i32, %arg1: memref<2048x128xbf16, #tpu.memory_space<vmem>>, %arg2: memref<1x128xf32, #tpu.memory_space<vmem>>, %arg3: memref<1x128xf32, #tpu.memory_space<vmem>>, %arg4: memref<2048x128xbf16, #tpu.memory_space<vmem>>) attributes {dimension_semantics = [#tpu.dimension_semantics<parallel>], iteration_bounds = array<i64: 4>, scalar_prefetch = 0 : i64, scratch_operands = 0 : i64, tpu.core_type = #tpu.core_type<tc>, window_params = [{transform_indices = @transform_0, window_bounds = array<i64: 2048, 128>}, {pipeline_mode = #tpu.pipeline_mode<synchronous>, transform_indices = @transform_1, window_bounds = array<i64: 1, 128>}, {pipeline_mode = #tpu.pipeline_mode<synchronous>, transform_indices = @transform_2, window_bounds = array<i64: 1, 128>}, {transform_indices = @transform_3, window_bounds = array<i64: 2048, 128>}]} {
    %c0 = arith.constant 0 : index
    %c0_0 = arith.constant 0 : index
    %0 = vector.load %arg1[%c0, %c0_0] : memref<2048x128xbf16, #tpu.memory_space<vmem>>, vector<2048x128xbf16>
    %1 = arith.extf %0 : vector<2048x128xbf16> to vector<2048x128xf32>
    %c0_1 = arith.constant 0 : index
    %c0_2 = arith.constant 0 : index
    %2 = vector.load %arg2[%c0_1, %c0_2] : memref<1x128xf32, #tpu.memory_space<vmem>>, vector<1x128xf32>
    %3 = vector.broadcast %2 : vector<1x128xf32> to vector<2048x128xf32>
    %4 = arith.mulf %1, %3 : vector<2048x128xf32>
    %c0_3 = arith.constant 0 : index
    %c0_4 = arith.constant 0 : index
    %5 = vector.load %arg3[%c0_3, %c0_4] : memref<1x128xf32, #tpu.memory_space<vmem>>, vector<1x128xf32>
    %6 = vector.broadcast %5 : vector<1x128xf32> to vector<2048x128xf32>
    %7 = arith.addf %4, %6 : vector<2048x128xf32>
    %cst = arith.constant 0.000000e+00 : f32
    %8 = vector.broadcast %cst : f32 to vector<2048x128xf32>
    %9 = arith.maximumf %7, %8 : vector<2048x128xf32>
    %10 = arith.truncf %9 : vector<2048x128xf32> to vector<2048x128xbf16>
    %c0_5 = arith.constant 0 : index
    %c0_6 = arith.constant 0 : index
    %11 = vector.load %arg4[%c0_5, %c0_6] : memref<2048x128xbf16, #tpu.memory_space<vmem>>, vector<2048x128xbf16>
    tpu.vector_store %arg4[%c0_5, %c0_6], %10 {strides = array<i32>} : memref<2048x128xbf16, #tpu.memory_space<vmem>>, vector<2048x128xbf16>,
    return
  }
  func.func @transform_0(%arg0: i32) -> (i32, i32) {
    %c0_i32 = arith.constant 0 : i32
    %c0_i32_0 = arith.constant 0 : i32
    return %arg0, %c0_i32 : i32, i32
  }
  func.func @transform_1(%arg0: i32) -> (i32, i32) {
    %c0_i32 = arith.constant 0 : i32
    %c0_i32_0 = arith.constant 0 : i32
    %c0_i32_1 = arith.constant 0 : i32
    return %c0_i32, %c0_i32_0 : i32, i32
  }
  func.func @transform_2(%arg0: i32) -> (i32, i32) {
    %c0_i32 = arith.constant 0 : i32
    %c0_i32_0 = arith.constant 0 : i32
    %c0_i32_1 = arith.constant 0 : i32
    return %c0_i32, %c0_i32_0 : i32, i32
  }
  func.func @transform_3(%arg0: i32) -> (i32, i32) {
    %c0_i32 = arith.constant 0 : i32
    %c0_i32_0 = arith.constant 0 : i32
    return %arg0, %c0_i32 : i32, i32
  }
}

</mosaic_0001>

<bundles_post_ra>
// kernel: _conv3x3_strided_bn.2
= control target key start
LH: loop header
LB: loop body
LE: loop exit
PB: predicated region body
PF: predicated region fallthrough
CT: control target
= control target key end

     0   :  { %s3471_s12 = smov 0   ;;  %s4601_s0 = inlined_call_operand.vmem [shape: bf16[32768,32], index: 0, kind: input, shape index: {}]   ;;  %s4602_s1 = inlined_call_operand.vmem [shape: bf16[32,32], index: 1, kind: input, shape index: {}]   ;;  %s4603_s2 = inlined_call_operand.vmem [shape: bf16[32768,32], index: 2, kind: output, shape index: {0}]   ;;  %s4604_s3 = inlined_call_operand.vmem [shape: f32[32,2,32], index: 3, kind: output, shape index: {1}]  }
   0x1 LB: > { %s3477_s13 = sadd.s32 4294967295, %s3449_s12   ;;  %p2773_p0 = scmp.ge.s32.totalorder %s3449_s12, 1  ;;  %s3449_s12 = sphi %s3471_s12, %s14_s12  }
   0x2   : > { %p141_p1 = scmp.lt.s32.totalorder %s3449_s12, 33 }
   0x4   : > { %p142_p2 = pnand %p2773_p0, %p141_p1 }
   0x6   : > { %145 = sbr.rel (%p142_p2) target bundleno = 507 (0x1fb), region = 28 }
   0xd   : > { %v3377_v0 = vld [vmem:[%s4602_s1] sm:$0xff]   ;;  %s2774_s16 = sshll.u32 %s3477_s13, 7  ;;  %v3378_v1 = vld [vmem:[%s4602_s1 + $0x8] sm:$0xff]   ;;  %vm650_vm0 = vcmask 261120   ;;  %vm1900_vm1 = vcmask 257024   ;;  %p181_p4 = scmp.lt.s32.totalorder %s3477_s13, 31 }
   0xe   : > { %p170_p3 = scmp.lt.s32.totalorder %s2774_s16, 4095  ;;  %3233 = vmatprep.subr.bf16.mxu0 %v3377_v0  ;;  %3365 = vmatprep.subr.bf16.mxu1 %v3377_v0  ;;  %vm2290_vm2 = vcmask 253952  }
   0xf   : > { %3234 = vmatpush3.bf16.msra.mxu0 %v3377_v0  ;;  %3367 = vmatpush3.bf16.msra.mxu1 %v3377_v0  ;;  %s4624_s13 = smov (!%p181_p4, %s3477_s13), 31 }
  0x10   : > { %s4622_s16 = smov (!%p170_p3, %s2774_s16), 4095  ;;  %3235 = vmatprep.subr.bf16.mxu0 %v3378_v1  ;;  %3366 = vmatprep.subr.bf16.mxu1 %v3378_v1  ;;  %s2778_s26 = sshll.u32 %s4624_s13, 1 }
  0x11   : > { %s2775_s19 = sshll.u32 %s4622_s16, 2  ;;  %s184_s29 = scalar_lea.vmem %s4604_s3, %s2778_s26 }
  0x12   : > { %s3496_s22 = scalar_lea.vmem %s4601_s0, %s2775_s19  ;;  %s3631_s25 = scalar_lea.vmem %s4603_s2, %s2775_s19 }
  0x13   : > { %3236 = vmatpush3.bf16.msra.mxu0 %v3378_v1  ;;  %v3379_v2 = vld [vmem:[%s3496_s22] sm:$0xff]   ;;  %3368 = vmatpush3.bf16.msra.mxu1 %v3378_v1  ;;  %v3380_v3 = vld [vmem:[%s3496_s22 + $0x8] sm:$0xff]   ;;  %v3381_v4 = vld [vmem:[%s3496_s22 + $0x10] sm:$0xff]  }
  0x14   : > { %3237 = vmatprep.mubr.msk.bf16.mxu0 %vm650_vm0, %v3379_v2  ;;  %v3382_v5 = vld [vmem:[%s3496_s22 + $0x18] sm:$0xff]   ;;  %v3383_v6 = vld [vmem:[%s3496_s22 + $0x20] sm:$0xff]   ;;  %v3384_v7 = vld [vmem:[%s3496_s22 + $0x28] sm:$0xff]  }
  0x15   : > { %v3385_v8 = vld [vmem:[%s3496_s22 + $0x30] sm:$0xff]   ;;  %v3386_v9 = vld [vmem:[%s3496_s22 + $0x38] sm:$0xff]   ;;  %v3387_v10 = vld [vmem:[%s3496_s22 + $0x40] sm:$0xff]  }
  0x16   : > { %3238 = vmatmul.mubr.msk.bf16.vlgmr.msra.gmra.mrb[0].mxu0 %vm650_vm0, %v3380_v3  ;;  %v3388_v11 = vld [vmem:[%s3496_s22 + $0x48] sm:$0xff]   ;;  %v3389_v12 = vld [vmem:[%s3496_s22 + $0x50] sm:$0xff]   ;;  %v3411_v13 = vld [vmem:[%s3496_s22 + $0x100] sm:$0xff]  }
  0x17   : > { %3241 = vmatprep.mubr.msk.bf16.mxu0 %vm650_vm0, %v3381_v4  ;;  %v3412_v14 = vld [vmem:[%s3496_s22 + $0x108] sm:$0xff]   ;;  %3301 = vmatprep.mubr.msk.bf16.mxu1 %vm650_vm0, %v3411_v13  ;;  %v3413_v15 = vld [vmem:[%s3496_s22 + $0x110] sm:$0xff]   ;;  %v3390_v16 = vld [vmem:[%s3496_s22 + $0x58] sm:$0xff]  }
  0x18   : > { %3302 = vmatmul.mubr.msk.bf16.vlgmr.msra.gmra.mrb[0].mxu1 %vm650_vm0, %v3412_v14  ;;  %v3391_v17 = vld [vmem:[%s3496_s22 + $0x60] sm:$0xff]   ;;  %v3414_v18 = vld [vmem:[%s3496_s22 + $0x118] sm:$0xff]   ;;  %v3392_v20 = vld [vmem:[%s3496_s22 + $0x68] sm:$0xff]  }
  0x19   : > { %3305 = vmatprep.mubr.msk.bf16.mxu1 %vm650_vm0, %v3413_v15  ;;  %v3415_v19 = vld [vmem:[%s3496_s22 + $0x120] sm:$0xff]   ;;  %v3393_v21 = vld [vmem:[%s3496_s22 + $0x70] sm:$0xff]   ;;  %v3416_v22 = vld [vmem:[%s3496_s22 + $0x128] sm:$0xff]  }
  0x1a   : > { %v3417_v23 = vld [vmem:[%s3496_s22 + $0x130] sm:$0xff]   ;;  %v3394_v24 = vld [vmem:[%s3496_s22 + $0x78] sm:$0xff]   ;;  %v3395_v26 = vld [vmem:[%s3496_s22 + $0x80] sm:$0xff]  }
  0x1b   : > { %v3418_v25 = vld [vmem:[%s3496_s22 + $0x138] sm:$0xff]   ;;  %v3419_v27 = vld [vmem:[%s3496_s22 + $0x140] sm:$0xff]   ;;  %v3396_v28 = vld [vmem:[%s3496_s22 + $0x88] sm:$0xff]  }
  0x1c   : > { %v3420_v29 = vld [vmem:[%s3496_s22 + $0x148] sm:$0xff]   ;;  %v3397_v30 = vld [vmem:[%s3496_s22 + $0x90] sm:$0xff]   ;;  %v3398_v32 = vld [vmem:[%s3496_s22 + $0x98] sm:$0xff]  }
  0x1d   : > { %v3421_v31 = vld [vmem:[%s3496_s22 + $0x150] sm:$0xff]   ;;  %v3422_v33 = vld [vmem:[%s3496_s22 + $0x158] sm:$0xff]   ;;  %v3399_v34 = vld [vmem:[%s3496_s22 + $0xa0] sm:$0xff]  }
  0x1e   : > { %3242 = vmatmul.mubr.msk.bf16.gmra.mrb[4].mxu0 %vm650_vm0, %v3382_v5  ;;  %v3423_v35 = vld [vmem:[%s3496_s22 + $0x160] sm:$0xff]   ;;  %v3400_v36 = vld [vmem:[%s3496_s22 + $0xa8] sm:$0xff]   ;;  %v3401_v38 = vld [vmem:[%s3496_s22 + $0xb0] sm:$0xff]  }
  0x1f   : > { %3245 = vmatprep.mubr.msk.bf16.mxu0 %vm650_vm0, %v3383_v6  ;;  %v3424_v37 = vld [vmem:[%s3496_s22 + $0x168] sm:$0xff]   ;;  %v3425_v39 = vld [vmem:[%s3496_s22 + $0x170] sm:$0xff]   ;;  %v3402_v40 = vld [vmem:[%s3496_s22 + $0xb8] sm:$0xff]  }
  0x20   : > { %3306 = vmatmul.mubr.msk.bf16.gmra.mrb[4].mxu1 %vm650_vm0, %v3414_v18  ;;  %v3426_v41 = vld [vmem:[%s3496_s22 + $0x178] sm:$0xff]   ;;  %v3403_v42 = vld [vmem:[%s3496_s22 + $0xc0] sm:$0xff]   ;;  %v3404_v44 = vld [vmem:[%s3496_s22 + $0xc8] sm:$0xff]  }
  0x21   : > { %3309 = vmatprep.mubr.msk.bf16.mxu1 %vm650_vm0, %v3415_v19  ;;  %v3427_v43 = vld [vmem:[%s3496_s22 + $0x180] sm:$0xff]   ;;  %v3428_v45 = vld [vmem:[%s3496_s22 + $0x188] sm:$0xff]   ;;  %v3405_v46 = vld [vmem:[%s3496_s22 + $0xd0] sm:$0xff]  }
  0x22   : > { %v3429_v47 = vld [vmem:[%s3496_s22 + $0x190] sm:$0xff]   ;;  %v3406_v48 = vld [vmem:[%s3496_s22 + $0xd8] sm:$0xff]   ;;  %v3407_v50 = vld [vmem:[%s3496_s22 + $0xe0] sm:$0xff]  }
  0x23   : > { %v3430_v49 = vld [vmem:[%s3496_s22 + $0x198] sm:$0xff]   ;;  %v3431_v51 = vld [vmem:[%s3496_s22 + $0x1a0] sm:$0xff]   ;;  %v3408_v52 = vld [vmem:[%s3496_s22 + $0xe8] sm:$0xff]  }
  0x24   : > { %v3432_v53 = vld [vmem:[%s3496_s22 + $0x1a8] sm:$0xff]   ;;  %v3409_v54 = vld [vmem:[%s3496_s22 + $0xf0] sm:$0xff]   ;;  %v3410_v56 = vld [vmem:[%s3496_s22 + $0xf8] sm:$0xff]  }
  0x25   : > { %v3433_v55 = vld [vmem:[%s3496_s22 + $0x1b0] sm:$0xff]   ;;  %v3434_v57 = vld [vmem:[%s3496_s22 + $0x1b8] sm:$0xff]   ;;  %v3435_v58 = vld [vmem:[%s3496_s22 + $0x1c0] sm:$0xff]  }
  0x26   : > { %3246 = vmatmul.mubr.msk.bf16.gmra.mrb[8].mxu0 %vm650_vm0, %v3384_v7  ;;  %v3436_v59 = vld [vmem:[%s3496_s22 + $0x1c8] sm:$0xff]   ;;  %v3437_v60 = vld [vmem:[%s3496_s22 + $0x1d0] sm:$0xff]   ;;  %v3438_v61 = vld [vmem:[%s3496_s22 + $0x1d8] sm:$0xff]  }
  0x27   : > { %3249 = vmatprep.mubr.msk.bf16.mxu0 %vm650_vm0, %v3385_v8  ;;  %v3439_v62 = vld [vmem:[%s3496_s22 + $0x1e0] sm:$0xff]   ;;  %v3440_v63 = vld [vmem:[%s3496_s22 + $0x1e8] sm:$0xff]   ;;  %v3441_v0 = vld [vmem:[%s3496_s22 + $0x1f0] sm:$0xff]  }
  0x28   : > { %3310 = vmatmul.mubr.msk.bf16.gmra.mrb[8].mxu1 %vm650_vm0, %v3416_v22  ;;  %v3442_v1 = vld [vmem:[%s3496_s22 + $0x1f8] sm:$0xff]  }
  0x29   : > { %3313 = vmatprep.mubr.msk.bf16.mxu1 %vm650_vm0, %v3417_v23 }
  0x2e   : > { %3250 = vmatmul.mubr.msk.bf16.gmra.mrb[12].mxu0 %vm650_vm0, %v3386_v9 }
  0x2f   : > { %3253 = vmatprep.mubr.msk.bf16.mxu0 %vm650_vm0, %v3387_v10 }
  0x30   : > { %3314 = vmatmul.mubr.msk.bf16.gmra.mrb[12].mxu1 %vm650_vm0, %v3418_v25 }
  0x31   : > { %3317 = vmatprep.mubr.msk.bf16.mxu1 %vm650_vm0, %v3419_v27 }
  0x36   : > { %3254 = vmatmul.mubr.msk.bf16.gmra.mrb[16].mxu0 %vm650_vm0, %v3388_v11 }
  0x37   : > { %3257 = vmatprep.mubr.msk.bf16.mxu0 %vm650_vm0, %v3389_v12 }
  0x38   : > { %3318 = vmatmul.mubr.msk.bf16.gmra.mrb[16].mxu1 %vm650_vm0, %v3420_v29 }
  0x39   : > { %3321 = vmatprep.mubr.msk.bf16.mxu1 %vm650_vm0, %v3421_v31 }
  0x3e   : > { %3258 = vmatmul.mubr.msk.bf16.gmra.mrb[20].mxu0 %vm650_vm0, %v3390_v16 }
  0x3f   : > { %3261 = vmatprep.mubr.msk.bf16.mxu0 %vm650_vm0, %v3391_v17 }
  0x40   : > { %3322 = vmatmul.mubr.msk.bf16.gmra.mrb[20].mxu1 %vm650_vm0, %v3422_v33 }
  0x41   : > { %3325 = vmatprep.mubr.msk.bf16.mxu1 %vm650_vm0, %v3423_v35 }
  0x46   : > { %3262 = vmatmul.mubr.msk.bf16.gmra.mrb[24].mxu0 %vm650_vm0, %v3392_v20 }
  0x47   : > { %3265 = vmatprep.mubr.msk.bf16.mxu0 %vm650_vm0, %v3393_v21 }
  0x48   : > { %3326 = vmatmul.mubr.msk.bf16.gmra.mrb[24].mxu1 %vm650_vm0, %v3424_v37 }
  0x49   : > { %3329 = vmatprep.mubr.msk.bf16.mxu1 %vm650_vm0, %v3425_v39 }
  0x4e   : > { %3266 = vmatmul.mubr.msk.bf16.gmra.mrb[28].mxu0 %vm650_vm0, %v3394_v24 }
  0x4f   : > { %3269 = vmatprep.mubr.msk.bf16.mxu0 %vm650_vm0, %v3395_v26 }
  0x50   : > { %3330 = vmatmul.mubr.msk.bf16.gmra.mrb[28].mxu1 %vm650_vm0, %v3426_v41 }
  0x51   : > { %3333 = vmatprep.mubr.msk.bf16.mxu1 %vm650_vm0, %v3427_v43 }
  0x56   : > { %3270 = vmatmul.mubr.msk.bf16.gmra.mrb[32].mxu0 %vm650_vm0, %v3396_v28 }
  0x57   : > { %3273 = vmatprep.mubr.msk.bf16.mxu0 %vm650_vm0, %v3397_v30 }
  0x58   : > { %3334 = vmatmul.mubr.msk.bf16.gmra.mrb[32].mxu1 %vm650_vm0, %v3428_v45 }
  0x59   : > { %3337 = vmatprep.mubr.msk.bf16.mxu1 %vm650_vm0, %v3429_v47 }
  0x5e   : > { %3274 = vmatmul.mubr.msk.bf16.gmra.mrb[36].mxu0 %vm650_vm0, %v3398_v32 }
  0x5f   : > { %3277 = vmatprep.mubr.msk.bf16.mxu0 %vm650_vm0, %v3399_v34 }
  0x60   : > { %3338 = vmatmul.mubr.msk.bf16.gmra.mrb[36].mxu1 %vm650_vm0, %v3430_v49 }
  0x61   : > { %3341 = vmatprep.mubr.msk.bf16.mxu1 %vm650_vm0, %v3431_v51 }
  0x66   : > { %3278 = vmatmul.mubr.msk.bf16.gmra.mrb[40].mxu0 %vm650_vm0, %v3400_v36 }
  0x67   : > { %3281 = vmatprep.mubr.msk.bf16.mxu0 %vm650_vm0, %v3401_v38 }
  0x68   : > { %3342 = vmatmul.mubr.msk.bf16.gmra.mrb[40].mxu1 %vm650_vm0, %v3432_v53 }
  0x69   : > { %3345 = vmatprep.mubr.msk.bf16.mxu1 %vm650_vm0, %v3433_v55 }
  0x6e   : > { %3282 = vmatmul.mubr.msk.bf16.gmra.mrb[44].mxu0 %vm650_vm0, %v3402_v40 }
  0x6f   : > { %3285 = vmatprep.mubr.msk.bf16.mxu0 %vm650_vm0, %v3403_v42 }
  0x70   : > { %3346 = vmatmul.mubr.msk.bf16.gmra.mrb[44].mxu1 %vm650_vm0, %v3434_v57 }
  0x71   : > { %3349 = vmatprep.mubr.msk.bf16.mxu1 %vm650_vm0, %v3435_v58 }
  0x76   : > { %3286 = vmatmul.mubr.msk.bf16.gmra.mrb[48].mxu0 %vm650_vm0, %v3404_v44 }
  0x77   : > { %3289 = vmatprep.mubr.msk.bf16.mxu0 %vm650_vm0, %v3405_v46 }
  0x78   : > { %3350 = vmatmul.mubr.msk.bf16.gmra.mrb[48].mxu1 %vm650_vm0, %v3436_v59 }
  0x79   : > { %3353 = vmatprep.mubr.msk.bf16.mxu1 %vm650_vm0, %v3437_v60 }
  0x7e   : > { %3290 = vmatmul.mubr.msk.bf16.gmra.mrb[52].mxu0 %vm650_vm0, %v3406_v48 }
  0x7f   : > { %3293 = vmatprep.mubr.msk.bf16.mxu0 %vm650_vm0, %v3407_v50 }
  0x80   : > { %3354 = vmatmul.mubr.msk.bf16.gmra.mrb[52].mxu1 %vm650_vm0, %v3438_v61 }
  0x81   : > { %3357 = vmatprep.mubr.msk.bf16.mxu1 %vm650_vm0, %v3439_v62 }
  0x86   : > { %3294 = vmatmul.mubr.msk.bf16.gmra.mrb[56].mxu0 %vm650_vm0, %v3408_v52 }
  0x87   : > { %3297 = vmatprep.mubr.msk.bf16.mxu0 %vm650_vm0, %v3409_v54 }
  0x88   : > { %3358 = vmatmul.mubr.msk.bf16.gmra.mrb[56].mxu1 %vm650_vm0, %v3440_v63 }
  0x89   : > { %3361 = vmatprep.mubr.msk.bf16.mxu1 %vm650_vm0, %v3441_v0 }
  0x8e   : > { %3298 = vmatmul.mubr.msk.bf16.gmra.mrb[60].mxu0 %vm650_vm0, %v3410_v56 }
  0x90   : > { %3362 = vmatmul.mubr.msk.bf16.gmra.mrb[60].mxu1 %vm650_vm0, %v3442_v1 }
  0xe9   : > { %v3239_v2 = vpop.f32.mrb[0].mxu0 }
  0xea   : > { %v3041_v3 = vpack.c.bf16 %v3239_v2, %v3239_v2  ;;  %v877_v4 = vpop.f32.mrb[1].mxu0  ;;  %v2294_v8 = vmul.f32 %v3239_v2, %v3239_v2  ;;  %v2032_v17 = vsel %vm650_vm0, %v3239_v2, 0.0 }
  0xeb   : > { %v3039_v5 = vpack.c.bf16 %v877_v4, %v877_v4  ;;  %v2292_v6 = vmul.f32 %v877_v4, %v877_v4  ;;  %v3240_v7 = vpop.f32.mrb[2].mxu0  ;;  %v2029_v11 = vsel %vm650_vm0, %v877_v4, 0.0 }
  0xec   : > { %1903 = vst.msk [vmem:[%s3631_s25 + $0x8] sm:$0xf] %vm1900_vm1, %v3041_v3  ;;  %v3042_v9 = vpack.c.bf16 %v3240_v7, %v3240_v7  ;;  %v880_v10 = vpop.f32.mrb[3].mxu0  ;;  %v2295_v15 = vmul.f32 %v3240_v7, %v3240_v7  ;;  %v2423_v22 = vsel %vm650_vm0, %v2294_v8, 0.0  ;;  %v2034_v24 = vsel %vm650_vm0, %v3240_v7, 0.0 }
  0xed   : > { %1901 = vst.msk [vmem:[%s3631_s25] sm:$0xf] %vm1900_vm1, %v3039_v5  ;;  %v3040_v12 = vpack.c.bf16 %v880_v10, %v880_v10  ;;  %v2030_v13 = vsel %vm650_vm0, %v880_v10, 0.0  ;;  %v2293_v14 = vmul.f32 %v880_v10, %v880_v10  ;;  %v2420_v18 = vsel %vm650_vm0, %v2292_v6, 0.0 }
  0xee   : > { %1904 = vst.msk [vmem:[%s3631_s25 + $0xc] sm:$0xf] %vm1900_vm1, %v3042_v9  ;;  %v2031_v16 = vadd.f32 %v2030_v13, %v2029_v11  ;;  %v2425_v25 = vsel %vm650_vm0, %v2295_v15, 0.0 }
  0xef   : > { %1902 = vst.msk [vmem:[%s3631_s25 + $0x4] sm:$0xf] %vm1900_vm1, %v3040_v12  ;;  %v2421_v19 = vsel %vm650_vm0, %v2293_v14, 0.0 }
  0xf0   : > { %v2033_v20 = vadd.f32 %v2032_v17, %v2031_v16  ;;  %v2422_v21 = vadd.f32 %v2421_v19, %v2420_v18 }
  0xf1   : > { %v3243_v23 = vpop.f32.mrb[4].mxu0 }
  0xf2   : > { %v2424_v26 = vadd.f32 %v2423_v22, %v2422_v21  ;;  %v3045_v27 = vpack.c.bf16 %v3243_v23, %v3243_v23  ;;  %v893_v28 = vpop.f32.mrb[5].mxu0  ;;  %v2035_v30 = vadd.f32 %v2034_v24, %v2033_v20  ;;  %v2298_v40 = vmul.f32 %v3243_v23, %v3243_v23 }
  0xf3   : > { %v3043_v29 = vpack.c.bf16 %v893_v28, %v893_v28  ;;  %v2036_v31 = vsel %vm650_vm0, %v893_v28, 0.0  ;;  %v2296_v32 = vmul.f32 %v893_v28, %v893_v28  ;;  %v3244_v33 = vpop.f32.mrb[6].mxu0  ;;  %v2040_v45 = vsel %vm650_vm0, %v3243_v23, 0.0 }
  0xf4   : > { %1907 = vst.msk [vmem:[%s3631_s25 + $0x18] sm:$0xf] %vm1900_vm1, %v3045_v27  ;;  %v2426_v34 = vadd.f32 %v2425_v25, %v2424_v26  ;;  %v3046_v35 = vpack.c.bf16 %v3244_v33, %v3244_v33  ;;  %v896_v36 = vpop.f32.mrb[7].mxu0  ;;  %v2037_v37 = vadd.f32 %v2036_v31, %v2035_v30  ;;  %v2299_v46 = vmul.f32 %v3244_v33, %v3244_v33 }
  0xf5   : > { %1905 = vst.msk [vmem:[%s3631_s25 + $0x10] sm:$0xf] %vm1900_vm1, %v3043_v29  ;;  %v2427_v38 = vsel %vm650_vm0, %v2296_v32, 0.0  ;;  %v3044_v39 = vpack.c.bf16 %v896_v36, %v896_v36  ;;  %v2038_v42 = vsel %vm650_vm0, %v896_v36, 0.0  ;;  %v2297_v43 = vmul.f32 %v896_v36, %v896_v36 }
  0xf6   : > { %v2428_v41 = vadd.f32 %v2427_v38, %v2426_v34  ;;  %1908 = vst.msk [vmem:[%s3631_s25 + $0x1c] sm:$0xf] %vm1900_vm1, %v3046_v35  ;;  %v2039_v44 = vadd.f32 %v2038_v42, %v2037_v37  ;;  %v2431_v51 = vsel %vm650_vm0, %v2298_v40, 0.0  ;;  %v2042_v52 = vsel %vm650_vm0, %v3244_v33, 0.0 }
  0xf7   : > { %1906 = vst.msk [vmem:[%s3631_s25 + $0x14] sm:$0xf] %vm1900_vm1, %v3044_v39  ;;  %v2429_v47 = vsel %vm650_vm0, %v2297_v43, 0.0  ;;  %v2433_v60 = vsel %vm650_vm0, %v2299_v46, 0.0  ;;  %v3694_v43 = vpop.f32.mrb[0].mxu1 }
  0xf8   : > { %v2041_v48 = vadd.f32 %v2040_v45, %v2039_v44  ;;  %v2430_v49 = vadd.f32 %v2429_v47, %v2428_v41 }
  0xf9   : > { %v3247_v50 = vpop.f32.mrb[8].mxu0 }
  0xfa   : > { %v3049_v53 = vpack.c.bf16 %v3247_v50, %v3247_v50  ;;  %v909_v54 = vpop.f32.mrb[9].mxu0  ;;  %v2432_v55 = vadd.f32 %v2431_v51, %v2430_v49  ;;  %v2043_v57 = vadd.f32 %v2042_v52, %v2041_v48  ;;  %v2302_v3 = vmul.f32 %v3247_v50, %v3247_v50  ;;  %v3700_v49 = vpop.f32.mrb[1].mxu1 }
  0xfb   : > { %v3047_v56 = vpack.c.bf16 %v909_v54, %v909_v54  ;;  %v2044_v58 = vsel %vm650_vm0, %v909_v54, 0.0  ;;  %v3248_v59 = vpop.f32.mrb[10].mxu0  ;;  %v2300_v61 = vmul.f32 %v909_v54, %v909_v54  ;;  %v2048_v9 = vsel %vm650_vm0, %v3247_v50, 0.0 }
  0xfc   : > { %1911 = vst.msk [vmem:[%s3631_s25 + $0x28] sm:$0xf] %vm1900_vm1, %v3049_v53  ;;  %v3050_v62 = vpack.c.bf16 %v3248_v59, %v3248_v59  ;;  %v912_v63 = vpop.f32.mrb[11].mxu0  ;;  %v2045_v0 = vadd.f32 %v2044_v58, %v2043_v57  ;;  %v2434_v1 = vadd.f32 %v2433_v60, %v2432_v55  ;;  %v2303_v10 = vmul.f32 %v3248_v59, %v3248_v59  ;;  %v3703_v55 = vpop.f32.mrb[2].mxu1 }
  0xfd   : > { %1909 = vst.msk [vmem:[%s3631_s25 + $0x20] sm:$0xf] %vm1900_vm1, %v3047_v56  ;;  %v3048_v2 = vpack.c.bf16 %v912_v63, %v912_v63  ;;  %v2435_v4 = vsel %vm650_vm0, %v2300_v61, 0.0  ;;  %v2046_v5 = vsel %vm650_vm0, %v912_v63, 0.0  ;;  %v2301_v6 = vmul.f32 %v912_v63, %v912_v63  ;;  %v3710_v60 = vpop.f32.mrb[3].mxu1 }
  0xfe   : > { %1912 = vst.msk [vmem:[%s3631_s25 + $0x2c] sm:$0xf] %vm1900_vm1, %v3050_v62  ;;  %v2436_v7 = vadd.f32 %v2435_v4, %v2434_v1  ;;  %v2047_v8 = vadd.f32 %v2046_v5, %v2045_v0  ;;  %v2439_v15 = vsel %vm650_vm0, %v2302_v3, 0.0  ;;  %v2050_v16 = vsel %vm650_vm0, %v3248_v59, 0.0 }
  0xff   : > { %1910 = vst.msk [vmem:[%s3631_s25 + $0x24] sm:$0xf] %vm1900_vm1, %v3048_v2  ;;  %v2437_v11 = vsel %vm650_vm0, %v2301_v6, 0.0  ;;  %v2441_v24 = vsel %vm650_vm0, %v2303_v10, 0.0  ;;  %v3105_v48 = vpack.c.bf16 %v3694_v43, %v3694_v43 }
 0x100   : > { %v2049_v12 = vadd.f32 %v2048_v9, %v2047_v8  ;;  %v2438_v13 = vadd.f32 %v2437_v11, %v2436_v7  ;;  %v3103_v9 = vpack.c.bf16 %v3700_v49, %v3700_v49 }
 0x101   : > { %v3251_v14 = vpop.f32.mrb[12].mxu0  ;;  %1967 = vst.msk [vmem:[%s3631_s25 + $0x108] sm:$0xf] %vm1900_vm1, %v3105_v48 }
 0x102   : > { %v3053_v17 = vpack.c.bf16 %v3251_v14, %v3251_v14  ;;  %v925_v18 = vpop.f32.mrb[13].mxu0  ;;  %v2440_v19 = vadd.f32 %v2439_v15, %v2438_v13  ;;  %v2051_v21 = vadd.f32 %v2050_v16, %v2049_v12  ;;  %v2306_v31 = vmul.f32 %v3251_v14, %v3251_v14  ;;  %1965 = vst.msk [vmem:[%s3631_s25 + $0x100] sm:$0xf] %vm1900_vm1, %v3103_v9 }
 0x103   : > { %v3051_v20 = vpack.c.bf16 %v925_v18, %v925_v18  ;;  %v2052_v22 = vsel %vm650_vm0, %v925_v18, 0.0  ;;  %v3252_v23 = vpop.f32.mrb[14].mxu0  ;;  %v2304_v25 = vmul.f32 %v925_v18, %v925_v18  ;;  %v2056_v37 = vsel %vm650_vm0, %v3251_v14, 0.0  ;;  %v3726_v14 = vpop.f32.mrb[4].mxu1 }
 0x104   : > { %1915 = vst.msk [vmem:[%s3631_s25 + $0x38] sm:$0xf] %vm1900_vm1, %v3053_v17  ;;  %v3054_v26 = vpack.c.bf16 %v3252_v23, %v3252_v23  ;;  %v928_v27 = vpop.f32.mrb[15].mxu0  ;;  %v2053_v28 = vadd.f32 %v2052_v22, %v2051_v21  ;;  %v2442_v29 = vadd.f32 %v2441_v24, %v2440_v19  ;;  %v2307_v38 = vmul.f32 %v3252_v23, %v3252_v23  ;;  %v3732_v19 = vpop.f32.mrb[5].mxu1 }
 0x105   : > { %1913 = vst.msk [vmem:[%s3631_s25 + $0x30] sm:$0xf] %vm1900_vm1, %v3051_v20  ;;  %v3052_v30 = vpack.c.bf16 %v928_v27, %v928_v27  ;;  %v2443_v32 = vsel %vm650_vm0, %v2304_v25, 0.0  ;;  %v2054_v33 = vsel %vm650_vm0, %v928_v27, 0.0  ;;  %v2305_v34 = vmul.f32 %v928_v27, %v928_v27  ;;  %v3737_v25 = vpop.f32.mrb[6].mxu1 }
 0x106   : > { %1916 = vst.msk [vmem:[%s3631_s25 + $0x3c] sm:$0xf] %vm1900_vm1, %v3054_v26  ;;  %v2444_v35 = vadd.f32 %v2443_v32, %v2442_v29  ;;  %v2055_v36 = vadd.f32 %v2054_v33, %v2053_v28  ;;  %v2447_v44 = vsel %vm650_vm0, %v2306_v31, 0.0  ;;  %v2058_v45 = vsel %vm650_vm0, %v3252_v23, 0.0 }
 0x107   : > { %1914 = vst.msk [vmem:[%s3631_s25 + $0x34] sm:$0xf] %vm1900_vm1, %v3052_v30  ;;  %v2445_v39 = vsel %vm650_vm0, %v2305_v34, 0.0  ;;  %v2449_v56 = vsel %vm650_vm0, %v2307_v38, 0.0  ;;  %v3106_v13 = vpack.c.bf16 %v3703_v55, %v3703_v55  ;;  %v3742_v30 = vpop.f32.mrb[7].mxu1  ;;  %v3109_v48 = vpack.c.bf16 %v3726_v14, %v3726_v14 }
 0x108   : > { %v2057_v40 = vadd.f32 %v2056_v37, %v2055_v36  ;;  %v2446_v41 = vadd.f32 %v2445_v39, %v2444_v35 }
 0x109   : > { %v3255_v42 = vpop.f32.mrb[16].mxu0  ;;  %1968 = vst.msk [vmem:[%s3631_s25 + $0x10c] sm:$0xf] %vm1900_vm1, %v3106_v13  ;;  %1971 = vst.msk [vmem:[%s3631_s25 + $0x118] sm:$0xf] %vm1900_vm1, %v3109_v48 }
 0x10a   : > { %v3057_v46 = vpack.c.bf16 %v3255_v42, %v3255_v42  ;;  %v941_v47 = vpop.f32.mrb[17].mxu0  ;;  %v2448_v50 = vadd.f32 %v2447_v44, %v2446_v41  ;;  %v2059_v52 = vadd.f32 %v2058_v45, %v2057_v40  ;;  %v2310_v0 = vmul.f32 %v3255_v42, %v3255_v42 }
 0x10b   : > { %v3055_v51 = vpack.c.bf16 %v941_v47, %v941_v47  ;;  %v2060_v53 = vsel %vm650_vm0, %v941_v47, 0.0  ;;  %v3256_v54 = vpop.f32.mrb[18].mxu0  ;;  %v2308_v57 = vmul.f32 %v941_v47, %v941_v47  ;;  %v2064_v6 = vsel %vm650_vm0, %v3255_v42, 0.0 }
 0x10c   : > { %1919 = vst.msk [vmem:[%s3631_s25 + $0x48] sm:$0xf] %vm1900_vm1, %v3057_v46  ;;  %v3058_v58 = vpack.c.bf16 %v3256_v54, %v3256_v54  ;;  %v944_v59 = vpop.f32.mrb[19].mxu0  ;;  %v2061_v61 = vadd.f32 %v2060_v53, %v2059_v52  ;;  %v2450_v62 = vadd.f32 %v2449_v56, %v2448_v50  ;;  %v2311_v7 = vmul.f32 %v3256_v54, %v3256_v54  ;;  %v3758_v50 = vpop.f32.mrb[8].mxu1 }
 0x10d   : > { %1917 = vst.msk [vmem:[%s3631_s25 + $0x40] sm:$0xf] %vm1900_vm1, %v3055_v51  ;;  %v3056_v63 = vpack.c.bf16 %v944_v59, %v944_v59  ;;  %v2451_v1 = vsel %vm650_vm0, %v2308_v57, 0.0  ;;  %v2062_v2 = vsel %vm650_vm0, %v944_v59, 0.0  ;;  %v2309_v3 = vmul.f32 %v944_v59, %v944_v59  ;;  %v3764_v56 = vpop.f32.mrb[9].mxu1 }
 0x10e   : > { %1920 = vst.msk [vmem:[%s3631_s25 + $0x4c] sm:$0xf] %vm1900_vm1, %v3058_v58  ;;  %v2452_v4 = vadd.f32 %v2451_v1, %v2450_v62  ;;  %v2063_v5 = vadd.f32 %v2062_v2, %v2061_v61  ;;  %v2455_v15 = vsel %vm650_vm0, %v2310_v0, 0.0  ;;  %v2066_v16 = vsel %vm650_vm0, %v3256_v54, 0.0 }
 0x10f   : > { %1918 = vst.msk [vmem:[%s3631_s25 + $0x44] sm:$0xf] %vm1900_vm1, %v3056_v63  ;;  %v2453_v8 = vsel %vm650_vm0, %v2309_v3, 0.0  ;;  %v2457_v26 = vsel %vm650_vm0, %v2311_v7, 0.0  ;;  %v3104_v44 = vpack.c.bf16 %v3710_v60, %v3710_v60  ;;  %v3769_v63 = vpop.f32.mrb[10].mxu1 }
 0x110   : > { %v2065_v10 = vadd.f32 %v2064_v6, %v2063_v5  ;;  %v2454_v11 = vadd.f32 %v2453_v8, %v2452_v4  ;;  %v3774_v4 = vpop.f32.mrb[11].mxu1 }
 0x111   : > { %v3259_v12 = vpop.f32.mrb[20].mxu0  ;;  %1966 = vst.msk [vmem:[%s3631_s25 + $0x104] sm:$0xf] %vm1900_vm1, %v3104_v44 }
 0x112   : > { %v3061_v17 = vpack.c.bf16 %v3259_v12, %v3259_v12  ;;  %v957_v18 = vpop.f32.mrb[21].mxu0  ;;  %v2456_v20 = vadd.f32 %v2455_v15, %v2454_v11  ;;  %v2067_v22 = vadd.f32 %v2066_v16, %v2065_v10  ;;  %v2314_v34 = vmul.f32 %v3259_v12, %v3259_v12 }
 0x113   : > { %v3059_v21 = vpack.c.bf16 %v957_v18, %v957_v18  ;;  %v2068_v23 = vsel %vm650_vm0, %v957_v18, 0.0  ;;  %v3260_v24 = vpop.f32.mrb[22].mxu0  ;;  %v2312_v27 = vmul.f32 %v957_v18, %v957_v18  ;;  %v2072_v40 = vsel %vm650_vm0, %v3259_v12, 0.0 }
 0x114   : > { %1923 = vst.msk [vmem:[%s3631_s25 + $0x58] sm:$0xf] %vm1900_vm1, %v3061_v17  ;;  %v3062_v28 = vpack.c.bf16 %v3260_v24, %v3260_v24  ;;  %v960_v29 = vpop.f32.mrb[23].mxu0  ;;  %v2069_v31 = vadd.f32 %v2068_v23, %v2067_v22  ;;  %v2458_v32 = vadd.f32 %v2457_v26, %v2456_v20  ;;  %v2315_v41 = vmul.f32 %v3260_v24, %v3260_v24 }
 0x115   : > { %1921 = vst.msk [vmem:[%s3631_s25 + $0x50] sm:$0xf] %vm1900_vm1, %v3059_v21  ;;  %v3060_v33 = vpack.c.bf16 %v960_v29, %v960_v29  ;;  %v2459_v35 = vsel %vm650_vm0, %v2312_v27, 0.0  ;;  %v2070_v36 = vsel %vm650_vm0, %v960_v29, 0.0  ;;  %v2313_v37 = vmul.f32 %v960_v29, %v960_v29 }
 0x116   : > { %1924 = vst.msk [vmem:[%s3631_s25 + $0x5c] sm:$0xf] %vm1900_vm1, %v3062_v28  ;;  %v2460_v38 = vadd.f32 %v2459_v35, %v2458_v32  ;;  %v2071_v39 = vadd.f32 %v2070_v36, %v2069_v31  ;;  %v2463_v51 = vsel %vm650_vm0, %v2314_v34, 0.0  ;;  %v2074_v52 = vsel %vm650_vm0, %v3260_v24, 0.0  ;;  %v3790_v24 = vpop.f32.mrb[12].mxu1 }
 0x117   : > { %1922 = vst.msk [vmem:[%s3631_s25 + $0x54] sm:$0xf] %vm1900_vm1, %v3060_v33  ;;  %v2461_v42 = vsel %vm650_vm0, %v2313_v37, 0.0  ;;  %v2465_v0 = vsel %vm650_vm0, %v2315_v41, 0.0  ;;  %v3107_v18 = vpack.c.bf16 %v3732_v19, %v3732_v19  ;;  %v3110_v23 = vpack.c.bf16 %v3737_v25, %v3737_v25  ;;  %v3796_v31 = vpop.f32.mrb[13].mxu1 }
 0x118   : > { %v2073_v45 = vadd.f32 %v2072_v40, %v2071_v39  ;;  %v2462_v46 = vadd.f32 %v2461_v42, %v2460_v38  ;;  %v3801_v37 = vpop.f32.mrb[14].mxu1 }
 0x119   : > { %v3263_v47 = vpop.f32.mrb[24].mxu0  ;;  %1969 = vst.msk [vmem:[%s3631_s25 + $0x110] sm:$0xf] %vm1900_vm1, %v3107_v18  ;;  %1972 = vst.msk [vmem:[%s3631_s25 + $0x11c] sm:$0xf] %vm1900_vm1, %v3110_v23  ;;  %v3806_v42 = vpop.f32.mrb[15].mxu1 }
 0x11a   : > { %v3065_v53 = vpack.c.bf16 %v3263_v47, %v3263_v47  ;;  %v973_v54 = vpop.f32.mrb[25].mxu0  ;;  %v2464_v57 = vadd.f32 %v2463_v51, %v2462_v46  ;;  %v2075_v59 = vadd.f32 %v2074_v52, %v2073_v45  ;;  %v2318_v8 = vmul.f32 %v3263_v47, %v3263_v47 }
 0x11b   : > { %v3063_v58 = vpack.c.bf16 %v973_v54, %v973_v54  ;;  %v2076_v61 = vsel %vm650_vm0, %v973_v54, 0.0  ;;  %v3264_v62 = vpop.f32.mrb[26].mxu0  ;;  %v2316_v1 = vmul.f32 %v973_v54, %v973_v54  ;;  %v2080_v15 = vsel %vm650_vm0, %v3263_v47, 0.0 }
 0x11c   : > { %1927 = vst.msk [vmem:[%s3631_s25 + $0x68] sm:$0xf] %vm1900_vm1, %v3065_v53  ;;  %v3066_v2 = vpack.c.bf16 %v3264_v62, %v3264_v62  ;;  %v976_v3 = vpop.f32.mrb[27].mxu0  ;;  %v2077_v5 = vadd.f32 %v2076_v61, %v2075_v59  ;;  %v2466_v6 = vadd.f32 %v2465_v0, %v2464_v57  ;;  %v2319_v16 = vmul.f32 %v3264_v62, %v3264_v62 }
 0x11d   : > { %1925 = vst.msk [vmem:[%s3631_s25 + $0x60] sm:$0xf] %vm1900_vm1, %v3063_v58  ;;  %v3064_v7 = vpack.c.bf16 %v976_v3, %v976_v3  ;;  %v2467_v9 = vsel %vm650_vm0, %v2316_v1, 0.0  ;;  %v2078_v10 = vsel %vm650_vm0, %v976_v3, 0.0  ;;  %v2317_v11 = vmul.f32 %v976_v3, %v976_v3  ;;  %v3822_v3 = vpop.f32.mrb[16].mxu1 }
 0x11e   : > { %1928 = vst.msk [vmem:[%s3631_s25 + $0x6c] sm:$0xf] %vm1900_vm1, %v3066_v2  ;;  %v2468_v12 = vadd.f32 %v2467_v9, %v2466_v6  ;;  %v2079_v13 = vadd.f32 %v2078_v10, %v2077_v5  ;;  %v2471_v26 = vsel %vm650_vm0, %v2318_v8, 0.0  ;;  %v2082_v27 = vsel %vm650_vm0, %v3264_v62, 0.0  ;;  %v3828_v9 = vpop.f32.mrb[17].mxu1 }
 0x11f   : > { %1926 = vst.msk [vmem:[%s3631_s25 + $0x64] sm:$0xf] %vm1900_vm1, %v3064_v7  ;;  %v2469_v17 = vsel %vm650_vm0, %v2317_v11, 0.0  ;;  %v2473_v38 = vsel %vm650_vm0, %v2319_v16, 0.0  ;;  %v3108_v61 = vpack.c.bf16 %v3742_v30, %v3742_v30  ;;  %v3113_v2 = vpack.c.bf16 %v3758_v50, %v3758_v50  ;;  %v3833_v16 = vpop.f32.mrb[18].mxu1 }
 0x120   : > { %v2081_v20 = vadd.f32 %v2080_v15, %v2079_v13  ;;  %v2470_v21 = vadd.f32 %v2469_v17, %v2468_v12  ;;  %4613 = vst [vmem:[#allocation2_spill] sm:$0xff] %v3833_v16 }
 0x121   : > { %v3267_v22 = vpop.f32.mrb[28].mxu0  ;;  %1970 = vst.msk [vmem:[%s3631_s25 + $0x114] sm:$0xf] %vm1900_vm1, %v3108_v61  ;;  %1975 = vst.msk [vmem:[%s3631_s25 + $0x128] sm:$0xf] %vm1900_vm1, %v3113_v2 }
 0x122   : > { %v3069_v28 = vpack.c.bf16 %v3267_v22, %v3267_v22  ;;  %v989_v29 = vpop.f32.mrb[29].mxu0  ;;  %v2472_v32 = vadd.f32 %v2471_v26, %v2470_v21  ;;  %v2083_v34 = vadd.f32 %v2082_v27, %v2081_v20  ;;  %v2322_v47 = vmul.f32 %v3267_v22, %v3267_v22 }
 0x123   : > { %v3067_v33 = vpack.c.bf16 %v989_v29, %v989_v29  ;;  %v2084_v35 = vsel %vm650_vm0, %v989_v29, 0.0  ;;  %v3268_v36 = vpop.f32.mrb[30].mxu0  ;;  %v2320_v39 = vmul.f32 %v989_v29, %v989_v29  ;;  %v2088_v57 = vsel %vm650_vm0, %v3267_v22, 0.0  ;;  %v3838_v22 = vpop.f32.mrb[19].mxu1 }
 0x124   : > { %1931 = vst.msk [vmem:[%s3631_s25 + $0x78] sm:$0xf] %vm1900_vm1, %v3069_v28  ;;  %v3070_v40 = vpack.c.bf16 %v3268_v36, %v3268_v36  ;;  %v992_v41 = vpop.f32.mrb[31].mxu0  ;;  %v2085_v44 = vadd.f32 %v2084_v35, %v2083_v34  ;;  %v2474_v45 = vadd.f32 %v2473_v38, %v2472_v32  ;;  %v2323_v58 = vmul.f32 %v3268_v36, %v3268_v36 }
 0x125   : > { %1929 = vst.msk [vmem:[%s3631_s25 + $0x70] sm:$0xf] %vm1900_vm1, %v3067_v33  ;;  %v3068_v46 = vpack.c.bf16 %v992_v41, %v992_v41  ;;  %v2475_v48 = vsel %vm650_vm0, %v2320_v39, 0.0  ;;  %v2086_v51 = vsel %vm650_vm0, %v992_v41, 0.0  ;;  %v2321_v52 = vmul.f32 %v992_v41, %v992_v41 }
 0x126   : > { %1932 = vst.msk [vmem:[%s3631_s25 + $0x7c] sm:$0xf] %vm1900_vm1, %v3070_v40  ;;  %v2476_v53 = vadd.f32 %v2475_v48, %v2474_v45  ;;  %v2087_v54 = vadd.f32 %v2086_v51, %v2085_v44  ;;  %v2479_v5 = vsel %vm650_vm0, %v2322_v47, 0.0  ;;  %v2090_v6 = vsel %vm650_vm0, %v3268_v36, 0.0  ;;  %v3854_v47 = vpop.f32.mrb[20].mxu1 }
 0x127   : > { %1930 = vst.msk [vmem:[%s3631_s25 + $0x74] sm:$0xf] %vm1900_vm1, %v3068_v46  ;;  %v2477_v59 = vsel %vm650_vm0, %v2321_v52, 0.0  ;;  %v2481_v17 = vsel %vm650_vm0, %v2323_v58, 0.0  ;;  %v3111_v40 = vpack.c.bf16 %v3764_v56, %v3764_v56  ;;  %v3114_v46 = vpack.c.bf16 %v3769_v63, %v3769_v63  ;;  %4614 = vst [vmem:[#allocation3_spill] sm:$0xff] %v3854_v47 }
 0x128   : > { %v2089_v62 = vadd.f32 %v2088_v57, %v2087_v54  ;;  %v2478_v0 = vadd.f32 %v2477_v59, %v2476_v53  ;;  %v3860_v54 = vpop.f32.mrb[21].mxu1 }
 0x129   : > { %v3271_v1 = vpop.f32.mrb[32].mxu0  ;;  %1973 = vst.msk [vmem:[%s3631_s25 + $0x120] sm:$0xf] %vm1900_vm1, %v3111_v40  ;;  %4615 = vst [vmem:[#allocation4_spill] sm:$0xff] %v3860_v54 }
 0x12a   : > { %v3073_v7 = vpack.c.bf16 %v3271_v1, %v3271_v1  ;;  %v1005_v8 = vpop.f32.mrb[33].mxu0  ;;  %v2480_v10 = vadd.f32 %v2479_v5, %v2478_v0  ;;  %v2091_v12 = vadd.f32 %v2090_v6, %v2089_v62  ;;  %v2326_v28 = vmul.f32 %v3271_v1, %v3271_v1  ;;  %1976 = vst.msk [vmem:[%s3631_s25 + $0x12c] sm:$0xf] %vm1900_vm1, %v3114_v46  ;;  %v3865_v0 = vpop.f32.mrb[22].mxu1 }
 0x12b   : > { %v3071_v11 = vpack.c.bf16 %v1005_v8, %v1005_v8  ;;  %v2092_v13 = vsel %vm650_vm0, %v1005_v8, 0.0  ;;  %v3272_v15 = vpop.f32.mrb[34].mxu0  ;;  %v2324_v18 = vmul.f32 %v1005_v8, %v1005_v8  ;;  %v2096_v36 = vsel %vm650_vm0, %v3271_v1, 0.0  ;;  %4616 = vst [vmem:[#allocation5_spill] sm:$0xff] %v3865_v0 }
 0x12c   : > { %1935 = vst.msk [vmem:[%s3631_s25 + $0x88] sm:$0xf] %vm1900_vm1, %v3073_v7  ;;  %v3074_v20 = vpack.c.bf16 %v3272_v15, %v3272_v15  ;;  %v1008_v21 = vpop.f32.mrb[35].mxu0  ;;  %v2093_v23 = vadd.f32 %v2092_v13, %v2091_v12  ;;  %v2482_v26 = vadd.f32 %v2481_v17, %v2480_v10  ;;  %v2327_v38 = vmul.f32 %v3272_v15, %v3272_v15  ;;  %v3870_v7 = vpop.f32.mrb[23].mxu1 }
 0x12d   : > { %1933 = vst.msk [vmem:[%s3631_s25 + $0x80] sm:$0xf] %vm1900_vm1, %v3071_v11  ;;  %v3072_v27 = vpack.c.bf16 %v1008_v21, %v1008_v21  ;;  %v2483_v29 = vsel %vm650_vm0, %v2324_v18, 0.0  ;;  %v2094_v32 = vsel %vm650_vm0, %v1008_v21, 0.0  ;;  %v2325_v33 = vmul.f32 %v1008_v21, %v1008_v21 }
 0x12e   : > { %1936 = vst.msk [vmem:[%s3631_s25 + $0x8c] sm:$0xf] %vm1900_vm1, %v3074_v20  ;;  %v2484_v34 = vadd.f32 %v2483_v29, %v2482_v26  ;;  %v2095_v35 = vadd.f32 %v2094_v32, %v2093_v23  ;;  %v2487_v48 = vsel %vm650_vm0, %v2326_v28, 0.0  ;;  %v2098_v51 = vsel %vm650_vm0, %v3272_v15, 0.0 }
 0x12f   : > { %1934 = vst.msk [vmem:[%s3631_s25 + $0x84] sm:$0xf] %vm1900_vm1, %v3072_v27  ;;  %v2485_v39 = vsel %vm650_vm0, %v2325_v33, 0.0  ;;  %v2489_v1 = vsel %vm650_vm0, %v2327_v38, 0.0  ;;  %v3112_v27 = vpack.c.bf16 %v3774_v4, %v3774_v4  ;;  %v3117_v33 = vpack.c.bf16 %v3790_v24, %v3790_v24 }
 0x130   : > { %v2097_v41 = vadd.f32 %v2096_v36, %v2095_v35  ;;  %v2486_v44 = vadd.f32 %v2485_v39, %v2484_v34  ;;  %v3886_v34 = vpop.f32.mrb[24].mxu1 }
 0x131   : > { %v3275_v45 = vpop.f32.mrb[36].mxu0  ;;  %1974 = vst.msk [vmem:[%s3631_s25 + $0x124] sm:$0xf] %vm1900_vm1, %v3112_v27  ;;  %v3892_v40 = vpop.f32.mrb[25].mxu1  ;;  %1979 = vst.msk [vmem:[%s3631_s25 + $0x138] sm:$0xf] %vm1900_vm1, %v3117_v33 }
 0x132   : > { %v3077_v52 = vpack.c.bf16 %v3275_v45, %v3275_v45  ;;  %v1021_v53 = vpop.f32.mrb[37].mxu0  ;;  %v2488_v57 = vadd.f32 %v2487_v48, %v2486_v44  ;;  %v2099_v59 = vadd.f32 %v2098_v51, %v2097_v41  ;;  %v2330_v12 = vmul.f32 %v3275_v45, %v3275_v45  ;;  %v3897_v51 = vpop.f32.mrb[26].mxu1 }
 0x133   : > { %v3075_v58 = vpack.c.bf16 %v1021_v53, %v1021_v53  ;;  %v2100_v61 = vsel %vm650_vm0, %v1021_v53, 0.0  ;;  %v3276_v62 = vpop.f32.mrb[38].mxu0  ;;  %v2328_v2 = vmul.f32 %v1021_v53, %v1021_v53  ;;  %v2104_v21 = vsel %vm650_vm0, %v3275_v45, 0.0 }
 0x134   : > { %1939 = vst.msk [vmem:[%s3631_s25 + $0x98] sm:$0xf] %vm1900_vm1, %v3077_v52  ;;  %v3078_v5 = vpack.c.bf16 %v3276_v62, %v3276_v62  ;;  %v1024_v6 = vpop.f32.mrb[39].mxu0  ;;  %v2101_v8 = vadd.f32 %v2100_v61, %v2099_v59  ;;  %v2490_v10 = vadd.f32 %v2489_v1, %v2488_v57  ;;  %v2331_v23 = vmul.f32 %v3276_v62, %v3276_v62  ;;  %v3902_v59 = vpop.f32.mrb[27].mxu1 }
 0x135   : > { %1937 = vst.msk [vmem:[%s3631_s25 + $0x90] sm:$0xf] %vm1900_vm1, %v3075_v58  ;;  %v3076_v11 = vpack.c.bf16 %v1024_v6, %v1024_v6  ;;  %v2491_v13 = vsel %vm650_vm0, %v2328_v2, 0.0  ;;  %v2102_v15 = vsel %vm650_vm0, %v1024_v6, 0.0  ;;  %v2329_v17 = vmul.f32 %v1024_v6, %v1024_v6 }
 0x136   : > { %1940 = vst.msk [vmem:[%s3631_s25 + $0x9c] sm:$0xf] %vm1900_vm1, %v3078_v5  ;;  %v2492_v18 = vadd.f32 %v2491_v13, %v2490_v10  ;;  %v2103_v20 = vadd.f32 %v2102_v15, %v2101_v8  ;;  %v2495_v35 = vsel %vm650_vm0, %v2330_v12, 0.0  ;;  %v2106_v36 = vsel %vm650_vm0, %v3276_v62, 0.0 }
 0x137   : > { %1938 = vst.msk [vmem:[%s3631_s25 + $0x94] sm:$0xf] %vm1900_vm1, %v3076_v11  ;;  %v2493_v26 = vsel %vm650_vm0, %v2329_v17, 0.0  ;;  %v2497_v52 = vsel %vm650_vm0, %v2331_v23, 0.0  ;;  %v3115_v17 = vpack.c.bf16 %v3796_v31, %v3796_v31  ;;  %v3118_v23 = vpack.c.bf16 %v3801_v37, %v3801_v37 }
 0x138   : > { %v2105_v28 = vadd.f32 %v2104_v21, %v2103_v20  ;;  %v2494_v29 = vadd.f32 %v2493_v26, %v2492_v18  ;;  %v3918_v26 = vpop.f32.mrb[28].mxu1 }
 0x139   : > { %v3279_v32 = vpop.f32.mrb[40].mxu0  ;;  %1977 = vst.msk [vmem:[%s3631_s25 + $0x130] sm:$0xf] %vm1900_vm1, %v3115_v17  ;;  %v3924_v33 = vpop.f32.mrb[29].mxu1  ;;  %1980 = vst.msk [vmem:[%s3631_s25 + $0x13c] sm:$0xf] %vm1900_vm1, %v3118_v23 }
 0x13a   : > { %v3081_v38 = vpack.c.bf16 %v3279_v32, %v3279_v32  ;;  %v1037_v39 = vpop.f32.mrb[41].mxu0  ;;  %v2496_v41 = vadd.f32 %v2495_v35, %v2494_v29  ;;  %v2107_v45 = vadd.f32 %v2106_v36, %v2105_v28  ;;  %v2334_v2 = vmul.f32 %v3279_v32, %v3279_v32 }
 0x13b   : > { %v3079_v44 = vpack.c.bf16 %v1037_v39, %v1037_v39  ;;  %v2108_v46 = vsel %vm650_vm0, %v1037_v39, 0.0  ;;  %v3280_v48 = vpop.f32.mrb[42].mxu0  ;;  %v2332_v53 = vmul.f32 %v1037_v39, %v1037_v39  ;;  %v2112_v12 = vsel %vm650_vm0, %v3279_v32, 0.0 }
 0x13c   : > { %1943 = vst.msk [vmem:[%s3631_s25 + $0xa8] sm:$0xf] %vm1900_vm1, %v3081_v38  ;;  %v3082_v57 = vpack.c.bf16 %v3280_v48, %v3280_v48  ;;  %v1040_v58 = vpop.f32.mrb[43].mxu0  ;;  %v2109_v61 = vadd.f32 %v2108_v46, %v2107_v45  ;;  %v2498_v62 = vadd.f32 %v2497_v52, %v2496_v41  ;;  %v2335_v13 = vmul.f32 %v3280_v48, %v3280_v48 }
 0x13d   : > { %1941 = vst.msk [vmem:[%s3631_s25 + $0xa0] sm:$0xf] %vm1900_vm1, %v3079_v44  ;;  %v3080_v1 = vpack.c.bf16 %v1040_v58, %v1040_v58  ;;  %v2499_v5 = vsel %vm650_vm0, %v2332_v53, 0.0  ;;  %v2110_v6 = vsel %vm650_vm0, %v1040_v58, 0.0  ;;  %v2333_v8 = vmul.f32 %v1040_v58, %v1040_v58  ;;  %v3929_v44 = vpop.f32.mrb[30].mxu1 }
 0x13e   : > { %1944 = vst.msk [vmem:[%s3631_s25 + $0xac] sm:$0xf] %vm1900_vm1, %v3082_v57  ;;  %v2500_v10 = vadd.f32 %v2499_v5, %v2498_v62  ;;  %v2111_v11 = vadd.f32 %v2110_v6, %v2109_v61  ;;  %v2503_v27 = vsel %vm650_vm0, %v2334_v2, 0.0  ;;  %v2114_v28 = vsel %vm650_vm0, %v3280_v48, 0.0  ;;  %v3934_v53 = vpop.f32.mrb[31].mxu1 }
 0x13f   : > { %1942 = vst.msk [vmem:[%s3631_s25 + $0xa4] sm:$0xf] %vm1900_vm1, %v3080_v1  ;;  %v2501_v15 = vsel %vm650_vm0, %v2333_v8, 0.0  ;;  %v2505_v45 = vsel %vm650_vm0, %v2335_v13, 0.0  ;;  %v3116_v13 = vpack.c.bf16 %v3806_v42, %v3806_v42  ;;  %v3950_v23 = vpop.f32.mrb[32].mxu1 }
 0x140   : > { %v2113_v18 = vadd.f32 %v2112_v12, %v2111_v11  ;;  %v2502_v20 = vadd.f32 %v2501_v15, %v2500_v10 }
 0x141   : > { %v3283_v21 = vpop.f32.mrb[44].mxu0  ;;  %1978 = vst.msk [vmem:[%s3631_s25 + $0x134] sm:$0xf] %vm1900_vm1, %v3116_v13 }
 0x142   : > { %v3085_v29 = vpack.c.bf16 %v3283_v21, %v3283_v21  ;;  %v1053_v32 = vpop.f32.mrb[45].mxu0  ;;  %v2504_v35 = vadd.f32 %v2503_v27, %v2502_v20  ;;  %v2115_v38 = vadd.f32 %v2114_v28, %v2113_v18  ;;  %v2338_v62 = vmul.f32 %v3283_v21, %v3283_v21 }
 0x143   : > { %v3083_v36 = vpack.c.bf16 %v1053_v32, %v1053_v32  ;;  %v2116_v39 = vsel %vm650_vm0, %v1053_v32, 0.0  ;;  %v3284_v41 = vpop.f32.mrb[46].mxu0  ;;  %v2336_v46 = vmul.f32 %v1053_v32, %v1053_v32  ;;  %v2120_v10 = vsel %vm650_vm0, %v3283_v21, 0.0  ;;  %v3956_v32 = vpop.f32.mrb[33].mxu1 }
 0x144   : > { %1947 = vst.msk [vmem:[%s3631_s25 + $0xb8] sm:$0xf] %vm1900_vm1, %v3085_v29  ;;  %v3086_v48 = vpack.c.bf16 %v3284_v41, %v3284_v41  ;;  %v1056_v52 = vpop.f32.mrb[47].mxu0  ;;  %v2117_v57 = vadd.f32 %v2116_v39, %v2115_v38  ;;  %v2506_v58 = vadd.f32 %v2505_v45, %v2504_v35  ;;  %v2339_v11 = vmul.f32 %v3284_v41, %v3284_v41 }
 0x145   : > { %1945 = vst.msk [vmem:[%s3631_s25 + $0xb0] sm:$0xf] %vm1900_vm1, %v3083_v36  ;;  %v3084_v61 = vpack.c.bf16 %v1056_v52, %v1056_v52  ;;  %v2507_v1 = vsel %vm650_vm0, %v2336_v46, 0.0  ;;  %v2118_v2 = vsel %vm650_vm0, %v1056_v52, 0.0  ;;  %v2337_v5 = vmul.f32 %v1056_v52, %v1056_v52  ;;  %v3961_v46 = vpop.f32.mrb[34].mxu1 }
 0x146   : > { %1948 = vst.msk [vmem:[%s3631_s25 + $0xbc] sm:$0xf] %vm1900_vm1, %v3086_v48  ;;  %v2508_v6 = vadd.f32 %v2507_v1, %v2506_v58  ;;  %v2119_v8 = vadd.f32 %v2118_v2, %v2117_v57  ;;  %v3121_v20 = vpack.c.bf16 %v3822_v3, %v3822_v3  ;;  %v2511_v27 = vsel %vm650_vm0, %v2338_v62, 0.0  ;;  %v3966_v58 = vpop.f32.mrb[35].mxu1 }
 0x147   : > { %1946 = vst.msk [vmem:[%s3631_s25 + $0xb4] sm:$0xf] %vm1900_vm1, %v3084_v61  ;;  %v2509_v12 = vsel %vm650_vm0, %v2337_v5, 0.0  ;;  %v2122_v21 = vsel %vm650_vm0, %v3284_v41, 0.0  ;;  %v2513_v41 = vsel %vm650_vm0, %v2339_v11, 0.0 }
 0x148   : > { %v2121_v15 = vadd.f32 %v2120_v10, %v2119_v8  ;;  %v2510_v17 = vadd.f32 %v2509_v12, %v2508_v6  ;;  %1983 = vst.msk [vmem:[%s3631_s25 + $0x148] sm:$0xf] %vm1900_vm1, %v3121_v20 }
 0x149   : > { %v3287_v18 = vpop.f32.mrb[48].mxu0 }
 0x14a   : > { %v3089_v28 = vpack.c.bf16 %v3287_v18, %v3287_v18  ;;  %v1069_v29 = vpop.f32.mrb[49].mxu0  ;;  %v2512_v35 = vadd.f32 %v2511_v27, %v2510_v17  ;;  %v2123_v38 = vadd.f32 %v2122_v21, %v2121_v15  ;;  %v2342_v2 = vmul.f32 %v3287_v18, %v3287_v18 }
 0x14b   : > { %v3087_v36 = vpack.c.bf16 %v1069_v29, %v1069_v29  ;;  %v2124_v39 = vsel %vm650_vm0, %v1069_v29, 0.0  ;;  %v3288_v45 = vpop.f32.mrb[50].mxu0  ;;  %v2340_v48 = vmul.f32 %v1069_v29, %v1069_v29  ;;  %v2128_v12 = vsel %vm650_vm0, %v3287_v18, 0.0  ;;  %v3982_v29 = vpop.f32.mrb[36].mxu1 }
 0x14c   : > { %1951 = vst.msk [vmem:[%s3631_s25 + $0xc8] sm:$0xf] %vm1900_vm1, %v3089_v28  ;;  %v3090_v52 = vpack.c.bf16 %v3288_v45, %v3288_v45  ;;  %v1072_v57 = vpop.f32.mrb[51].mxu0  ;;  %v2125_v61 = vadd.f32 %v2124_v39, %v2123_v38  ;;  %v2514_v62 = vadd.f32 %v2513_v41, %v2512_v35  ;;  %v2343_v13 = vmul.f32 %v3288_v45, %v3288_v45  ;;  %v3988_v39 = vpop.f32.mrb[37].mxu1 }
 0x14d   : > { %1949 = vst.msk [vmem:[%s3631_s25 + $0xc0] sm:$0xf] %vm1900_vm1, %v3087_v36  ;;  %v3088_v1 = vpack.c.bf16 %v1072_v57, %v1072_v57  ;;  %v2515_v5 = vsel %vm650_vm0, %v2340_v48, 0.0  ;;  %v2126_v6 = vsel %vm650_vm0, %v1072_v57, 0.0  ;;  %v2341_v8 = vmul.f32 %v1072_v57, %v1072_v57 }
 0x14e   : > { %1952 = vst.msk [vmem:[%s3631_s25 + $0xcc] sm:$0xf] %vm1900_vm1, %v3090_v52  ;;  %v2516_v10 = vadd.f32 %v2515_v5, %v2514_v62  ;;  %v2127_v11 = vadd.f32 %v2126_v6, %v2125_v61  ;;  %v3119_v17 = vpack.c.bf16 %v3828_v9, %v3828_v9  ;;  %v3122_v28 = vpack.c.bf16 %v3833_v16, %v3833_v16  ;;  %v3993_v62 = vpop.f32.mrb[38].mxu1 }
 0x14f   : > { %1950 = vst.msk [vmem:[%s3631_s25 + $0xc4] sm:$0xf] %vm1900_vm1, %v3088_v1  ;;  %v2517_v15 = vsel %vm650_vm0, %v2341_v8, 0.0  ;;  %v2519_v35 = vsel %vm650_vm0, %v2342_v2, 0.0  ;;  %v2130_v18 = vsel %vm650_vm0, %v3288_v45, 0.0  ;;  %v2521_v45 = vsel %vm650_vm0, %v2343_v13, 0.0 }
 0x150   : > { %v2129_v20 = vadd.f32 %v2128_v12, %v2127_v11  ;;  %v2518_v27 = vadd.f32 %v2517_v15, %v2516_v10  ;;  %1981 = vst.msk [vmem:[%s3631_s25 + $0x140] sm:$0xf] %vm1900_vm1, %v3119_v17  ;;  %1984 = vst.msk [vmem:[%s3631_s25 + $0x14c] sm:$0xf] %vm1900_vm1, %v3122_v28  ;;  %v3998_v6 = vpop.f32.mrb[39].mxu1  ;;  %v2356_v16 = vmul.f32 %v3700_v49, %v3700_v49 }
 0x151   : > { %v3291_v21 = vpop.f32.mrb[52].mxu0 }
 0x152   : > { %v3093_v36 = vpack.c.bf16 %v3291_v21, %v3291_v21  ;;  %v1085_v38 = vpop.f32.mrb[53].mxu0  ;;  %v2520_v41 = vadd.f32 %v2519_v35, %v2518_v27  ;;  %v2131_v52 = vadd.f32 %v2130_v18, %v2129_v20  ;;  %v2346_v12 = vmul.f32 %v3291_v21, %v3291_v21 }
 0x153   : > { %v3091_v48 = vpack.c.bf16 %v1085_v38, %v1085_v38  ;;  %v2132_v57 = vsel %vm650_vm0, %v1085_v38, 0.0  ;;  %v3292_v61 = vpop.f32.mrb[54].mxu0  ;;  %v2344_v1 = vmul.f32 %v1085_v38, %v1085_v38  ;;  %v2136_v28 = vsel %vm650_vm0, %v3291_v21, 0.0 }
 0x154   : > { %1955 = vst.msk [vmem:[%s3631_s25 + $0xd8] sm:$0xf] %vm1900_vm1, %v3093_v36  ;;  %v3094_v2 = vpack.c.bf16 %v3292_v61, %v3292_v61  ;;  %v1088_v5 = vpop.f32.mrb[55].mxu0  ;;  %v2133_v8 = vadd.f32 %v2132_v57, %v2131_v52  ;;  %v2522_v10 = vadd.f32 %v2521_v45, %v2520_v41  ;;  %v2347_v35 = vmul.f32 %v3292_v61, %v3292_v61  ;;  %v4014_v57 = vpop.f32.mrb[40].mxu1 }
 0x155   : > { %1953 = vst.msk [vmem:[%s3631_s25 + $0xd0] sm:$0xf] %vm1900_vm1, %v3091_v48  ;;  %v3092_v11 = vpack.c.bf16 %v1088_v5, %v1088_v5  ;;  %v2523_v15 = vsel %vm650_vm0, %v2344_v1, 0.0  ;;  %v2134_v13 = vsel %vm650_vm0, %v1088_v5, 0.0  ;;  %v2345_v17 = vmul.f32 %v1088_v5, %v1088_v5  ;;  %v4020_v5 = vpop.f32.mrb[41].mxu1 }
 0x156   : > { %1956 = vst.msk [vmem:[%s3631_s25 + $0xdc] sm:$0xf] %vm1900_vm1, %v3094_v2  ;;  %v2524_v20 = vadd.f32 %v2523_v15, %v2522_v10  ;;  %v2135_v27 = vadd.f32 %v2134_v13, %v2133_v8  ;;  %v3120_v36 = vpack.c.bf16 %v3838_v22, %v3838_v22  ;;  %v3125_v52 = vpack.c.bf16 %v3854_v47, %v3854_v47 }
 0x157   : > { %1954 = vst.msk [vmem:[%s3631_s25 + $0xd4] sm:$0xf] %vm1900_vm1, %v3092_v11  ;;  %v2525_v18 = vsel %vm650_vm0, %v2345_v17, 0.0  ;;  %v2527_v45 = vsel %vm650_vm0, %v2346_v12, 0.0  ;;  %v2138_v21 = vsel %vm650_vm0, %v3292_v61, 0.0  ;;  %v4025_v17 = vpop.f32.mrb[42].mxu1 }
 0x158   : > { %v2137_v38 = vadd.f32 %v2136_v28, %v2135_v27  ;;  %v2526_v41 = vadd.f32 %v2525_v18, %v2524_v20  ;;  %1982 = vst.msk [vmem:[%s3631_s25 + $0x144] sm:$0xf] %vm1900_vm1, %v3120_v36  ;;  %1987 = vst.msk [vmem:[%s3631_s25 + $0x158] sm:$0xf] %vm1900_vm1, %v3125_v52  ;;  %v2529_v61 = vsel %vm650_vm0, %v2347_v35, 0.0  ;;  %v4030_v28 = vpop.f32.mrb[43].mxu1 }
 0x159   : > { %v3295_v48 = vpop.f32.mrb[56].mxu0 }
 0x15a   : > { %v3097_v1 = vpack.c.bf16 %v3295_v48, %v3295_v48  ;;  %v1101_v2 = vpop.f32.mrb[57].mxu0  ;;  %v2528_v8 = vadd.f32 %v2527_v45, %v2526_v41  ;;  %v2139_v11 = vadd.f32 %v2138_v21, %v2137_v38  ;;  %v2350_v41 = vmul.f32 %v3295_v48, %v3295_v48 }
 0x15b   : > { %v3095_v10 = vpack.c.bf16 %v1101_v2, %v1101_v2  ;;  %v2140_v15 = vsel %vm650_vm0, %v1101_v2, 0.0  ;;  %v3296_v13 = vpop.f32.mrb[58].mxu0  ;;  %v2348_v12 = vmul.f32 %v1101_v2, %v1101_v2  ;;  %v2144_v2 = vsel %vm650_vm0, %v3295_v48, 0.0 }
 0x15c   : > { %1959 = vst.msk [vmem:[%s3631_s25 + $0xe8] sm:$0xf] %vm1900_vm1, %v3097_v1  ;;  %v3098_v20 = vpack.c.bf16 %v3296_v13, %v3296_v13  ;;  %v1104_v27 = vpop.f32.mrb[59].mxu0  ;;  %v2141_v18 = vadd.f32 %v2140_v15, %v2139_v11  ;;  %v2530_v36 = vadd.f32 %v2529_v61, %v2528_v8  ;;  %v2351_v47 = vmul.f32 %v3296_v13, %v3296_v13 }
 0x15d   : > { %1957 = vst.msk [vmem:[%s3631_s25 + $0xe0] sm:$0xf] %vm1900_vm1, %v3095_v10  ;;  %v3096_v38 = vpack.c.bf16 %v1104_v27, %v1104_v27  ;;  %v2531_v52 = vsel %vm650_vm0, %v2348_v12, 0.0  ;;  %v2142_v35 = vsel %vm650_vm0, %v1104_v27, 0.0  ;;  %v2349_v45 = vmul.f32 %v1104_v27, %v1104_v27 }
 0x15e   : > { %1960 = vst.msk [vmem:[%s3631_s25 + $0xec] sm:$0xf] %vm1900_vm1, %v3098_v20  ;;  %v2532_v21 = vadd.f32 %v2531_v52, %v2530_v36  ;;  %v2143_v1 = vadd.f32 %v2142_v35, %v2141_v18  ;;  %v3123_v8 = vpack.c.bf16 %v3860_v54, %v3860_v54  ;;  %v3126_v12 = vpack.c.bf16 %v3865_v0, %v3865_v0  ;;  %v4046_v20 = vpop.f32.mrb[44].mxu1 }
 0x15f   : > { %1958 = vst.msk [vmem:[%s3631_s25 + $0xe4] sm:$0xf] %vm1900_vm1, %v3096_v38  ;;  %v2533_v10 = vsel %vm650_vm0, %v2349_v45, 0.0  ;;  %v2535_v27 = vsel %vm650_vm0, %v2350_v41, 0.0  ;;  %v2146_v48 = vsel %vm650_vm0, %v3296_v13, 0.0  ;;  %v4052_v38 = vpop.f32.mrb[45].mxu1 }
 0x160   : > { %v2145_v11 = vadd.f32 %v2144_v2, %v2143_v1  ;;  %v2534_v15 = vadd.f32 %v2533_v10, %v2532_v21  ;;  %1985 = vst.msk [vmem:[%s3631_s25 + $0x150] sm:$0xf] %vm1900_vm1, %v3123_v8  ;;  %1988 = vst.msk [vmem:[%s3631_s25 + $0x15c] sm:$0xf] %vm1900_vm1, %v3126_v12  ;;  %v4057_v2 = vpop.f32.mrb[46].mxu1  ;;  %v2537_v13 = vsel %vm650_vm0, %v2351_v47, 0.0 }
 0x161   : > { %v3299_v61 = vpop.f32.mrb[60].mxu0  ;;  %v4062_v0 = vpop.f32.mrb[47].mxu1 }
 0x162   : > { %v3101_v18 = vpack.c.bf16 %v3299_v61, %v3299_v61  ;;  %v1117_v36 = vpop.f32.mrb[61].mxu0  ;;  %v2536_v52 = vadd.f32 %v2535_v27, %v2534_v15  ;;  %v2147_v45 = vadd.f32 %v2146_v48, %v2145_v11  ;;  %v2354_v48 = vmul.f32 %v3299_v61, %v3299_v61 }
 0x163   : > { %v3099_v35 = vpack.c.bf16 %v1117_v36, %v1117_v36  ;;  %v2148_v21 = vsel %vm650_vm0, %v1117_v36, 0.0  ;;  %v3300_v1 = vpop.f32.mrb[62].mxu0  ;;  %v2352_v41 = vmul.f32 %v1117_v36, %v1117_v36 }
 0x164   : > { %1963 = vst.msk [vmem:[%s3631_s25 + $0xf8] sm:$0xf] %vm1900_vm1, %v3101_v18  ;;  %v3102_v10 = vpack.c.bf16 %v3300_v1, %v3300_v1  ;;  %v1120_v8 = vpop.f32.mrb[63].mxu0  ;;  %v2149_v11 = vadd.f32 %v2148_v21, %v2147_v45  ;;  %v2538_v15 = vadd.f32 %v2537_v13, %v2536_v52  ;;  %v2355_v52 = vmul.f32 %v3300_v1, %v3300_v1 }
 0x165   : > { %1961 = vst.msk [vmem:[%s3631_s25 + $0xf0] sm:$0xf] %vm1900_vm1, %v3099_v35  ;;  %v3100_v27 = vpack.c.bf16 %v1120_v8, %v1120_v8  ;;  %v2539_v12 = vsel %vm650_vm0, %v2352_v41, 0.0  ;;  %v2150_v47 = vsel %vm650_vm0, %v1120_v8, 0.0  ;;  %v2353_v54 = vmul.f32 %v1120_v8, %v1120_v8  ;;  %v4080_v8 = vpop.f32.mrb[48].mxu1 }
 0x166   : > { %1964 = vst.msk [vmem:[%s3631_s25 + $0xfc] sm:$0xf] %vm1900_vm1, %v3102_v10  ;;  %v2540_v18 = vadd.f32 %v2539_v12, %v2538_v15  ;;  %v2151_v36 = vadd.f32 %v2150_v47, %v2149_v11  ;;  %v2152_v35 = vsel %vm650_vm0, %v3299_v61, 0.0  ;;  %v3124_v21 = vpack.c.bf16 %v3870_v7, %v3870_v7 }
 0x167   : > { %1962 = vst.msk [vmem:[%s3631_s25 + $0xf4] sm:$0xf] %vm1900_vm1, %v3100_v27  ;;  %v2541_v45 = vsel %vm650_vm0, %v2353_v54, 0.0  ;;  %v3129_v10 = vpack.c.bf16 %v3886_v34, %v3886_v34  ;;  %v2543_v11 = vsel %vm650_vm0, %v2354_v48, 0.0  ;;  %v2154_v15 = vsel %vm650_vm0, %v3300_v1, 0.0  ;;  %v4090_v27 = vpop.f32.mrb[49].mxu1 }
 0x168   : > { %v2153_v13 = vadd.f32 %v2152_v35, %v2151_v36  ;;  %v2542_v41 = vadd.f32 %v2541_v45, %v2540_v18  ;;  %v2156_v61 = vsel %vm650_vm0, %v3700_v49, 0.0  ;;  %1986 = vst.msk [vmem:[%s3631_s25 + $0x154] sm:$0xf] %vm1900_vm1, %v3124_v21  ;;  %v3127_v54 = vpack.c.bf16 %v3892_v40, %v3892_v40  ;;  %v4094_v18 = vpop.f32.mrb[50].mxu1 }
 0x169   : > { %1991 = vst.msk [vmem:[%s3631_s25 + $0x168] sm:$0xf] %vm1900_vm1, %v3129_v10  ;;  %v2545_v48 = vsel %vm650_vm0, %v2355_v52, 0.0  ;;  %v2547_v1 = vsel %vm650_vm0, %v2356_v16, 0.0  ;;  %v2357_v49 = vmul.f32 %v3710_v60, %v3710_v60  ;;  %v3130_v36 = vpack.c.bf16 %v3897_v51, %v3897_v51  ;;  %v4104_v35 = vpop.f32.mrb[51].mxu1 }
 0x16a   : > { %v2155_v12 = vadd.f32 %v2154_v15, %v2153_v13  ;;  %v2544_v47 = vadd.f32 %v2543_v11, %v2542_v41  ;;  %1989 = vst.msk [vmem:[%s3631_s25 + $0x160] sm:$0xf] %vm1900_vm1, %v3127_v54  ;;  %v3128_v13 = vpack.c.bf16 %v3902_v59, %v3902_v59  ;;  %v2358_v52 = vmul.f32 %v3694_v43, %v3694_v43 }
 0x16b   : > { %v2158_v16 = vsel %vm650_vm0, %v3710_v60, 0.0  ;;  %1992 = vst.msk [vmem:[%s3631_s25 + $0x16c] sm:$0xf] %vm1900_vm1, %v3130_v36  ;;  %v3133_v41 = vpack.c.bf16 %v3918_v26, %v3918_v26  ;;  %v2160_v10 = vsel %vm650_vm0, %v3694_v43, 0.0  ;;  %v2549_v54 = vsel %vm650_vm0, %v2357_v49, 0.0 }
 0x16c   : > { %v2546_v45 = vadd.f32 %v2545_v48, %v2544_v47  ;;  %v2157_v21 = vadd.f32 %v2156_v61, %v2155_v12  ;;  %1990 = vst.msk [vmem:[%s3631_s25 + $0x164] sm:$0xf] %vm1900_vm1, %v3128_v13  ;;  %v2359_v61 = vmul.f32 %v3703_v55, %v3703_v55  ;;  %v2360_v60 = vmul.f32 %v3732_v19, %v3732_v19 }
 0x16d   : > { %1995 = vst.msk [vmem:[%s3631_s25 + $0x178] sm:$0xf] %vm1900_vm1, %v3133_v41  ;;  %v3131_v12 = vpack.c.bf16 %v3924_v33, %v3924_v33  ;;  %v3134_v48 = vpack.c.bf16 %v3929_v44, %v3929_v44  ;;  %v2551_v36 = vsel %vm650_vm0, %v2358_v52, 0.0  ;;  %v2162_v49 = vsel %vm650_vm0, %v3703_v55, 0.0 }
 0x16e   : > { %v2548_v11 = vadd.f32 %v2547_v1, %v2546_v45  ;;  %v2159_v15 = vadd.f32 %v2158_v16, %v2157_v21  ;;  %v4131_v1 = vpop.f32.mrb[52].mxu1  ;;  %v2164_v45 = vsel %vm650_vm0, %v3732_v19, 0.0  ;;  %v3132_v21 = vpack.c.bf16 %v3934_v53, %v3934_v53 }
 0x16f   : > { %1993 = vst.msk [vmem:[%s3631_s25 + $0x170] sm:$0xf] %vm1900_vm1, %v3131_v12  ;;  %v4142_v13 = vpop.f32.mrb[53].mxu1  ;;  %1996 = vst.msk [vmem:[%s3631_s25 + $0x17c] sm:$0xf] %vm1900_vm1, %v3134_v48  ;;  %v2553_v52 = vsel %vm650_vm0, %v2359_v61, 0.0  ;;  %v2361_v19 = vmul.f32 %v3742_v30, %v3742_v30  ;;  %v2362_v61 = vmul.f32 %v3726_v14, %v3726_v14 }
 0x170   : > { %v2161_v43 = vadd.f32 %v2160_v10, %v2159_v15  ;;  %v2550_v47 = vadd.f32 %v2549_v54, %v2548_v11  ;;  %v4146_v10 = vpop.f32.mrb[54].mxu1  ;;  %v2555_v55 = vsel %vm650_vm0, %v2360_v60, 0.0  ;;  %1994 = vst.msk [vmem:[%s3631_s25 + $0x174] sm:$0xf] %vm1900_vm1, %v3132_v21  ;;  %v3137_v11 = vpack.c.bf16 %v3950_v23, %v3950_v23 }
 0x171   : > { %v4156_v15 = vpop.f32.mrb[55].mxu1  ;;  %v2166_v60 = vsel %vm650_vm0, %v3742_v30, 0.0  ;;  %v2168_v48 = vsel %vm650_vm0, %v3726_v14, 0.0  ;;  %v2557_v21 = vsel %vm650_vm0, %v2361_v19, 0.0  ;;  %v2364_v30 = vmul.f32 %v3764_v56, %v3764_v56 }
 0x172   : > { %v2552_v16 = vadd.f32 %v2551_v36, %v2550_v47  ;;  %v2163_v41 = vadd.f32 %v2162_v49, %v2161_v43  ;;  %v3135_v43 = vpack.c.bf16 %v3956_v32, %v3956_v32  ;;  %1999 = vst.msk [vmem:[%s3631_s25 + $0x188] sm:$0xf] %vm1900_vm1, %v3137_v11  ;;  %v3138_v47 = vpack.c.bf16 %v3961_v46, %v3961_v46 }
 0x173   : > { %v2559_v11 = vsel %vm650_vm0, %v2362_v61, 0.0  ;;  %v2170_v19 = vsel %vm650_vm0, %v3737_v25, 0.0 }
 0x174   : > { %v2165_v54 = vadd.f32 %v2164_v45, %v2163_v41  ;;  %v2554_v12 = vadd.f32 %v2553_v52, %v2552_v16  ;;  %1997 = vst.msk [vmem:[%s3631_s25 + $0x180] sm:$0xf] %vm1900_vm1, %v3135_v43  ;;  %v2363_v45 = vmul.f32 %v3737_v25, %v3737_v25  ;;  %2000 = vst.msk [vmem:[%s3631_s25 + $0x18c] sm:$0xf] %vm1900_vm1, %v3138_v47  ;;  %v2563_v25 = vsel %vm650_vm0, %v2364_v30, 0.0 }
 0x175   : > { %v3136_v16 = vpack.c.bf16 %v3966_v58, %v3966_v58  ;;  %v3141_v52 = vpack.c.bf16 %v3982_v29, %v3982_v29  ;;  %v2174_v30 = vsel %vm650_vm0, %v3774_v4, 0.0 }
 0x176   : > { %v2556_v36 = vadd.f32 %v2555_v55, %v2554_v12  ;;  %v2167_v49 = vadd.f32 %v2166_v60, %v2165_v54  ;;  %v4183_v55 = vpop.f32.mrb[56].mxu1  ;;  %v2172_v54 = vsel %vm650_vm0, %v3764_v56, 0.0  ;;  %v3139_v12 = vpack.c.bf16 %v3988_v39, %v3988_v39 }
 0x177   : > { %1998 = vst.msk [vmem:[%s3631_s25 + $0x184] sm:$0xf] %vm1900_vm1, %v3136_v16  ;;  %v4194_v43 = vpop.f32.mrb[57].mxu1  ;;  %2003 = vst.msk [vmem:[%s3631_s25 + $0x198] sm:$0xf] %vm1900_vm1, %v3141_v52  ;;  %v2561_v61 = vsel %vm650_vm0, %v2363_v45, 0.0  ;;  %v2365_v56 = vmul.f32 %v3774_v4, %v3774_v4  ;;  %v2366_v45 = vmul.f32 %v3758_v50, %v3758_v50  ;;  %v2368_v4 = vmul.f32 %v3796_v31, %v3796_v31 }
 0x178   : > { %v2169_v14 = vadd.f32 %v2168_v48, %v2167_v49  ;;  %v2558_v41 = vadd.f32 %v2557_v21, %v2556_v36  ;;  %v4198_v48 = vpop.f32.mrb[58].mxu1  ;;  %2001 = vst.msk [vmem:[%s3631_s25 + $0x190] sm:$0xf] %vm1900_vm1, %v3139_v12  ;;  %v3142_v36 = vpack.c.bf16 %v3993_v62, %v3993_v62  ;;  %v2176_v52 = vsel %vm650_vm0, %v3758_v50, 0.0 }
 0x179   : > { %v4208_v49 = vpop.f32.mrb[59].mxu1  ;;  %v2565_v12 = vsel %vm650_vm0, %v2365_v56, 0.0  ;;  %v2178_v56 = vsel %vm650_vm0, %v3769_v63, 0.0 }
 0x17a   : > { %v2560_v60 = vadd.f32 %v2559_v11, %v2558_v41  ;;  %v2171_v47 = vadd.f32 %v2170_v19, %v2169_v14  ;;  %v3140_v14 = vpack.c.bf16 %v3998_v6, %v3998_v6  ;;  %2004 = vst.msk [vmem:[%s3631_s25 + $0x19c] sm:$0xf] %vm1900_vm1, %v3142_v36  ;;  %v3145_v41 = vpack.c.bf16 %v4014_v57, %v4014_v57 }
 0x17b   : > { %v2567_v36 = vsel %vm650_vm0, %v2366_v45, 0.0 }
 0x17c   : > { %v2173_v21 = vadd.f32 %v2172_v54, %v2171_v47  ;;  %v2562_v16 = vadd.f32 %v2561_v61, %v2560_v60  ;;  %2002 = vst.msk [vmem:[%s3631_s25 + $0x194] sm:$0xf] %vm1900_vm1, %v3140_v14  ;;  %v2367_v54 = vmul.f32 %v3769_v63, %v3769_v63  ;;  %2007 = vst.msk [vmem:[%s3631_s25 + $0x1a8] sm:$0xf] %vm1900_vm1, %v3145_v41  ;;  %v2571_v63 = vsel %vm650_vm0, %v2368_v4, 0.0 }
 0x17d   : > { %v3143_v60 = vpack.c.bf16 %v4020_v5, %v4020_v5  ;;  %v3146_v61 = vpack.c.bf16 %v4025_v17, %v4025_v17  ;;  %v2182_v4 = vsel %vm650_vm0, %v3806_v42, 0.0 }
 0x17e   : > { %v2564_v11 = vadd.f32 %v2563_v25, %v2562_v16  ;;  %v2175_v19 = vadd.f32 %v2174_v30, %v2173_v21  ;;  %v4235_v25 = vpop.f32.mrb[60].mxu1  ;;  %v2180_v21 = vsel %vm650_vm0, %v3796_v31, 0.0  ;;  %v3144_v16 = vpack.c.bf16 %v4030_v28, %v4030_v28 }
 0x17f   : > { %2005 = vst.msk [vmem:[%s3631_s25 + $0x1a0] sm:$0xf] %vm1900_vm1, %v3143_v60  ;;  %v4246_v14 = vpop.f32.mrb[61].mxu1  ;;  %2008 = vst.msk [vmem:[%s3631_s25 + $0x1ac] sm:$0xf] %vm1900_vm1, %v3146_v61  ;;  %v2569_v45 = vsel %vm650_vm0, %v2367_v54, 0.0  ;;  %v2369_v31 = vmul.f32 %v3806_v42, %v3806_v42  ;;  %v2370_v54 = vmul.f32 %v3790_v24, %v3790_v24  ;;  %v2372_v42 = vmul.f32 %v3828_v9, %v3828_v9 }
 0x180   : > { %v2177_v50 = vadd.f32 %v2176_v52, %v2175_v19  ;;  %v2566_v47 = vadd.f32 %v2565_v12, %v2564_v11  ;;  %v4250_v52 = vpop.f32.mrb[62].mxu1  ;;  %2006 = vst.msk [vmem:[%s3631_s25 + $0x1a4] sm:$0xf] %vm1900_vm1, %v3144_v16  ;;  %v3149_v11 = vpack.c.bf16 %v4046_v20, %v4046_v20  ;;  %v2184_v61 = vsel %vm650_vm0, %v3790_v24, 0.0 }
 0x181   : > { %v4260_v19 = vpop.f32.mrb[63].mxu1  ;;  %v2573_v16 = vsel %vm650_vm0, %v2369_v31, 0.0  ;;  %v2188_v31 = vsel %vm650_vm0, %v3828_v9, 0.0  ;;  %v3154_v9 = vpack.c.bf16 %v4094_v18, %v4094_v18 }
 0x182   : > { %v2568_v30 = vadd.f32 %v2567_v36, %v2566_v47  ;;  %v2179_v41 = vadd.f32 %v2178_v56, %v2177_v50  ;;  %v3147_v50 = vpack.c.bf16 %v4052_v38, %v4052_v38  ;;  %2011 = vst.msk [vmem:[%s3631_s25 + $0x1b8] sm:$0xf] %vm1900_vm1, %v3149_v11  ;;  %v3150_v47 = vpack.c.bf16 %v4057_v2, %v4057_v2 }
 0x183   : > { %v2186_v11 = vsel %vm650_vm0, %v3801_v37, 0.0  ;;  %2016 = vst.msk [vmem:[%s3631_s25 + $0x1cc] sm:$0xf] %vm1900_vm1, %v3154_v9 }
 0x184   : > { %v2181_v12 = vadd.f32 %v2180_v21, %v2179_v41  ;;  %v2570_v60 = vadd.f32 %v2569_v45, %v2568_v30  ;;  %2009 = vst.msk [vmem:[%s3631_s25 + $0x1b0] sm:$0xf] %vm1900_vm1, %v3147_v50  ;;  %v2371_v21 = vmul.f32 %v3801_v37, %v3801_v37  ;;  %2012 = vst.msk [vmem:[%s3631_s25 + $0x1bc] sm:$0xf] %vm1900_vm1, %v3150_v47 }
 0x185   : > { %v3148_v30 = vpack.c.bf16 %v4062_v0, %v4062_v0  ;;  %v3153_v45 = vpack.c.bf16 %v4080_v8, %v4080_v8  ;;  %v2373_v37 = vmul.f32 %v3838_v22, %v3838_v22 }
 0x186   : > { %v2572_v36 = vadd.f32 %v2571_v63, %v2570_v60  ;;  %v2183_v56 = vadd.f32 %v2182_v4, %v2181_v12  ;;  %v2575_v63 = vsel %vm650_vm0, %v2370_v54, 0.0  ;;  %v3151_v12 = vpack.c.bf16 %v4090_v27, %v4090_v27 }
 0x187   : > { %2010 = vst.msk [vmem:[%s3631_s25 + $0x1b4] sm:$0xf] %vm1900_vm1, %v3148_v30  ;;  %2015 = vst.msk [vmem:[%s3631_s25 + $0x1c8] sm:$0xf] %vm1900_vm1, %v3153_v45  ;;  %v2577_v4 = vsel %vm650_vm0, %v2371_v21, 0.0  ;;  %v2579_v54 = vsel %vm650_vm0, %v2372_v42, 0.0 }
 0x188   : > { %v2185_v24 = vadd.f32 %v2184_v61, %v2183_v56  ;;  %v2574_v41 = vadd.f32 %v2573_v16, %v2572_v36  ;;  %2013 = vst.msk [vmem:[%s3631_s25 + $0x1c0] sm:$0xf] %vm1900_vm1, %v3151_v12  ;;  %v3152_v36 = vpack.c.bf16 %v4104_v35, %v4104_v35  ;;  %v2374_v56 = vmul.f32 %v3822_v3, %v3822_v3 }
 0x189   : > { %v2190_v21 = vsel %vm650_vm0, %v3838_v22, 0.0  ;;  %v3157_v16 = vpack.c.bf16 %v4131_v1, %v4131_v1  ;;  %v2192_v42 = vsel %vm650_vm0, %v3822_v3, 0.0  ;;  %v4618_v22 = vld [vmem:[#allocation4_spill] sm:$0xff] }
 0x18a   : > { %v2576_v60 = vadd.f32 %v2575_v63, %v2574_v41  ;;  %v2187_v50 = vadd.f32 %v2186_v11, %v2185_v24  ;;  %2014 = vst.msk [vmem:[%s3631_s25 + $0x1c4] sm:$0xf] %vm1900_vm1, %v3152_v36  ;;  %v4617_v41 = vld [vmem:[#allocation2_spill] sm:$0xff]  ;;  %v2581_v63 = vsel %vm650_vm0, %v2373_v37, 0.0  ;;  %v2376_v11 = vmul.f32 %v4618_v22, %v4618_v22 }
 0x18b   : > { %v2375_v45 = vmul.f32 %v4617_v41, %v4617_v41  ;;  %2019 = vst.msk [vmem:[%s3631_s25 + $0x1d8] sm:$0xf] %vm1900_vm1, %v3157_v16  ;;  %v3156_v37 = vpack.c.bf16 %v4156_v15, %v4156_v15 }
 0x18c   : > { %v2189_v47 = vadd.f32 %v2188_v31, %v2187_v50  ;;  %v2578_v61 = vadd.f32 %v2577_v4, %v2576_v60  ;;  %v3155_v31 = vpack.c.bf16 %v4142_v13, %v4142_v13  ;;  %v3158_v60 = vpack.c.bf16 %v4146_v10, %v4146_v10 }
 0x18d   : > { %v2583_v50 = vsel %vm650_vm0, %v2374_v56, 0.0  ;;  %v2194_v4 = vsel %vm650_vm0, %v4617_v41, 0.0  ;;  %v2587_v36 = vsel %vm650_vm0, %v2376_v11, 0.0  ;;  %v2377_v56 = vmul.f32 %v3870_v7, %v3870_v7  ;;  %2018 = vst.msk [vmem:[%s3631_s25 + $0x1d4] sm:$0xf] %vm1900_vm1, %v3156_v37 }
 0x18e   : > { %v2580_v30 = vadd.f32 %v2579_v54, %v2578_v61  ;;  %v2191_v24 = vadd.f32 %v2190_v21, %v2189_v47  ;;  %v2196_v54 = vsel %vm650_vm0, %v4618_v22, 0.0  ;;  %2017 = vst.msk [vmem:[%s3631_s25 + $0x1d0] sm:$0xf] %vm1900_vm1, %v3155_v31  ;;  %2020 = vst.msk [vmem:[%s3631_s25 + $0x1dc] sm:$0xf] %vm1900_vm1, %v3158_v60  ;;  %v2585_v61 = vsel %vm650_vm0, %v2375_v45, 0.0 }
 0x18f   : > { %v3161_v21 = vpack.c.bf16 %v4183_v55, %v4183_v55  ;;  %v2198_v45 = vsel %vm650_vm0, %v3870_v7, 0.0  ;;  %v2589_v60 = vsel %vm650_vm0, %v2377_v56, 0.0  ;;  %v2380_v7 = vmul.f32 %v3892_v40, %v3892_v40 }
 0x190   : > { %v2193_v3 = vadd.f32 %v2192_v42, %v2191_v24  ;;  %v2582_v12 = vadd.f32 %v2581_v63, %v2580_v30  ;;  %v3159_v30 = vpack.c.bf16 %v4194_v43, %v4194_v43  ;;  %v4619_v24 = vld [vmem:[#allocation3_spill] sm:$0xff]  ;;  %v3162_v63 = vpack.c.bf16 %v4198_v48, %v4198_v48 }
 0x191   : > { %v2378_v41 = vmul.f32 %v4619_v24, %v4619_v24  ;;  %2023 = vst.msk [vmem:[%s3631_s25 + $0x1e8] sm:$0xf] %vm1900_vm1, %v3161_v21  ;;  %v2200_v22 = vsel %vm650_vm0, %v4619_v24, 0.0  ;;  %v3165_v37 = vpack.c.bf16 %v4235_v25, %v4235_v25 }
 0x192   : > { %v2584_v9 = vadd.f32 %v2583_v50, %v2582_v12  ;;  %v2195_v47 = vadd.f32 %v2194_v4, %v2193_v3  ;;  %2021 = vst.msk [vmem:[%s3631_s25 + $0x1e0] sm:$0xf] %vm1900_vm1, %v3159_v30  ;;  %v4620_v3 = vld [vmem:[#allocation5_spill] sm:$0xff]  ;;  %2024 = vst.msk [vmem:[%s3631_s25 + $0x1ec] sm:$0xf] %vm1900_vm1, %v3162_v63  ;;  %v3160_v50 = vpack.c.bf16 %v4208_v49, %v4208_v49 }
 0x193   : > { %v2379_v12 = vmul.f32 %v4620_v3, %v4620_v3  ;;  %2027 = vst.msk [vmem:[%s3631_s25 + $0x1f8] sm:$0xf] %vm1900_vm1, %v3165_v37  ;;  %v2381_v30 = vmul.f32 %v3902_v59, %v3902_v59  ;;  %v2382_v63 = vmul.f32 %v3886_v34, %v3886_v34  ;;  %v2212_v37 = vsel %vm650_vm0, %v3924_v33, 0.0 }
 0x194   : > { %v2197_v16 = vadd.f32 %v2196_v54, %v2195_v47  ;;  %v2586_v42 = vadd.f32 %v2585_v61, %v2584_v9  ;;  %v2591_v9 = vsel %vm650_vm0, %v2378_v41, 0.0  ;;  %v2202_v47 = vsel %vm650_vm0, %v4620_v3, 0.0  ;;  %2022 = vst.msk [vmem:[%s3631_s25 + $0x1e4] sm:$0xf] %vm1900_vm1, %v3160_v50 }
 0x195   : > { %v2204_v61 = vsel %vm650_vm0, %v3892_v40, 0.0  ;;  %v3166_v40 = vpack.c.bf16 %v4250_v52, %v4250_v52  ;;  %v2208_v3 = vsel %vm650_vm0, %v3886_v34, 0.0 }
 0x196   : > { %v2588_v11 = vadd.f32 %v2587_v36, %v2586_v42  ;;  %v2199_v31 = vadd.f32 %v2198_v45, %v2197_v16  ;;  %v3163_v36 = vpack.c.bf16 %v4246_v14, %v4246_v14  ;;  %v2593_v16 = vsel %vm650_vm0, %v2379_v12, 0.0 }
 0x197   : > { %v2595_v42 = vsel %vm650_vm0, %v2380_v7, 0.0  ;;  %v3164_v45 = vpack.c.bf16 %v4260_v19, %v4260_v19  ;;  %2028 = vst.msk [vmem:[%s3631_s25 + $0x1fc] sm:$0xf] %vm1900_vm1, %v3166_v40  ;;  %v2383_v12 = vmul.f32 %v3897_v51, %v3897_v51  ;;  %v2384_v7 = vmul.f32 %v3924_v33, %v3924_v33 }
 0x198   : > { %v2201_v4 = vadd.f32 %v2200_v22, %v2199_v31  ;;  %v2590_v54 = vadd.f32 %v2589_v60, %v2588_v11  ;;  %2025 = vst.msk [vmem:[%s3631_s25 + $0x1f0] sm:$0xf] %vm1900_vm1, %v3163_v36  ;;  %v2206_v22 = vsel %vm650_vm0, %v3902_v59, 0.0  ;;  %v2597_v60 = vsel %vm650_vm0, %v2381_v30, 0.0 }
 0x199   : > { %2026 = vst.msk [vmem:[%s3631_s25 + $0x1f4] sm:$0xf] %vm1900_vm1, %v3164_v45  ;;  %v2599_v59 = vsel %vm650_vm0, %v2382_v63, 0.0  ;;  %v2385_v36 = vmul.f32 %v3934_v53, %v3934_v53  ;;  %v2216_v33 = vsel %vm650_vm0, %v3918_v26, 0.0  ;;  %v2387_v40 = vmul.f32 %v3929_v44, %v3929_v44 }
 0x19a   : > { %v2592_v56 = vadd.f32 %v2591_v9, %v2590_v54  ;;  %v2203_v21 = vadd.f32 %v2202_v47, %v2201_v4  ;;  %v2210_v54 = vsel %vm650_vm0, %v3897_v51, 0.0  ;;  %v2601_v47 = vsel %vm650_vm0, %v2383_v12, 0.0 }
 0x19b   : > { %v2214_v51 = vsel %vm650_vm0, %v3934_v53, 0.0  ;;  %v2218_v53 = vsel %vm650_vm0, %v3929_v44, 0.0  ;;  %v2222_v44 = vsel %vm650_vm0, %v3966_v58, 0.0 }
 0x19c   : > { %v2205_v24 = vadd.f32 %v2204_v61, %v2203_v21  ;;  %v2594_v41 = vadd.f32 %v2593_v16, %v2592_v56  ;;  %v2603_v61 = vsel %vm650_vm0, %v2384_v7, 0.0  ;;  %v2386_v16 = vmul.f32 %v3918_v26, %v3918_v26 }
 0x19e   : > { %v2596_v11 = vadd.f32 %v2595_v42, %v2594_v41  ;;  %v2207_v31 = vadd.f32 %v2206_v22, %v2205_v24  ;;  %v2605_v24 = vsel %vm650_vm0, %v2385_v36, 0.0  ;;  %v2388_v41 = vmul.f32 %v3956_v32, %v3956_v32 }
 0x19f   : > { %v2607_v22 = vsel %vm650_vm0, %v2386_v16, 0.0 }
 0x1a0   : > { %v2209_v50 = vadd.f32 %v2208_v3, %v2207_v31  ;;  %v2598_v4 = vadd.f32 %v2597_v60, %v2596_v11  ;;  %v2220_v11 = vsel %vm650_vm0, %v3956_v32, 0.0  ;;  %v2609_v3 = vsel %vm650_vm0, %v2387_v40, 0.0 }
 0x1a1   : > { %v2611_v12 = vsel %vm650_vm0, %v2388_v41, 0.0  ;;  %v2389_v60 = vmul.f32 %v3966_v58, %v3966_v58  ;;  %v2224_v32 = vsel %vm650_vm0, %v3950_v23, 0.0  ;;  %v2226_v58 = vsel %vm650_vm0, %v3961_v46, 0.0 }
 0x1a2   : > { %v2600_v9 = vadd.f32 %v2599_v59, %v2598_v4  ;;  %v2211_v34 = vadd.f32 %v2210_v54, %v2209_v50  ;;  %v2390_v4 = vmul.f32 %v3950_v23, %v3950_v23  ;;  %v2394_v40 = vmul.f32 %v3982_v29, %v3982_v29 }
 0x1a4   : > { %v2213_v56 = vadd.f32 %v2212_v37, %v2211_v34  ;;  %v2602_v21 = vadd.f32 %v2601_v47, %v2600_v9  ;;  %v2391_v37 = vmul.f32 %v3961_v46, %v3961_v46  ;;  %v2613_v9 = vsel %vm650_vm0, %v2389_v60, 0.0 }
 0x1a5   : > { %v2392_v34 = vmul.f32 %v3988_v39, %v3988_v39  ;;  %v2615_v36 = vsel %vm650_vm0, %v2390_v4, 0.0  ;;  %v2230_v46 = vsel %vm650_vm0, %v3998_v6, 0.0 }
 0x1a6   : > { %v2604_v42 = vadd.f32 %v2603_v61, %v2602_v21  ;;  %v2215_v30 = vadd.f32 %v2214_v51, %v2213_v56  ;;  %v2228_v56 = vsel %vm650_vm0, %v3988_v39, 0.0  ;;  %v2617_v16 = vsel %vm650_vm0, %v2391_v37, 0.0 }
 0x1a7   : > { %v2619_v51 = vsel %vm650_vm0, %v2392_v34, 0.0  ;;  %v2232_v39 = vsel %vm650_vm0, %v3982_v29, 0.0 }
 0x1a8   : > { %v2217_v45 = vadd.f32 %v2216_v33, %v2215_v30  ;;  %v2606_v63 = vadd.f32 %v2605_v24, %v2604_v42  ;;  %v2393_v42 = vmul.f32 %v3998_v6, %v3998_v6  ;;  %v2234_v6 = vsel %vm650_vm0, %v3993_v62, 0.0 }
 0x1aa   : > { %v2608_v31 = vadd.f32 %v2607_v22, %v2606_v63  ;;  %v2219_v26 = vadd.f32 %v2218_v53, %v2217_v45  ;;  %v2395_v45 = vmul.f32 %v3993_v62, %v3993_v62  ;;  %v2621_v63 = vsel %vm650_vm0, %v2393_v42, 0.0 }
 0x1ab   : > { %v2396_v22 = vmul.f32 %v4020_v5, %v4020_v5  ;;  %v2238_v62 = vsel %vm650_vm0, %v4030_v28, 0.0  ;;  %v2402_v42 = vmul.f32 %v4046_v20, %v4046_v20 }
 0x1ac   : > { %v2221_v7 = vadd.f32 %v2220_v11, %v2219_v26  ;;  %v2610_v50 = vadd.f32 %v2609_v3, %v2608_v31  ;;  %v2623_v31 = vsel %vm650_vm0, %v2394_v40, 0.0  ;;  %v2236_v26 = vsel %vm650_vm0, %v4020_v5, 0.0 }
 0x1ad   : > { %v2627_v60 = vsel %vm650_vm0, %v2396_v22, 0.0  ;;  %v2240_v5 = vsel %vm650_vm0, %v4014_v57, 0.0  ;;  %v2403_v40 = vmul.f32 %v4057_v2, %v4057_v2 }
 0x1ae   : > { %v2612_v59 = vadd.f32 %v2611_v12, %v2610_v50  ;;  %v2223_v54 = vadd.f32 %v2222_v44, %v2221_v7  ;;  %v2625_v12 = vsel %vm650_vm0, %v2395_v45, 0.0  ;;  %v2397_v7 = vmul.f32 %v4030_v28, %v4030_v28 }
 0x1af   : > { %v2398_v44 = vmul.f32 %v4014_v57, %v4014_v57  ;;  %v2242_v28 = vsel %vm650_vm0, %v4025_v17, 0.0  ;;  %v2639_v45 = vsel %vm650_vm0, %v2402_v42, 0.0 }
 0x1b0   : > { %v2225_v47 = vadd.f32 %v2224_v32, %v2223_v54  ;;  %v2614_v61 = vadd.f32 %v2613_v9, %v2612_v59  ;;  %v2399_v32 = vmul.f32 %v4025_v17, %v4025_v17  ;;  %v2629_v37 = vsel %vm650_vm0, %v2397_v7, 0.0 }
 0x1b1   : > { %v2400_v9 = vmul.f32 %v4052_v38, %v4052_v38  ;;  %v2246_v17 = vsel %vm650_vm0, %v4062_v0, 0.0 }
 0x1b2   : > { %v2616_v21 = vadd.f32 %v2615_v36, %v2614_v61  ;;  %v2227_v23 = vadd.f32 %v2226_v58, %v2225_v47  ;;  %v2631_v61 = vsel %vm650_vm0, %v2398_v44, 0.0  ;;  %v2244_v36 = vsel %vm650_vm0, %v4052_v38, 0.0 }
 0x1b3   : > { %v2248_v38 = vsel %vm650_vm0, %v4046_v20, 0.0 }
 0x1b4   : > { %v2229_v30 = vadd.f32 %v2228_v56, %v2227_v23  ;;  %v2618_v33 = vadd.f32 %v2617_v16, %v2616_v21  ;;  %v2633_v56 = vsel %vm650_vm0, %v2399_v32, 0.0  ;;  %v2635_v21 = vsel %vm650_vm0, %v2400_v9, 0.0 }
 0x1b5   : > { %v2401_v23 = vmul.f32 %v4062_v0, %v4062_v0  ;;  %v2250_v0 = vsel %vm650_vm0, %v4057_v2, 0.0  ;;  %v2254_v2 = vsel %vm650_vm0, %v4104_v35, 0.0 }
 0x1b6   : > { %v2620_v24 = vadd.f32 %v2619_v51, %v2618_v33  ;;  %v2231_v41 = vadd.f32 %v2230_v46, %v2229_v30 }
 0x1b7   : > { %v2637_v46 = vsel %vm650_vm0, %v2401_v23, 0.0 }
 0x1b8   : > { %v2233_v53 = vadd.f32 %v2232_v39, %v2231_v41  ;;  %v2622_v11 = vadd.f32 %v2621_v63, %v2620_v24  ;;  %v2404_v24 = vmul.f32 %v4090_v27, %v4090_v27  ;;  %v2252_v63 = vsel %vm650_vm0, %v4090_v27, 0.0 }
 0x1b9   : > { %v2256_v27 = vsel %vm650_vm0, %v4080_v8, 0.0 }
 0x1ba   : > { %v2624_v3 = vadd.f32 %v2623_v31, %v2622_v11  ;;  %v2235_v29 = vadd.f32 %v2234_v6, %v2233_v53  ;;  %v2641_v53 = vsel %vm650_vm0, %v2403_v40, 0.0  ;;  %v2643_v11 = vsel %vm650_vm0, %v2404_v24, 0.0 }
 0x1bb   : > { %v2405_v31 = vmul.f32 %v4104_v35, %v4104_v35  ;;  %v2258_v35 = vsel %vm650_vm0, %v4094_v18, 0.0  ;;  %v2414_v40 = vmul.f32 %v4183_v55, %v4183_v55 }
 0x1bc   : > { %v2237_v50 = vadd.f32 %v2236_v26, %v2235_v29  ;;  %v2626_v4 = vadd.f32 %v2625_v12, %v2624_v3  ;;  %v2406_v3 = vmul.f32 %v4080_v8, %v4080_v8 }
 0x1bd   : > { %v2645_v7 = vsel %vm650_vm0, %v2405_v31, 0.0 }
 0x1be   : > { %v2628_v59 = vadd.f32 %v2627_v60, %v2626_v4  ;;  %v2239_v54 = vadd.f32 %v2238_v62, %v2237_v50  ;;  %v2407_v60 = vmul.f32 %v4094_v18, %v4094_v18  ;;  %v2408_v50 = vmul.f32 %v4142_v13, %v4142_v13 }
 0x1bf   : > { %v2647_v62 = vsel %vm650_vm0, %v2406_v3, 0.0  ;;  %v2262_v18 = vsel %vm650_vm0, %v4156_v15, 0.0 }
 0x1c0   : > { %v2241_v34 = vadd.f32 %v2240_v5, %v2239_v54  ;;  %v2630_v47 = vadd.f32 %v2629_v37, %v2628_v59  ;;  %v2260_v59 = vsel %vm650_vm0, %v4142_v13, 0.0  ;;  %v2649_v5 = vsel %vm650_vm0, %v2407_v60, 0.0 }
 0x1c1   : > { %v2651_v32 = vsel %vm650_vm0, %v2408_v50, 0.0  ;;  %v2409_v37 = vmul.f32 %v4156_v15, %v4156_v15  ;;  %v2264_v13 = vsel %vm650_vm0, %v4131_v1, 0.0  ;;  %v2266_v15 = vsel %vm650_vm0, %v4146_v10, 0.0 }
 0x1c2   : > { %v2632_v58 = vadd.f32 %v2631_v61, %v2630_v47  ;;  %v2243_v57 = vadd.f32 %v2242_v28, %v2241_v34  ;;  %v2410_v47 = vmul.f32 %v4131_v1, %v4131_v1 }
 0x1c4   : > { %v2245_v16 = vadd.f32 %v2244_v36, %v2243_v57  ;;  %v2634_v51 = vadd.f32 %v2633_v56, %v2632_v58  ;;  %v2411_v36 = vmul.f32 %v4146_v10, %v4146_v10  ;;  %v2653_v58 = vsel %vm650_vm0, %v2409_v37, 0.0 }
 0x1c5   : > { %v2412_v57 = vmul.f32 %v4194_v43, %v4194_v43  ;;  %v2655_v23 = vsel %vm650_vm0, %v2410_v47, 0.0  ;;  %v2270_v10 = vsel %vm650_vm0, %v4208_v49, 0.0 }
 0x1c6   : > { %v2636_v30 = vadd.f32 %v2635_v21, %v2634_v51  ;;  %v2247_v33 = vadd.f32 %v2246_v17, %v2245_v16  ;;  %v2268_v16 = vsel %vm650_vm0, %v4194_v43, 0.0  ;;  %v2657_v42 = vsel %vm650_vm0, %v2411_v36, 0.0 }
 0x1c7   : > { %v2659_v17 = vsel %vm650_vm0, %v2412_v57, 0.0  ;;  %v2272_v43 = vsel %vm650_vm0, %v4183_v55, 0.0 }
 0x1c8   : > { %v2249_v41 = vadd.f32 %v2248_v38, %v2247_v33  ;;  %v2638_v39 = vadd.f32 %v2637_v46, %v2636_v30  ;;  %v2413_v30 = vmul.f32 %v4208_v49, %v4208_v49  ;;  %v2274_v49 = vsel %vm650_vm0, %v4198_v48, 0.0 }
 0x1ca   : > { %v2640_v22 = vadd.f32 %v2639_v45, %v2638_v39  ;;  %v2251_v20 = vadd.f32 %v2250_v0, %v2249_v41  ;;  %v2415_v41 = vmul.f32 %v4198_v48, %v4198_v48  ;;  %v2661_v39 = vsel %vm650_vm0, %v2413_v30, 0.0 }
 0x1cb   : > { %v2416_v45 = vmul.f32 %v4246_v14, %v4246_v14  ;;  %v2278_v48 = vsel %vm650_vm0, %v4260_v19, 0.0 }
 0x1cc   : > { %v2253_v6 = vadd.f32 %v2252_v63, %v2251_v20  ;;  %v2642_v26 = vadd.f32 %v2641_v53, %v2640_v22  ;;  %v2663_v22 = vsel %vm650_vm0, %v2414_v40, 0.0  ;;  %v2276_v20 = vsel %vm650_vm0, %v4246_v14, 0.0 }
 0x1cd   : > { %v2667_v31 = vsel %vm650_vm0, %v2416_v45, 0.0 }
 0x1ce   : > { %v2644_v29 = vadd.f32 %v2643_v11, %v2642_v26  ;;  %v2255_v12 = vadd.f32 %v2254_v2, %v2253_v6  ;;  %v2665_v11 = vsel %vm650_vm0, %v2415_v41, 0.0  ;;  %v2417_v6 = vmul.f32 %v4260_v19, %v4260_v19 }
 0x1cf   : > { %v2418_v2 = vmul.f32 %v4235_v25, %v4235_v25 }
 0x1d0   : > { %v2257_v4 = vadd.f32 %v2256_v27, %v2255_v12  ;;  %v2646_v44 = vadd.f32 %v2645_v7, %v2644_v29  ;;  %v2280_v12 = vsel %vm650_vm0, %v4235_v25, 0.0  ;;  %v2419_v27 = vmul.f32 %v4250_v52, %v4250_v52 }
 0x1d1   : > { %v2669_v60 = vsel %vm650_vm0, %v2417_v6, 0.0 }
 0x1d2   : > { %v2648_v54 = vadd.f32 %v2647_v62, %v2646_v44  ;;  %v2259_v8 = vadd.f32 %v2258_v35, %v2257_v4  ;;  %v2671_v4 = vsel %vm650_vm0, %v2418_v2, 0.0  ;;  %v2282_v44 = vsel %vm650_vm0, %v4250_v52, 0.0 }
 0x1d3   : > { %v2673_v35 = vsel %vm650_vm0, %v2419_v27, 0.0 }
 0x1d4   : > { %v2261_v9 = vadd.f32 %v2260_v59, %v2259_v8  ;;  %v2650_v34 = vadd.f32 %v2649_v5, %v2648_v54 }
 0x1d6   : > { %v2652_v61 = vadd.f32 %v2651_v32, %v2650_v34  ;;  %v2263_v28 = vadd.f32 %v2262_v18, %v2261_v9 }
 0x1d8   : > { %v2265_v56 = vadd.f32 %v2264_v13, %v2263_v28  ;;  %v2654_v21 = vadd.f32 %v2653_v58, %v2652_v61 }
 0x1da   : > { %v2656_v51 = vadd.f32 %v2655_v23, %v2654_v21  ;;  %v2267_v1 = vadd.f32 %v2266_v15, %v2265_v56 }
 0x1dc   : > { %v2269_v33 = vadd.f32 %v2268_v16, %v2267_v1  ;;  %v2658_v38 = vadd.f32 %v2657_v42, %v2656_v51 }
 0x1de   : > { %v2660_v46 = vadd.f32 %v2659_v17, %v2658_v38  ;;  %v2271_v24 = vadd.f32 %v2270_v10, %v2269_v33 }
 0x1e0   : > { %v2273_v0 = vadd.f32 %v2272_v43, %v2271_v24  ;;  %v2662_v63 = vadd.f32 %v2661_v39, %v2660_v46 }
 0x1e2   : > { %v2664_v53 = vadd.f32 %v2663_v22, %v2662_v63  ;;  %v2275_v55 = vadd.f32 %v2274_v49, %v2273_v0 }
 0x1e4   : > { %v2277_v26 = vadd.f32 %v2276_v20, %v2275_v55  ;;  %v2666_v3 = vadd.f32 %v2665_v11, %v2664_v53 }
 0x1e6   : > { %v2668_v14 = vadd.f32 %v2667_v31, %v2666_v3  ;;  %v2279_v29 = vadd.f32 %v2278_v48, %v2277_v26 }
 0x1e8   : > { %v2281_v7 = vadd.f32 %v2280_v12, %v2279_v29  ;;  %v2670_v50 = vadd.f32 %v2669_v60, %v2668_v14 }
 0x1ea   : > { %v2283_v19 = vadd.f32 %v2282_v44, %v2281_v7  ;;  %v2672_v62 = vadd.f32 %v2671_v4, %v2670_v50 }
 0x1ec   : > { %v2284_v59 = vrot.slane %v2283_v19, 4  ;;  %v2674_v54 = vadd.f32 %v2673_v35, %v2672_v62 }
 0x1ee   : > { %v2285_v25 = vadd.f32 %v2284_v59, %v2283_v19  ;;  %v2675_v8 = vrot.slane %v2674_v54, 4 }
 0x1f0   : > { %v2286_v5 = vrot.slane %v2285_v25, 2  ;;  %v2676_v32 = vadd.f32 %v2675_v8, %v2674_v54 }
 0x1f2   : > { %v2287_v37 = vadd.f32 %v2286_v5, %v2285_v25  ;;  %v2677_v9 = vrot.slane %v2676_v32, 2 }
 0x1f4   : > { %v2288_v34 = vrot.slane %v2287_v37, 1  ;;  %v2678_v47 = vadd.f32 %v2677_v9, %v2676_v32 }
 0x1f6   : > { %v2289_v52 = vadd.f32 %v2288_v34, %v2287_v37  ;;  %v2679_v18 = vrot.slane %v2678_v47, 1 }
 0x1f8   : > { %2291 = vst.msk [vmem:[%s184_s29] sm:$0x1] %vm2290_vm2, %v2289_v52  ;;  %v2680_v61 = vadd.f32 %v2679_v18, %v2678_v47 }
 0x1fa   : > { %2681 = vst.msk [vmem:[%s184_s29 + $0x1] sm:$0x1] %vm2290_vm2, %v2680_v61 }
 0x1fb PF: > { %s14_s12 = sadd.s32 1, %s3449_s12  }
 0x1fc   : > { %p11_p5 = scmp.ge.s32.totalorder %s14_s12, 34  }
 0x1fe   :  { %13 = sbr.rel (!%p11_p5) target bundleno = 1 (0x1), region = 70 }

// kernel: tile.18
= control target key start
LH: loop header
LB: loop body
LE: loop exit
PB: predicated region body
PF: predicated region fallthrough
CT: control target
= control target key end

     0   :  { %s22_s0 = inlined_call_operand.vmem [shape: f32[32], index: 0, kind: input, shape index: {}]   ;;  %s23_s1 = inlined_call_operand.vmem [shape: f32[4,32], index: 1, kind: output, shape index: {}]  }
   0x1   :  { %v4_v0 = vld [vmem:[%s22_s0] ss:$0 sm:$0xff] }
   0x2   :  { %5 = vst [vmem:[%s23_s1] sm:$0xf] %v4_v0 }

// kernel: tile.19
= control target key start
LH: loop header
LB: loop body
LE: loop exit
PB: predicated region body
PF: predicated region fallthrough
CT: control target
= control target key end

     0   :  { %vm7_vm0 = vcmask 261120   ;;  %s37_s8 = smov 32   ;;  %s38_s9 = smov 64   ;;  %vm13_vm1 = vcmask 1048320   ;;  %vm19_vm2 = vcmask 785920   ;;  %vm25_vm3 = vcmask 523520   ;;  %s55_s0 = inlined_call_operand.vmem [shape: f32[4,32], index: 0, kind: input, shape index: {}]   ;;  %s56_s1 = inlined_call_operand.vmem [shape: f32[1,128], index: 1, kind: output, shape index: {}]  }
   0x1   :  { %v4_v0 = vld [vmem:[%s55_s0] sm:$0xf]  ;;  %s36_s0 = smov 96  }
   0x2   :  { %5 = vst [vmem:[#allocation1] sm:$0xf] %v4_v0 }
   0x9   :  { %v10_v1 = vld [vmem:[#allocation1 + $0x3] sm:$0x1]   ;;  %v22_v2 = vld [vmem:[#allocation1 + $0x1] sm:$0x1]   ;;  %v6_v3 = vld [vmem:[#allocation1] sm:$0x1]  }
   0xa   :  { %11 = vrot.lane.b32.xlu0 %v10_v1, %s36_s0  ;;  %23 = vrot.lane.b32.xlu1 %v22_v2, %s37_s8  ;;  %v16_v4 = vld [vmem:[#allocation1 + $0x2] sm:$0x1]   ;;  %8 = vst.msk [vmem:[#allocation0] sm:$0x1] %vm7_vm0, %v6_v3  }
   0xe   :  { %17 = vrot.lane.b32.xlu0 %v16_v4, %s38_s9 }
  0x7c   :  { %v12_v5 = vpop.permute.xlu0 %11   ;;  %v24_v6 = vpop.permute.xlu1 %23  }
  0x7d   :  { %14 = vst.msk [vmem:[#allocation0] sm:$0x1] %vm13_vm1, %v12_v5  }
  0x80   :  { %v18_v7 = vpop.permute.xlu0 %17  }
  0x81   :  { %20 = vst.msk [vmem:[#allocation0] sm:$0x1] %vm19_vm2, %v18_v7  }
  0x82   :  { %26 = vst.msk [vmem:[#allocation0] sm:$0x1] %vm25_vm3, %v24_v6  }
  0x89   :  { %v30_v8 = vld [vmem:[#allocation0] sm:$0x1] }
  0x8a   :  { %32 = vst [vmem:[%s56_s1] sm:$0x1] %v30_v8 }

// kernel: _conv3x3_strided_bn.3
= control target key start
LH: loop header
LB: loop body
LE: loop exit
PB: predicated region body
PF: predicated region fallthrough
CT: control target
= control target key end

     0   :  { %s4775_s12 = smov 0   ;;  %s5601_s0 = inlined_call_operand.vmem [shape: bf16[8192,128], index: 0, kind: input, shape index: {}]   ;;  %s5602_s1 = inlined_call_operand.vmem [shape: f32[1,128], index: 1, kind: input, shape index: {}]   ;;  %s5603_s2 = inlined_call_operand.vmem [shape: f32[1,128], index: 2, kind: input, shape index: {}]   ;;  %s5604_s3 = inlined_call_operand.vmem [shape: bf16[8192,128], index: 3, kind: output, shape index: {}]  }
   0x1 LB: > { %s2804_s13 = sadd.s32 4294967295, %s4753_s12   ;;  %p2808_p0 = scmp.ge.s32.totalorder %s4753_s12, 1  ;;  %s4753_s12 = sphi %s4775_s12, %s13_s12  }
   0x2   : > { %p138_p1 = scmp.lt.s32.totalorder %s4753_s12, 5 }
   0x4   : > { %p139_p2 = pnand %p2808_p0, %p138_p1 }
   0x5   : > { %s2809_s14 = sshll.u32 (!%p139_p2), %s2804_s13, 8  ;;  %v4796_v0 = vld [vmem:[%s5602_s1] ss:$0 sm:$0xff] (!%p139_p2) }
   0x6   : > { %142 = sbr.rel (%p139_p2) target bundleno = 311 (0x137), region = 32  ;;  %p163_p3 = scmp.lt.s32.totalorder (!%p139_p2), %s2809_s14, 1023  ;;  %v4805_v9 = vld [vmem:[%s5603_s2] ss:$0 sm:$0xff] (!%p139_p2) }
   0xd   : > { %s5606_s14 = smov (!%p163_p3, %s2809_s14), 1023 }
   0xe   : > { %s2810_s15 = sshll.u32 %s5606_s14, 2 }
   0xf   : > { %s4791_s18 = scalar_lea.vmem %s5601_s0, %s2810_s15  ;;  %s4830_s25 = scalar_lea.vmem %s5604_s3, %s2810_s15 }
  0x10   : > { %v3330_v1 = vld [vmem:[%s4791_s18] sm:$0xff]   ;;  %v4481_v2 = vld [vmem:[%s4791_s18 + $0x8] sm:$0xff]   ;;  %v4482_v3 = vld [vmem:[%s4791_s18 + $0x10] sm:$0xff]  }
  0x11   : > { %v3331_v4 = vunpack.c.l.bf16 %v3330_v1  ;;  %v3332_v5 = vunpack.c.h.bf16 %v3330_v1  ;;  %v3335_v6 = vunpack.c.l.bf16 %v4481_v2  ;;  %v3336_v7 = vunpack.c.h.bf16 %v4481_v2  ;;  %v4483_v8 = vld [vmem:[%s4791_s18 + $0x18] sm:$0xff]   ;;  %v4484_v30 = vld [vmem:[%s4791_s18 + $0x20] sm:$0xff]   ;;  %v4485_v35 = vld [vmem:[%s4791_s18 + $0x28] sm:$0xff]  }
  0x12   : > { %v3339_v10 = vunpack.c.l.bf16 %v4482_v3  ;;  %v3340_v11 = vunpack.c.h.bf16 %v4482_v3  ;;  %v3343_v12 = vunpack.c.l.bf16 %v4483_v8  ;;  %v3344_v13 = vunpack.c.h.bf16 %v4483_v8  ;;  %v4486_v40 = vld [vmem:[%s4791_s18 + $0x30] sm:$0xff]   ;;  %v4487_v45 = vld [vmem:[%s4791_s18 + $0x38] sm:$0xff]   ;;  %v4488_v3 = vld [vmem:[%s4791_s18 + $0x40] sm:$0xff]  }
  0x13   : > { %v693_v14 = vmul.f32 %v3331_v4, %v4796_v0  ;;  %v694_v15 = vmul.f32 %v3332_v5, %v4796_v0  ;;  %v695_v16 = vmul.f32 %v3335_v6, %v4796_v0  ;;  %v696_v17 = vmul.f32 %v3336_v7, %v4796_v0 }
  0x14   : > { %v697_v18 = vmul.f32 %v3339_v10, %v4796_v0  ;;  %v698_v19 = vmul.f32 %v3340_v11, %v4796_v0  ;;  %v699_v20 = vmul.f32 %v3343_v12, %v4796_v0  ;;  %v700_v21 = vmul.f32 %v3344_v13, %v4796_v0  ;;  %v4489_v13 = vld [vmem:[%s4791_s18 + $0x48] sm:$0xff]  }
  0x15   : > { %v956_v22 = vadd.f32 %v4805_v9, %v693_v14  ;;  %v957_v23 = vadd.f32 %v4805_v9, %v694_v15  ;;  %v958_v24 = vadd.f32 %v4805_v9, %v695_v16  ;;  %v959_v25 = vadd.f32 %v4805_v9, %v696_v17 }
  0x16   : > { %v960_v26 = vadd.f32 %v4805_v9, %v697_v18  ;;  %v961_v27 = vadd.f32 %v4805_v9, %v698_v19  ;;  %v962_v28 = vadd.f32 %v4805_v9, %v699_v20  ;;  %v963_v29 = vadd.f32 %v4805_v9, %v700_v21  ;;  %v4490_v18 = vld [vmem:[%s4791_s18 + $0x50] sm:$0xff]  }
  0x17   : > { %v1212_v31 = vmax.f32 %v956_v22, 0.0  ;;  %v1213_v32 = vmax.f32 %v957_v23, 0.0  ;;  %v1214_v33 = vmax.f32 %v958_v24, 0.0  ;;  %v1215_v34 = vmax.f32 %v959_v25, 0.0  ;;  %v4491_v23 = vld [vmem:[%s4791_s18 + $0x58] sm:$0xff]  }
  0x18   : > { %v1216_v36 = vmax.f32 %v960_v26, 0.0  ;;  %v1217_v37 = vmax.f32 %v961_v27, 0.0  ;;  %v1218_v38 = vmax.f32 %v962_v28, 0.0  ;;  %v1219_v39 = vmax.f32 %v963_v29, 0.0 }
  0x19   : > { %v3844_v41 = vpack.c.bf16 %v1213_v32, %v1212_v31  ;;  %v3849_v42 = vpack.c.bf16 %v1215_v34, %v1214_v33  ;;  %v3347_v43 = vunpack.c.l.bf16 %v4484_v30  ;;  %v3348_v44 = vunpack.c.h.bf16 %v4484_v30 }
  0x1a   : > { %v3854_v46 = vpack.c.bf16 %v1217_v37, %v1216_v36  ;;  %v3859_v47 = vpack.c.bf16 %v1219_v39, %v1218_v38  ;;  %v3351_v48 = vunpack.c.l.bf16 %v4485_v35  ;;  %v3352_v49 = vunpack.c.h.bf16 %v4485_v35 }
  0x1b   : > { %3845 = vst [vmem:[%s4830_s25] sm:$0xff] %v3844_v41   ;;  %4608 = vst [vmem:[%s4830_s25 + $0x8] sm:$0xff] %v3849_v42   ;;  %v701_v50 = vmul.f32 %v3347_v43, %v4796_v0  ;;  %v702_v51 = vmul.f32 %v3348_v44, %v4796_v0  ;;  %v3355_v52 = vunpack.c.l.bf16 %v4486_v40  ;;  %v3356_v53 = vunpack.c.h.bf16 %v4486_v40  ;;  %v4492_v40 = vld [vmem:[%s4791_s18 + $0x60] sm:$0xff]  }
  0x1c   : > { %4609 = vst [vmem:[%s4830_s25 + $0x10] sm:$0xff] %v3854_v46   ;;  %4610 = vst [vmem:[%s4830_s25 + $0x18] sm:$0xff] %v3859_v47   ;;  %v703_v54 = vmul.f32 %v3351_v48, %v4796_v0  ;;  %v704_v55 = vmul.f32 %v3352_v49, %v4796_v0  ;;  %v3359_v56 = vunpack.c.l.bf16 %v4487_v45  ;;  %v3360_v57 = vunpack.c.h.bf16 %v4487_v45 }
  0x1d   : > { %v964_v58 = vadd.f32 %v4805_v9, %v701_v50  ;;  %v965_v59 = vadd.f32 %v4805_v9, %v702_v51  ;;  %v705_v60 = vmul.f32 %v3355_v52, %v4796_v0  ;;  %v706_v61 = vmul.f32 %v3356_v53, %v4796_v0  ;;  %v4493_v53 = vld [vmem:[%s4791_s18 + $0x68] sm:$0xff]  }
  0x1e   : > { %v966_v62 = vadd.f32 %v4805_v9, %v703_v54  ;;  %v967_v63 = vadd.f32 %v4805_v9, %v704_v55  ;;  %v707_v1 = vmul.f32 %v3359_v56, %v4796_v0  ;;  %v708_v2 = vmul.f32 %v3360_v57, %v4796_v0 }
  0x1f   : > { %v1220_v4 = vmax.f32 %v964_v58, 0.0  ;;  %v1221_v5 = vmax.f32 %v965_v59, 0.0  ;;  %v968_v6 = vadd.f32 %v4805_v9, %v705_v60  ;;  %v969_v7 = vadd.f32 %v4805_v9, %v706_v61  ;;  %v4494_v58 = vld [vmem:[%s4791_s18 + $0x70] sm:$0xff]  }
  0x20   : > { %v1222_v8 = vmax.f32 %v966_v62, 0.0  ;;  %v1223_v10 = vmax.f32 %v967_v63, 0.0  ;;  %v970_v11 = vadd.f32 %v4805_v9, %v707_v1  ;;  %v971_v12 = vadd.f32 %v4805_v9, %v708_v2  ;;  %v4495_v63 = vld [vmem:[%s4791_s18 + $0x78] sm:$0xff]  }
  0x21   : > { %v3864_v14 = vpack.c.bf16 %v1221_v5, %v1220_v4  ;;  %v1224_v15 = vmax.f32 %v968_v6, 0.0  ;;  %v1225_v16 = vmax.f32 %v969_v7, 0.0  ;;  %v3363_v17 = vunpack.c.l.bf16 %v4488_v3 }
  0x22   : > { %v3869_v19 = vpack.c.bf16 %v1223_v10, %v1222_v8  ;;  %v1226_v20 = vmax.f32 %v970_v11, 0.0  ;;  %v1227_v21 = vmax.f32 %v971_v12, 0.0  ;;  %v3364_v22 = vunpack.c.h.bf16 %v4488_v3 }
  0x23   : > { %4611 = vst [vmem:[%s4830_s25 + $0x20] sm:$0xff] %v3864_v14   ;;  %v3874_v24 = vpack.c.bf16 %v1225_v16, %v1224_v15  ;;  %v709_v25 = vmul.f32 %v3363_v17, %v4796_v0  ;;  %v3367_v26 = vunpack.c.l.bf16 %v4489_v13  ;;  %v3368_v27 = vunpack.c.h.bf16 %v4489_v13  ;;  %v4496_v14 = vld [vmem:[%s4791_s18 + $0x80] sm:$0xff]  }
  0x24   : > { %4612 = vst [vmem:[%s4830_s25 + $0x28] sm:$0xff] %v3869_v19   ;;  %v3879_v28 = vpack.c.bf16 %v1227_v21, %v1226_v20  ;;  %v710_v29 = vmul.f32 %v3364_v22, %v4796_v0  ;;  %v3371_v30 = vunpack.c.l.bf16 %v4490_v18  ;;  %v3372_v31 = vunpack.c.h.bf16 %v4490_v18 }
  0x25   : > { %4613 = vst [vmem:[%s4830_s25 + $0x30] sm:$0xff] %v3874_v24   ;;  %v972_v32 = vadd.f32 %v4805_v9, %v709_v25  ;;  %v711_v33 = vmul.f32 %v3367_v26, %v4796_v0  ;;  %v712_v34 = vmul.f32 %v3368_v27, %v4796_v0  ;;  %v3375_v35 = vunpack.c.l.bf16 %v4491_v23 }
  0x26   : > { %4614 = vst [vmem:[%s4830_s25 + $0x38] sm:$0xff] %v3879_v28   ;;  %v973_v36 = vadd.f32 %v4805_v9, %v710_v29  ;;  %v713_v37 = vmul.f32 %v3371_v30, %v4796_v0  ;;  %v714_v38 = vmul.f32 %v3372_v31, %v4796_v0  ;;  %v3376_v39 = vunpack.c.h.bf16 %v4491_v23  ;;  %v4497_v31 = vld [vmem:[%s4791_s18 + $0x88] sm:$0xff]  }
  0x27   : > { %v1228_v41 = vmax.f32 %v972_v32, 0.0  ;;  %v974_v42 = vadd.f32 %v4805_v9, %v711_v33  ;;  %v975_v43 = vadd.f32 %v4805_v9, %v712_v34  ;;  %v715_v44 = vmul.f32 %v3375_v35, %v4796_v0 }
  0x28   : > { %v1229_v45 = vmax.f32 %v973_v36, 0.0  ;;  %v976_v46 = vadd.f32 %v4805_v9, %v713_v37  ;;  %v977_v47 = vadd.f32 %v4805_v9, %v714_v38  ;;  %v716_v48 = vmul.f32 %v3376_v39, %v4796_v0  ;;  %v4498_v36 = vld [vmem:[%s4791_s18 + $0x90] sm:$0xff]  }
  0x29   : > { %v1230_v49 = vmax.f32 %v974_v42, 0.0  ;;  %v1231_v50 = vmax.f32 %v975_v43, 0.0  ;;  %v978_v51 = vadd.f32 %v4805_v9, %v715_v44  ;;  %v3379_v52 = vunpack.c.l.bf16 %v4492_v40 }
  0x2a   : > { %v3884_v54 = vpack.c.bf16 %v1229_v45, %v1228_v41  ;;  %v1232_v55 = vmax.f32 %v976_v46, 0.0  ;;  %v1233_v56 = vmax.f32 %v977_v47, 0.0  ;;  %v979_v57 = vadd.f32 %v4805_v9, %v716_v48  ;;  %v4499_v41 = vld [vmem:[%s4791_s18 + $0x98] sm:$0xff]  }
  0x2b   : > { %v3889_v59 = vpack.c.bf16 %v1231_v50, %v1230_v49  ;;  %v1234_v60 = vmax.f32 %v978_v51, 0.0  ;;  %v3380_v61 = vunpack.c.h.bf16 %v4492_v40  ;;  %v717_v62 = vmul.f32 %v3379_v52, %v4796_v0 }
  0x2c   : > { %4615 = vst [vmem:[%s4830_s25 + $0x40] sm:$0xff] %v3884_v54   ;;  %v3894_v1 = vpack.c.bf16 %v1233_v56, %v1232_v55  ;;  %v1235_v2 = vmax.f32 %v979_v57, 0.0  ;;  %v3383_v3 = vunpack.c.l.bf16 %v4493_v53  ;;  %v3384_v4 = vunpack.c.h.bf16 %v4493_v53  ;;  %v4500_v54 = vld [vmem:[%s4791_s18 + $0xa0] sm:$0xff]  }
  0x2d   : > { %4616 = vst [vmem:[%s4830_s25 + $0x48] sm:$0xff] %v3889_v59   ;;  %v718_v5 = vmul.f32 %v3380_v61, %v4796_v0  ;;  %v980_v6 = vadd.f32 %v4805_v9, %v717_v62  ;;  %v3387_v7 = vunpack.c.l.bf16 %v4494_v58  ;;  %v3388_v8 = vunpack.c.h.bf16 %v4494_v58 }
  0x2e   : > { %4617 = vst [vmem:[%s4830_s25 + $0x50] sm:$0xff] %v3894_v1   ;;  %v3899_v10 = vpack.c.bf16 %v1235_v2, %v1234_v60  ;;  %v719_v11 = vmul.f32 %v3383_v3, %v4796_v0  ;;  %v720_v12 = vmul.f32 %v3384_v4, %v4796_v0  ;;  %v3391_v13 = vunpack.c.l.bf16 %v4495_v63  ;;  %v4501_v4 = vld [vmem:[%s4791_s18 + $0xa8] sm:$0xff]  }
  0x2f   : > { %v981_v15 = vadd.f32 %v4805_v9, %v718_v5  ;;  %v1236_v16 = vmax.f32 %v980_v6, 0.0  ;;  %v721_v17 = vmul.f32 %v3387_v7, %v4796_v0  ;;  %v722_v18 = vmul.f32 %v3388_v8, %v4796_v0 }
  0x30   : > { %4618 = vst [vmem:[%s4830_s25 + $0x58] sm:$0xff] %v3899_v10   ;;  %v982_v19 = vadd.f32 %v4805_v9, %v719_v11  ;;  %v983_v20 = vadd.f32 %v4805_v9, %v720_v12  ;;  %v3392_v21 = vunpack.c.h.bf16 %v4495_v63  ;;  %v723_v22 = vmul.f32 %v3391_v13, %v4796_v0 }
  0x31   : > { %v1237_v23 = vmax.f32 %v981_v15, 0.0  ;;  %v984_v24 = vadd.f32 %v4805_v9, %v721_v17  ;;  %v985_v25 = vadd.f32 %v4805_v9, %v722_v18  ;;  %v3395_v26 = vunpack.c.l.bf16 %v4496_v14 }
  0x32   : > { %v1238_v27 = vmax.f32 %v982_v19, 0.0  ;;  %v1239_v28 = vmax.f32 %v983_v20, 0.0  ;;  %v724_v29 = vmul.f32 %v3392_v21, %v4796_v0  ;;  %v986_v30 = vadd.f32 %v4805_v9, %v723_v22  ;;  %v4503_v19 = vld [vmem:[%s4791_s18 + $0xb8] sm:$0xff]  }
  0x33   : > { %v3904_v32 = vpack.c.bf16 %v1237_v23, %v1236_v16  ;;  %v1240_v33 = vmax.f32 %v984_v24, 0.0  ;;  %v1241_v34 = vmax.f32 %v985_v25, 0.0  ;;  %v3396_v35 = vunpack.c.h.bf16 %v4496_v14  ;;  %v4502_v14 = vld [vmem:[%s4791_s18 + $0xb0] sm:$0xff]  }
  0x34   : > { %v3909_v37 = vpack.c.bf16 %v1239_v28, %v1238_v27  ;;  %v987_v38 = vadd.f32 %v4805_v9, %v724_v29  ;;  %v1242_v39 = vmax.f32 %v986_v30, 0.0  ;;  %v725_v40 = vmul.f32 %v3395_v26, %v4796_v0 }
  0x35   : > { %4619 = vst [vmem:[%s4830_s25 + $0x60] sm:$0xff] %v3904_v32   ;;  %v3914_v42 = vpack.c.bf16 %v1241_v34, %v1240_v33  ;;  %v726_v43 = vmul.f32 %v3396_v35, %v4796_v0  ;;  %v3399_v44 = vunpack.c.l.bf16 %v4497_v31  ;;  %v3400_v45 = vunpack.c.h.bf16 %v4497_v31  ;;  %v4504_v32 = vld [vmem:[%s4791_s18 + $0xc0] sm:$0xff]  }
  0x36   : > { %4620 = vst [vmem:[%s4830_s25 + $0x68] sm:$0xff] %v3909_v37   ;;  %v1243_v46 = vmax.f32 %v987_v38, 0.0  ;;  %v988_v47 = vadd.f32 %v4805_v9, %v725_v40  ;;  %v3403_v48 = vunpack.c.l.bf16 %v4498_v36  ;;  %v3404_v49 = vunpack.c.h.bf16 %v4498_v36 }
  0x37   : > { %4621 = vst [vmem:[%s4830_s25 + $0x70] sm:$0xff] %v3914_v42   ;;  %v989_v50 = vadd.f32 %v4805_v9, %v726_v43  ;;  %v727_v51 = vmul.f32 %v3399_v44, %v4796_v0  ;;  %v728_v52 = vmul.f32 %v3400_v45, %v4796_v0  ;;  %v3407_v53 = vunpack.c.l.bf16 %v4499_v41  ;;  %v4505_v45 = vld [vmem:[%s4791_s18 + $0xc8] sm:$0xff]  }
  0x38   : > { %v3919_v55 = vpack.c.bf16 %v1243_v46, %v1242_v39  ;;  %v1244_v56 = vmax.f32 %v988_v47, 0.0  ;;  %v729_v57 = vmul.f32 %v3403_v48, %v4796_v0  ;;  %v730_v58 = vmul.f32 %v3404_v49, %v4796_v0 }
  0x39   : > { %v1245_v59 = vmax.f32 %v989_v50, 0.0  ;;  %v990_v60 = vadd.f32 %v4805_v9, %v727_v51  ;;  %v991_v61 = vadd.f32 %v4805_v9, %v728_v52  ;;  %v3408_v62 = vunpack.c.h.bf16 %v4499_v41 }
  0x3a   : > { %4622 = vst [vmem:[%s4830_s25 + $0x78] sm:$0xff] %v3919_v55   ;;  %v992_v63 = vadd.f32 %v4805_v9, %v729_v57  ;;  %v993_v1 = vadd.f32 %v4805_v9, %v730_v58  ;;  %v731_v2 = vmul.f32 %v3407_v53, %v4796_v0  ;;  %v3411_v3 = vunpack.c.l.bf16 %v4500_v54 }
  0x3b   : > { %v3924_v5 = vpack.c.bf16 %v1245_v59, %v1244_v56  ;;  %v1246_v6 = vmax.f32 %v990_v60, 0.0  ;;  %v1247_v7 = vmax.f32 %v991_v61, 0.0  ;;  %v732_v8 = vmul.f32 %v3408_v62, %v4796_v0 }
  0x3c   : > { %v1248_v10 = vmax.f32 %v992_v63, 0.0  ;;  %v1249_v11 = vmax.f32 %v993_v1, 0.0  ;;  %v994_v12 = vadd.f32 %v4805_v9, %v731_v2  ;;  %v3412_v13 = vunpack.c.h.bf16 %v4500_v54  ;;  %v4506_v54 = vld [vmem:[%s4791_s18 + $0xd0] sm:$0xff]   ;;  %v4507_v63 = vld [vmem:[%s4791_s18 + $0xd8] sm:$0xff]  }
  0x3d   : > { %4623 = vst [vmem:[%s4830_s25 + $0x80] sm:$0xff] %v3924_v5   ;;  %v3929_v15 = vpack.c.bf16 %v1247_v7, %v1246_v6  ;;  %v995_v16 = vadd.f32 %v4805_v9, %v732_v8  ;;  %v733_v17 = vmul.f32 %v3411_v3, %v4796_v0  ;;  %v3415_v18 = vunpack.c.l.bf16 %v4501_v4 }
  0x3e   : > { %v3934_v20 = vpack.c.bf16 %v1249_v11, %v1248_v10  ;;  %v1250_v21 = vmax.f32 %v994_v12, 0.0  ;;  %v734_v22 = vmul.f32 %v3412_v13, %v4796_v0  ;;  %v3416_v23 = vunpack.c.h.bf16 %v4501_v4  ;;  %v4508_v10 = vld [vmem:[%s4791_s18 + $0xe0] sm:$0xff]  }
  0x3f   : > { %4624 = vst [vmem:[%s4830_s25 + $0x88] sm:$0xff] %v3929_v15   ;;  %v1251_v24 = vmax.f32 %v995_v16, 0.0  ;;  %v996_v25 = vadd.f32 %v4805_v9, %v733_v17  ;;  %v735_v26 = vmul.f32 %v3415_v18, %v4796_v0  ;;  %v3419_v27 = vunpack.c.l.bf16 %v4502_v14 }
  0x40   : > { %4625 = vst [vmem:[%s4830_s25 + $0x90] sm:$0xff] %v3934_v20   ;;  %v997_v28 = vadd.f32 %v4805_v9, %v734_v22  ;;  %v736_v29 = vmul.f32 %v3416_v23, %v4796_v0  ;;  %v3420_v30 = vunpack.c.h.bf16 %v4502_v14  ;;  %v3423_v31 = vunpack.c.l.bf16 %v4503_v19  ;;  %v4509_v23 = vld [vmem:[%s4791_s18 + $0xe8] sm:$0xff]  }
  0x41   : > { %v3939_v33 = vpack.c.bf16 %v1251_v24, %v1250_v21  ;;  %v1252_v34 = vmax.f32 %v996_v25, 0.0  ;;  %v998_v35 = vadd.f32 %v4805_v9, %v735_v26  ;;  %v737_v36 = vmul.f32 %v3419_v27, %v4796_v0 }
  0x42   : > { %v1253_v37 = vmax.f32 %v997_v28, 0.0  ;;  %v999_v38 = vadd.f32 %v4805_v9, %v736_v29  ;;  %v738_v39 = vmul.f32 %v3420_v30, %v4796_v0  ;;  %v3424_v40 = vunpack.c.h.bf16 %v4503_v19 }
  0x43   : > { %4626 = vst [vmem:[%s4830_s25 + $0x98] sm:$0xff] %v3939_v33   ;;  %v1254_v41 = vmax.f32 %v998_v35, 0.0  ;;  %v1000_v42 = vadd.f32 %v4805_v9, %v737_v36  ;;  %v739_v43 = vmul.f32 %v3423_v31, %v4796_v0  ;;  %v3427_v44 = vunpack.c.l.bf16 %v4504_v32 }
  0x44   : > { %v3944_v46 = vpack.c.bf16 %v1253_v37, %v1252_v34  ;;  %v1255_v47 = vmax.f32 %v999_v38, 0.0  ;;  %v1001_v48 = vadd.f32 %v4805_v9, %v738_v39  ;;  %v740_v49 = vmul.f32 %v3424_v40, %v4796_v0 }
  0x45   : > { %v1256_v50 = vmax.f32 %v1000_v42, 0.0  ;;  %v1002_v51 = vadd.f32 %v4805_v9, %v739_v43  ;;  %v3428_v52 = vunpack.c.h.bf16 %v4504_v32  ;;  %v741_v53 = vmul.f32 %v3427_v44, %v4796_v0  ;;  %v4510_v32 = vld [vmem:[%s4791_s18 + $0xf0] sm:$0xff]  }
  0x46   : > { %4627 = vst [vmem:[%s4830_s25 + $0xa0] sm:$0xff] %v3944_v46   ;;  %v3949_v55 = vpack.c.bf16 %v1255_v47, %v1254_v41  ;;  %v1257_v56 = vmax.f32 %v1001_v48, 0.0  ;;  %v1003_v57 = vadd.f32 %v4805_v9, %v740_v49  ;;  %v3431_v58 = vunpack.c.l.bf16 %v4505_v45  ;;  %v4511_v41 = vld [vmem:[%s4791_s18 + $0xf8] sm:$0xff]  }
  0x47   : > { %v1258_v59 = vmax.f32 %v1002_v51, 0.0  ;;  %v742_v60 = vmul.f32 %v3428_v52, %v4796_v0  ;;  %v1004_v61 = vadd.f32 %v4805_v9, %v741_v53  ;;  %v3432_v62 = vunpack.c.h.bf16 %v4505_v45 }
  0x48   : > { %4628 = vst [vmem:[%s4830_s25 + $0xa8] sm:$0xff] %v3949_v55   ;;  %v3954_v1 = vpack.c.bf16 %v1257_v56, %v1256_v50  ;;  %v1259_v2 = vmax.f32 %v1003_v57, 0.0  ;;  %v743_v3 = vmul.f32 %v3431_v58, %v4796_v0  ;;  %v3435_v4 = vunpack.c.l.bf16 %v4506_v54  ;;  %v4512_v50 = vld [vmem:[%s4791_s18 + $0x100] sm:$0xff]  }
  0x49   : > { %v1005_v5 = vadd.f32 %v4805_v9, %v742_v60  ;;  %v1260_v6 = vmax.f32 %v1004_v61, 0.0  ;;  %v744_v7 = vmul.f32 %v3432_v62, %v4796_v0  ;;  %v3436_v8 = vunpack.c.h.bf16 %v4506_v54 }
  0x4a   : > { %4629 = vst [vmem:[%s4830_s25 + $0xb0] sm:$0xff] %v3954_v1   ;;  %v3959_v11 = vpack.c.bf16 %v1259_v2, %v1258_v59  ;;  %v1006_v12 = vadd.f32 %v4805_v9, %v743_v3  ;;  %v745_v13 = vmul.f32 %v3435_v4, %v4796_v0  ;;  %v3439_v14 = vunpack.c.l.bf16 %v4507_v63 }
  0x4b   : > { %v1261_v15 = vmax.f32 %v1005_v5, 0.0  ;;  %v1007_v16 = vadd.f32 %v4805_v9, %v744_v7  ;;  %v746_v17 = vmul.f32 %v3436_v8, %v4796_v0  ;;  %v3440_v18 = vunpack.c.h.bf16 %v4507_v63  ;;  %v4513_v63 = vld [vmem:[%s4791_s18 + $0x108] sm:$0xff]  }
  0x4c   : > { %4630 = vst [vmem:[%s4830_s25 + $0xb8] sm:$0xff] %v3959_v11   ;;  %v1262_v19 = vmax.f32 %v1006_v12, 0.0  ;;  %v1008_v20 = vadd.f32 %v4805_v9, %v745_v13  ;;  %v747_v21 = vmul.f32 %v3439_v14, %v4796_v0  ;;  %v3443_v22 = vunpack.c.l.bf16 %v4508_v10 }
  0x4d   : > { %v3964_v24 = vpack.c.bf16 %v1261_v15, %v1260_v6  ;;  %v1263_v25 = vmax.f32 %v1007_v16, 0.0  ;;  %v1009_v26 = vadd.f32 %v4805_v9, %v746_v17  ;;  %v748_v27 = vmul.f32 %v3440_v18, %v4796_v0 }
  0x4e   : > { %v1264_v28 = vmax.f32 %v1008_v20, 0.0  ;;  %v1010_v29 = vadd.f32 %v4805_v9, %v747_v21  ;;  %v3444_v30 = vunpack.c.h.bf16 %v4508_v10  ;;  %v749_v31 = vmul.f32 %v3443_v22, %v4796_v0  ;;  %v4514_v10 = vld [vmem:[%s4791_s18 + $0x110] sm:$0xff]  }
  0x4f   : > { %4631 = vst [vmem:[%s4830_s25 + $0xc0] sm:$0xff] %v3964_v24   ;;  %v3969_v33 = vpack.c.bf16 %v1263_v25, %v1262_v19  ;;  %v1265_v34 = vmax.f32 %v1009_v26, 0.0  ;;  %v1011_v35 = vadd.f32 %v4805_v9, %v748_v27  ;;  %v3447_v36 = vunpack.c.l.bf16 %v4509_v23  ;;  %v4515_v19 = vld [vmem:[%s4791_s18 + $0x118] sm:$0xff]  }
  0x50   : > { %v1266_v37 = vmax.f32 %v1010_v29, 0.0  ;;  %v750_v38 = vmul.f32 %v3444_v30, %v4796_v0  ;;  %v1012_v39 = vadd.f32 %v4805_v9, %v749_v31  ;;  %v3448_v40 = vunpack.c.h.bf16 %v4509_v23 }
  0x51   : > { %4632 = vst [vmem:[%s4830_s25 + $0xc8] sm:$0xff] %v3969_v33   ;;  %v3974_v42 = vpack.c.bf16 %v1265_v34, %v1264_v28  ;;  %v1267_v43 = vmax.f32 %v1011_v35, 0.0  ;;  %v751_v44 = vmul.f32 %v3447_v36, %v4796_v0  ;;  %v3451_v45 = vunpack.c.l.bf16 %v4510_v32  ;;  %v4516_v28 = vld [vmem:[%s4791_s18 + $0x120] sm:$0xff]  }
  0x52   : > { %v1013_v46 = vadd.f32 %v4805_v9, %v750_v38  ;;  %v1268_v47 = vmax.f32 %v1012_v39, 0.0  ;;  %v752_v48 = vmul.f32 %v3448_v40, %v4796_v0  ;;  %v3452_v49 = vunpack.c.h.bf16 %v4510_v32 }
  0x53   : > { %4633 = vst [vmem:[%s4830_s25 + $0xd0] sm:$0xff] %v3974_v42   ;;  %v3979_v51 = vpack.c.bf16 %v1267_v43, %v1266_v37  ;;  %v1014_v52 = vadd.f32 %v4805_v9, %v751_v44  ;;  %v753_v53 = vmul.f32 %v3451_v45, %v4796_v0  ;;  %v3455_v54 = vunpack.c.l.bf16 %v4511_v41 }
  0x54   : > { %v1269_v55 = vmax.f32 %v1013_v46, 0.0  ;;  %v1015_v56 = vadd.f32 %v4805_v9, %v752_v48  ;;  %v754_v57 = vmul.f32 %v3452_v49, %v4796_v0  ;;  %v3456_v58 = vunpack.c.h.bf16 %v4511_v41  ;;  %v4517_v41 = vld [vmem:[%s4791_s18 + $0x128] sm:$0xff]  }
  0x55   : > { %4634 = vst [vmem:[%s4830_s25 + $0xd8] sm:$0xff] %v3979_v51   ;;  %v1270_v59 = vmax.f32 %v1014_v52, 0.0  ;;  %v1016_v60 = vadd.f32 %v4805_v9, %v753_v53  ;;  %v755_v61 = vmul.f32 %v3455_v54, %v4796_v0  ;;  %v3459_v62 = vunpack.c.l.bf16 %v4512_v50 }
  0x56   : > { %v3984_v1 = vpack.c.bf16 %v1269_v55, %v1268_v47  ;;  %v1271_v2 = vmax.f32 %v1015_v56, 0.0  ;;  %v1017_v3 = vadd.f32 %v4805_v9, %v754_v57  ;;  %v756_v4 = vmul.f32 %v3456_v58, %v4796_v0 }
  0x57   : > { %v1272_v5 = vmax.f32 %v1016_v60, 0.0  ;;  %v1018_v6 = vadd.f32 %v4805_v9, %v755_v61  ;;  %v3460_v7 = vunpack.c.h.bf16 %v4512_v50  ;;  %v757_v8 = vmul.f32 %v3459_v62, %v4796_v0  ;;  %v4518_v50 = vld [vmem:[%s4791_s18 + $0x130] sm:$0xff]  }
  0x58   : > { %4635 = vst [vmem:[%s4830_s25 + $0xe0] sm:$0xff] %v3984_v1   ;;  %v3989_v11 = vpack.c.bf16 %v1271_v2, %v1270_v59  ;;  %v1273_v12 = vmax.f32 %v1017_v3, 0.0  ;;  %v1019_v13 = vadd.f32 %v4805_v9, %v756_v4  ;;  %v3463_v14 = vunpack.c.l.bf16 %v4513_v63  ;;  %v4519_v59 = vld [vmem:[%s4791_s18 + $0x138] sm:$0xff]  }
  0x59   : > { %v1274_v15 = vmax.f32 %v1018_v6, 0.0  ;;  %v758_v16 = vmul.f32 %v3460_v7, %v4796_v0  ;;  %v1020_v17 = vadd.f32 %v4805_v9, %v757_v8  ;;  %v3464_v18 = vunpack.c.h.bf16 %v4513_v63 }
  0x5a   : > { %4636 = vst [vmem:[%s4830_s25 + $0xe8] sm:$0xff] %v3989_v11   ;;  %v3994_v20 = vpack.c.bf16 %v1273_v12, %v1272_v5  ;;  %v1275_v21 = vmax.f32 %v1019_v13, 0.0  ;;  %v759_v22 = vmul.f32 %v3463_v14, %v4796_v0  ;;  %v3467_v23 = vunpack.c.l.bf16 %v4514_v10  ;;  %v4520_v5 = vld [vmem:[%s4791_s18 + $0x140] sm:$0xff]  }
  0x5b   : > { %v1021_v24 = vadd.f32 %v4805_v9, %v758_v16  ;;  %v1276_v25 = vmax.f32 %v1020_v17, 0.0  ;;  %v760_v26 = vmul.f32 %v3464_v18, %v4796_v0  ;;  %v3468_v27 = vunpack.c.h.bf16 %v4514_v10 }
  0x5c   : > { %4637 = vst [vmem:[%s4830_s25 + $0xf0] sm:$0xff] %v3994_v20   ;;  %v3999_v29 = vpack.c.bf16 %v1275_v21, %v1274_v15  ;;  %v1022_v30 = vadd.f32 %v4805_v9, %v759_v22  ;;  %v761_v31 = vmul.f32 %v3467_v23, %v4796_v0  ;;  %v3471_v32 = vunpack.c.l.bf16 %v4515_v19 }
  0x5d   : > { %v1277_v33 = vmax.f32 %v1021_v24, 0.0  ;;  %v1023_v34 = vadd.f32 %v4805_v9, %v760_v26  ;;  %v762_v35 = vmul.f32 %v3468_v27, %v4796_v0  ;;  %v3472_v36 = vunpack.c.h.bf16 %v4515_v19  ;;  %v4521_v19 = vld [vmem:[%s4791_s18 + $0x148] sm:$0xff]  }
  0x5e   : > { %4638 = vst [vmem:[%s4830_s25 + $0xf8] sm:$0xff] %v3999_v29   ;;  %v1278_v37 = vmax.f32 %v1022_v30, 0.0  ;;  %v1024_v38 = vadd.f32 %v4805_v9, %v761_v31  ;;  %v763_v39 = vmul.f32 %v3471_v32, %v4796_v0  ;;  %v3475_v40 = vunpack.c.l.bf16 %v4516_v28 }
  0x5f   : > { %v4004_v42 = vpack.c.bf16 %v1277_v33, %v1276_v25  ;;  %v1279_v43 = vmax.f32 %v1023_v34, 0.0  ;;  %v1025_v44 = vadd.f32 %v4805_v9, %v762_v35  ;;  %v764_v45 = vmul.f32 %v3472_v36, %v4796_v0 }
  0x60   : > { %v1280_v46 = vmax.f32 %v1024_v38, 0.0  ;;  %v1026_v47 = vadd.f32 %v4805_v9, %v763_v39  ;;  %v3476_v48 = vunpack.c.h.bf16 %v4516_v28  ;;  %v765_v49 = vmul.f32 %v3475_v40, %v4796_v0  ;;  %v4522_v28 = vld [vmem:[%s4791_s18 + $0x150] sm:$0xff]  }
  0x61   : > { %4639 = vst [vmem:[%s4830_s25 + $0x100] sm:$0xff] %v4004_v42   ;;  %v4009_v51 = vpack.c.bf16 %v1279_v43, %v1278_v37  ;;  %v1281_v52 = vmax.f32 %v1025_v44, 0.0  ;;  %v1027_v53 = vadd.f32 %v4805_v9, %v764_v45  ;;  %v3479_v54 = vunpack.c.l.bf16 %v4517_v41  ;;  %v4523_v37 = vld [vmem:[%s4791_s18 + $0x158] sm:$0xff]  }
  0x62   : > { %v1282_v55 = vmax.f32 %v1026_v47, 0.0  ;;  %v766_v56 = vmul.f32 %v3476_v48, %v4796_v0  ;;  %v1028_v57 = vadd.f32 %v4805_v9, %v765_v49  ;;  %v3480_v58 = vunpack.c.h.bf16 %v4517_v41 }
  0x63   : > { %4640 = vst [vmem:[%s4830_s25 + $0x108] sm:$0xff] %v4009_v51   ;;  %v4014_v60 = vpack.c.bf16 %v1281_v52, %v1280_v46  ;;  %v1283_v61 = vmax.f32 %v1027_v53, 0.0  ;;  %v767_v62 = vmul.f32 %v3479_v54, %v4796_v0  ;;  %v3483_v63 = vunpack.c.l.bf16 %v4518_v50  ;;  %v4524_v46 = vld [vmem:[%s4791_s18 + $0x160] sm:$0xff]  }
  0x64   : > { %v1029_v1 = vadd.f32 %v4805_v9, %v766_v56  ;;  %v1284_v2 = vmax.f32 %v1028_v57, 0.0  ;;  %v768_v3 = vmul.f32 %v3480_v58, %v4796_v0  ;;  %v3484_v4 = vunpack.c.h.bf16 %v4518_v50 }
  0x65   : > { %4641 = vst [vmem:[%s4830_s25 + $0x110] sm:$0xff] %v4014_v60   ;;  %v4019_v6 = vpack.c.bf16 %v1283_v61, %v1282_v55  ;;  %v1030_v7 = vadd.f32 %v4805_v9, %v767_v62  ;;  %v769_v8 = vmul.f32 %v3483_v63, %v4796_v0  ;;  %v3487_v10 = vunpack.c.l.bf16 %v4519_v59 }
  0x66   : > { %v1285_v11 = vmax.f32 %v1029_v1, 0.0  ;;  %v1031_v12 = vadd.f32 %v4805_v9, %v768_v3  ;;  %v770_v13 = vmul.f32 %v3484_v4, %v4796_v0  ;;  %v3488_v14 = vunpack.c.h.bf16 %v4519_v59  ;;  %v4525_v59 = vld [vmem:[%s4791_s18 + $0x168] sm:$0xff]  }
  0x67   : > { %4642 = vst [vmem:[%s4830_s25 + $0x118] sm:$0xff] %v4019_v6   ;;  %v1286_v15 = vmax.f32 %v1030_v7, 0.0  ;;  %v1032_v16 = vadd.f32 %v4805_v9, %v769_v8  ;;  %v771_v17 = vmul.f32 %v3487_v10, %v4796_v0  ;;  %v3491_v18 = vunpack.c.l.bf16 %v4520_v5 }
  0x68   : > { %v4024_v20 = vpack.c.bf16 %v1285_v11, %v1284_v2  ;;  %v1287_v21 = vmax.f32 %v1031_v12, 0.0  ;;  %v1033_v22 = vadd.f32 %v4805_v9, %v770_v13  ;;  %v772_v23 = vmul.f32 %v3488_v14, %v4796_v0 }
  0x69   : > { %v1288_v24 = vmax.f32 %v1032_v16, 0.0  ;;  %v1034_v25 = vadd.f32 %v4805_v9, %v771_v17  ;;  %v3492_v26 = vunpack.c.h.bf16 %v4520_v5  ;;  %v773_v27 = vmul.f32 %v3491_v18, %v4796_v0  ;;  %v4526_v5 = vld [vmem:[%s4791_s18 + $0x170] sm:$0xff]  }
  0x6a   : > { %4643 = vst [vmem:[%s4830_s25 + $0x120] sm:$0xff] %v4024_v20   ;;  %v4029_v29 = vpack.c.bf16 %v1287_v21, %v1286_v15  ;;  %v1289_v30 = vmax.f32 %v1033_v22, 0.0  ;;  %v1035_v31 = vadd.f32 %v4805_v9, %v772_v23  ;;  %v3495_v32 = vunpack.c.l.bf16 %v4521_v19  ;;  %v4527_v15 = vld [vmem:[%s4791_s18 + $0x178] sm:$0xff]  }
  0x6b   : > { %v1290_v33 = vmax.f32 %v1034_v25, 0.0  ;;  %v774_v34 = vmul.f32 %v3492_v26, %v4796_v0  ;;  %v1036_v35 = vadd.f32 %v4805_v9, %v773_v27  ;;  %v3496_v36 = vunpack.c.h.bf16 %v4521_v19 }
  0x6c   : > { %4644 = vst [vmem:[%s4830_s25 + $0x128] sm:$0xff] %v4029_v29   ;;  %v4034_v38 = vpack.c.bf16 %v1289_v30, %v1288_v24  ;;  %v1291_v39 = vmax.f32 %v1035_v31, 0.0  ;;  %v775_v40 = vmul.f32 %v3495_v32, %v4796_v0  ;;  %v3499_v41 = vunpack.c.l.bf16 %v4522_v28  ;;  %v4528_v24 = vld [vmem:[%s4791_s18 + $0x180] sm:$0xff]  }
  0x6d   : > { %v1037_v42 = vadd.f32 %v4805_v9, %v774_v34  ;;  %v1292_v43 = vmax.f32 %v1036_v35, 0.0  ;;  %v776_v44 = vmul.f32 %v3496_v36, %v4796_v0  ;;  %v3500_v45 = vunpack.c.h.bf16 %v4522_v28  ;;  %v5093_v35 = vld [vmem:[%s5602_s1] ss:$0 sm:$0xff] }
  0x6e   : > { %4645 = vst [vmem:[%s4830_s25 + $0x130] sm:$0xff] %v4034_v38   ;;  %v4039_v47 = vpack.c.bf16 %v1291_v39, %v1290_v33  ;;  %v1038_v48 = vadd.f32 %v4805_v9, %v775_v40  ;;  %v777_v49 = vmul.f32 %v3499_v41, %v4796_v0  ;;  %v3503_v50 = vunpack.c.l.bf16 %v4523_v37  ;;  %v4529_v38 = vld [vmem:[%s4791_s18 + $0x188] sm:$0xff]  }
  0x6f   : > { %v1293_v51 = vmax.f32 %v1037_v42, 0.0  ;;  %v1039_v52 = vadd.f32 %v4805_v9, %v776_v44  ;;  %v778_v53 = vmul.f32 %v3500_v45, %v4796_v0  ;;  %v3504_v54 = vunpack.c.h.bf16 %v4523_v37 }
  0x70   : > { %4646 = vst [vmem:[%s4830_s25 + $0x138] sm:$0xff] %v4039_v47   ;;  %v1294_v55 = vmax.f32 %v1038_v48, 0.0  ;;  %v1040_v56 = vadd.f32 %v4805_v9, %v777_v49  ;;  %v779_v57 = vmul.f32 %v3503_v50, %v4796_v0  ;;  %v3507_v58 = vunpack.c.l.bf16 %v4524_v46  ;;  %v4530_v47 = vld [vmem:[%s4791_s18 + $0x190] sm:$0xff]  }
  0x71   : > { %v4044_v60 = vpack.c.bf16 %v1293_v51, %v1292_v43  ;;  %v1295_v61 = vmax.f32 %v1039_v52, 0.0  ;;  %v1041_v62 = vadd.f32 %v4805_v9, %v778_v53  ;;  %v780_v63 = vmul.f32 %v3504_v54, %v4796_v0  ;;  %v5102_v43 = vld [vmem:[%s5603_s2] ss:$0 sm:$0xff] }
  0x72   : > { %v1296_v1 = vmax.f32 %v1040_v56, 0.0  ;;  %v1042_v2 = vadd.f32 %v4805_v9, %v779_v57  ;;  %v3508_v3 = vunpack.c.h.bf16 %v4524_v46  ;;  %v781_v4 = vmul.f32 %v3507_v58, %v4796_v0 }
  0x73   : > { %4647 = vst [vmem:[%s4830_s25 + $0x140] sm:$0xff] %v4044_v60   ;;  %v4049_v6 = vpack.c.bf16 %v1295_v61, %v1294_v55  ;;  %v1297_v7 = vmax.f32 %v1041_v62, 0.0  ;;  %v1043_v8 = vadd.f32 %v4805_v9, %v780_v63  ;;  %v3511_v10 = vunpack.c.l.bf16 %v4525_v59  ;;  %v4531_v55 = vld [vmem:[%s4791_s18 + $0x198] sm:$0xff]  }
  0x74   : > { %v1298_v11 = vmax.f32 %v1042_v2, 0.0  ;;  %v782_v12 = vmul.f32 %v3508_v3, %v4796_v0  ;;  %v1044_v13 = vadd.f32 %v4805_v9, %v781_v4  ;;  %v3512_v14 = vunpack.c.h.bf16 %v4525_v59 }
  0x75   : > { %4648 = vst [vmem:[%s4830_s25 + $0x148] sm:$0xff] %v4049_v6   ;;  %v4054_v16 = vpack.c.bf16 %v1297_v7, %v1296_v1  ;;  %v1299_v17 = vmax.f32 %v1043_v8, 0.0  ;;  %v783_v18 = vmul.f32 %v3511_v10, %v4796_v0  ;;  %v3515_v19 = vunpack.c.l.bf16 %v4526_v5  ;;  %v4532_v1 = vld [vmem:[%s4791_s18 + $0x1a0] sm:$0xff]  }
  0x76   : > { %v1045_v20 = vadd.f32 %v4805_v9, %v782_v12  ;;  %v1300_v21 = vmax.f32 %v1044_v13, 0.0  ;;  %v784_v22 = vmul.f32 %v3512_v14, %v4796_v0  ;;  %v3516_v23 = vunpack.c.h.bf16 %v4526_v5 }
  0x77   : > { %4649 = vst [vmem:[%s4830_s25 + $0x150] sm:$0xff] %v4054_v16   ;;  %v4059_v25 = vpack.c.bf16 %v1299_v17, %v1298_v11  ;;  %v1046_v26 = vadd.f32 %v4805_v9, %v783_v18  ;;  %v785_v27 = vmul.f32 %v3515_v19, %v4796_v0  ;;  %v3519_v28 = vunpack.c.l.bf16 %v4527_v15 }
  0x78   : > { %v1301_v29 = vmax.f32 %v1045_v20, 0.0  ;;  %v1047_v30 = vadd.f32 %v4805_v9, %v784_v22  ;;  %v786_v31 = vmul.f32 %v3516_v23, %v4796_v0  ;;  %v3520_v32 = vunpack.c.h.bf16 %v4527_v15  ;;  %v4533_v15 = vld [vmem:[%s4791_s18 + $0x1a8] sm:$0xff]  }
  0x79   : > { %4650 = vst [vmem:[%s4830_s25 + $0x158] sm:$0xff] %v4059_v25   ;;  %v1302_v33 = vmax.f32 %v1046_v26, 0.0  ;;  %v1048_v34 = vadd.f32 %v4805_v9, %v785_v27  ;;  %v787_v36 = vmul.f32 %v5093_v35, %v3519_v28  ;;  %v3523_v37 = vunpack.c.l.bf16 %v4528_v24 }
  0x7a   : > { %v4064_v39 = vpack.c.bf16 %v1301_v29, %v1300_v21  ;;  %v1303_v40 = vmax.f32 %v1047_v30, 0.0  ;;  %v1049_v0 = vadd.f32 %v4805_v9, %v786_v31  ;;  %v788_v41 = vmul.f32 %v5093_v35, %v3520_v32 }
  0x7b   : > { %v1304_v42 = vmax.f32 %v1048_v34, 0.0  ;;  %v1050_v44 = vadd.f32 %v5102_v43, %v787_v36  ;;  %v3524_v45 = vunpack.c.h.bf16 %v4528_v24  ;;  %v789_v46 = vmul.f32 %v5093_v35, %v3523_v37  ;;  %v4534_v24 = vld [vmem:[%s4791_s18 + $0x1b0] sm:$0xff]  }
  0x7c   : > { %4651 = vst [vmem:[%s4830_s25 + $0x160] sm:$0xff] %v4064_v39   ;;  %v4069_v48 = vpack.c.bf16 %v1303_v40, %v1302_v33  ;;  %v1305_v49 = vmax.f32 %v1049_v0, 0.0  ;;  %v1051_v9 = vadd.f32 %v5102_v43, %v788_v41  ;;  %v3527_v50 = vunpack.c.l.bf16 %v4529_v38  ;;  %v4535_v33 = vld [vmem:[%s4791_s18 + $0x1b8] sm:$0xff]  }
  0x7d   : > { %v1306_v51 = vmax.f32 %v1050_v44, 0.0  ;;  %v790_v52 = vmul.f32 %v5093_v35, %v3524_v45  ;;  %v1052_v53 = vadd.f32 %v5102_v43, %v789_v46  ;;  %v3528_v54 = vunpack.c.h.bf16 %v4529_v38 }
  0x7e   : > { %4652 = vst [vmem:[%s4830_s25 + $0x168] sm:$0xff] %v4069_v48   ;;  %v4074_v56 = vpack.c.bf16 %v1305_v49, %v1304_v42  ;;  %v1307_v57 = vmax.f32 %v1051_v9, 0.0  ;;  %v791_v58 = vmul.f32 %v5093_v35, %v3527_v50  ;;  %v3531_v59 = vunpack.c.l.bf16 %v4530_v47  ;;  %v4536_v42 = vld [vmem:[%s4791_s18 + $0x1c0] sm:$0xff]  }
  0x7f   : > { %v1053_v60 = vadd.f32 %v5102_v43, %v790_v52  ;;  %v1308_v61 = vmax.f32 %v1052_v53, 0.0  ;;  %v792_v62 = vmul.f32 %v5093_v35, %v3528_v54  ;;  %v3532_v63 = vunpack.c.h.bf16 %v4530_v47 }
  0x80   : > { %4653 = vst [vmem:[%s4830_s25 + $0x170] sm:$0xff] %v4074_v56   ;;  %v4079_v2 = vpack.c.bf16 %v1307_v57, %v1306_v51  ;;  %v1054_v3 = vadd.f32 %v5102_v43, %v791_v58  ;;  %v793_v4 = vmul.f32 %v5093_v35, %v3531_v59  ;;  %v3535_v5 = vunpack.c.l.bf16 %v4531_v55 }
  0x81   : > { %v1309_v6 = vmax.f32 %v1053_v60, 0.0  ;;  %v1055_v7 = vadd.f32 %v5102_v43, %v792_v62  ;;  %v794_v8 = vmul.f32 %v5093_v35, %v3532_v63  ;;  %v3536_v10 = vunpack.c.h.bf16 %v4531_v55  ;;  %v4537_v55 = vld [vmem:[%s4791_s18 + $0x1c8] sm:$0xff]  }
  0x82   : > { %4654 = vst [vmem:[%s4830_s25 + $0x178] sm:$0xff] %v4079_v2   ;;  %v1310_v11 = vmax.f32 %v1054_v3, 0.0  ;;  %v1056_v12 = vadd.f32 %v5102_v43, %v793_v4  ;;  %v795_v13 = vmul.f32 %v5093_v35, %v3535_v5  ;;  %v3539_v14 = vunpack.c.l.bf16 %v4532_v1 }
  0x83   : > { %v4084_v16 = vpack.c.bf16 %v1309_v6, %v1308_v61  ;;  %v1311_v17 = vmax.f32 %v1055_v7, 0.0  ;;  %v1057_v18 = vadd.f32 %v5102_v43, %v794_v8  ;;  %v796_v19 = vmul.f32 %v5093_v35, %v3536_v10 }
  0x84   : > { %v1312_v20 = vmax.f32 %v1056_v12, 0.0  ;;  %v1058_v21 = vadd.f32 %v5102_v43, %v795_v13  ;;  %v3540_v22 = vunpack.c.h.bf16 %v4532_v1  ;;  %v797_v23 = vmul.f32 %v5093_v35, %v3539_v14  ;;  %v4538_v1 = vld [vmem:[%s4791_s18 + $0x1d0] sm:$0xff]  }
  0x85   : > { %4655 = vst [vmem:[%s4830_s25 + $0x180] sm:$0xff] %v4084_v16   ;;  %v4089_v25 = vpack.c.bf16 %v1311_v17, %v1310_v11  ;;  %v1313_v26 = vmax.f32 %v1057_v18, 0.0  ;;  %v1059_v27 = vadd.f32 %v5102_v43, %v796_v19  ;;  %v3543_v28 = vunpack.c.l.bf16 %v4533_v15  ;;  %v4539_v11 = vld [vmem:[%s4791_s18 + $0x1d8] sm:$0xff]  }
  0x86   : > { %v1314_v29 = vmax.f32 %v1058_v21, 0.0  ;;  %v798_v30 = vmul.f32 %v5093_v35, %v3540_v22  ;;  %v1060_v31 = vadd.f32 %v5102_v43, %v797_v23  ;;  %v3544_v32 = vunpack.c.h.bf16 %v4533_v15 }
  0x87   : > { %4656 = vst [vmem:[%s4830_s25 + $0x188] sm:$0xff] %v4089_v25   ;;  %v4094_v34 = vpack.c.bf16 %v1313_v26, %v1312_v20  ;;  %v1315_v36 = vmax.f32 %v1059_v27, 0.0  ;;  %v799_v37 = vmul.f32 %v5093_v35, %v3543_v28  ;;  %v3547_v38 = vunpack.c.l.bf16 %v4534_v24  ;;  %v4540_v20 = vld [vmem:[%s4791_s18 + $0x1e0] sm:$0xff]  }
  0x88   : > { %v1061_v39 = vadd.f32 %v5102_v43, %v798_v30  ;;  %v1316_v40 = vmax.f32 %v1060_v31, 0.0  ;;  %v800_v0 = vmul.f32 %v5093_v35, %v3544_v32  ;;  %v3548_v41 = vunpack.c.h.bf16 %v4534_v24 }
  0x89   : > { %4657 = vst [vmem:[%s4830_s25 + $0x190] sm:$0xff] %v4094_v34   ;;  %v4099_v44 = vpack.c.bf16 %v1315_v36, %v1314_v29  ;;  %v1062_v45 = vadd.f32 %v5102_v43, %v799_v37  ;;  %v801_v46 = vmul.f32 %v5093_v35, %v3547_v38  ;;  %v3551_v47 = vunpack.c.l.bf16 %v4535_v33 }
  0x8a   : > { %v1317_v48 = vmax.f32 %v1061_v39, 0.0  ;;  %v1063_v49 = vadd.f32 %v5102_v43, %v800_v0  ;;  %v802_v9 = vmul.f32 %v5093_v35, %v3548_v41  ;;  %v3552_v50 = vunpack.c.h.bf16 %v4535_v33  ;;  %v4541_v33 = vld [vmem:[%s4791_s18 + $0x1e8] sm:$0xff]  }
  0x8b   : > { %4658 = vst [vmem:[%s4830_s25 + $0x198] sm:$0xff] %v4099_v44   ;;  %v1318_v51 = vmax.f32 %v1062_v45, 0.0  ;;  %v1064_v52 = vadd.f32 %v5102_v43, %v801_v46  ;;  %v803_v53 = vmul.f32 %v5093_v35, %v3551_v47  ;;  %v3555_v54 = vunpack.c.l.bf16 %v4536_v42 }
  0x8c   : > { %v4104_v56 = vpack.c.bf16 %v1317_v48, %v1316_v40  ;;  %v1319_v57 = vmax.f32 %v1063_v49, 0.0  ;;  %v1065_v58 = vadd.f32 %v5102_v43, %v802_v9  ;;  %v804_v59 = vmul.f32 %v5093_v35, %v3552_v50 }
  0x8d   : > { %v1320_v60 = vmax.f32 %v1064_v52, 0.0  ;;  %v1066_v61 = vadd.f32 %v5102_v43, %v803_v53  ;;  %v3556_v62 = vunpack.c.h.bf16 %v4536_v42  ;;  %v805_v63 = vmul.f32 %v5093_v35, %v3555_v54  ;;  %v4542_v42 = vld [vmem:[%s4791_s18 + $0x1f0] sm:$0xff]  }
  0x8e   : > { %4659 = vst [vmem:[%s4830_s25 + $0x1a0] sm:$0xff] %v4104_v56   ;;  %v4109_v2 = vpack.c.bf16 %v1319_v57, %v1318_v51  ;;  %v1321_v3 = vmax.f32 %v1065_v58, 0.0  ;;  %v1067_v4 = vadd.f32 %v5102_v43, %v804_v59  ;;  %v3559_v5 = vunpack.c.l.bf16 %v4537_v55  ;;  %v4543_v51 = vld [vmem:[%s4791_s18 + $0x1f8] sm:$0xff]  }
  0x8f   : > { %v1322_v6 = vmax.f32 %v1066_v61, 0.0  ;;  %v806_v7 = vmul.f32 %v5093_v35, %v3556_v62  ;;  %v1068_v8 = vadd.f32 %v5102_v43, %v805_v63  ;;  %v3560_v10 = vunpack.c.h.bf16 %v4537_v55 }
  0x90   : > { %4660 = vst [vmem:[%s4830_s25 + $0x1a8] sm:$0xff] %v4109_v2   ;;  %v4114_v12 = vpack.c.bf16 %v1321_v3, %v1320_v60  ;;  %v1323_v13 = vmax.f32 %v1067_v4, 0.0  ;;  %v807_v14 = vmul.f32 %v5093_v35, %v3559_v5  ;;  %v3563_v15 = vunpack.c.l.bf16 %v4538_v1  ;;  %v4544_v60 = vld [vmem:[%s4791_s18 + $0x200] sm:$0xff]  }
  0x91   : > { %v1069_v16 = vadd.f32 %v5102_v43, %v806_v7  ;;  %v1324_v17 = vmax.f32 %v1068_v8, 0.0  ;;  %v808_v18 = vmul.f32 %v5093_v35, %v3560_v10  ;;  %v3564_v19 = vunpack.c.h.bf16 %v4538_v1 }
  0x92   : > { %4661 = vst [vmem:[%s4830_s25 + $0x1b0] sm:$0xff] %v4114_v12   ;;  %v4119_v21 = vpack.c.bf16 %v1323_v13, %v1322_v6  ;;  %v1070_v22 = vadd.f32 %v5102_v43, %v807_v14  ;;  %v809_v23 = vmul.f32 %v5093_v35, %v3563_v15  ;;  %v3567_v24 = vunpack.c.l.bf16 %v4539_v11 }
  0x93   : > { %v1325_v25 = vmax.f32 %v1069_v16, 0.0  ;;  %v1071_v26 = vadd.f32 %v5102_v43, %v808_v18  ;;  %v810_v27 = vmul.f32 %v5093_v35, %v3564_v19  ;;  %v3568_v28 = vunpack.c.h.bf16 %v4539_v11  ;;  %v4545_v11 = vld [vmem:[%s4791_s18 + $0x208] sm:$0xff]  }
  0x94   : > { %4662 = vst [vmem:[%s4830_s25 + $0x1b8] sm:$0xff] %v4119_v21   ;;  %v1326_v29 = vmax.f32 %v1070_v22, 0.0  ;;  %v1072_v30 = vadd.f32 %v5102_v43, %v809_v23  ;;  %v811_v31 = vmul.f32 %v5093_v35, %v3567_v24  ;;  %v3571_v32 = vunpack.c.l.bf16 %v4540_v20 }
  0x95   : > { %v4124_v34 = vpack.c.bf16 %v1325_v25, %v1324_v17  ;;  %v1327_v36 = vmax.f32 %v1071_v26, 0.0  ;;  %v1073_v37 = vadd.f32 %v5102_v43, %v810_v27  ;;  %v812_v38 = vmul.f32 %v5093_v35, %v3568_v28 }
  0x96   : > { %v1328_v39 = vmax.f32 %v1072_v30, 0.0  ;;  %v1074_v40 = vadd.f32 %v5102_v43, %v811_v31  ;;  %v3572_v0 = vunpack.c.h.bf16 %v4540_v20  ;;  %v813_v41 = vmul.f32 %v5093_v35, %v3571_v32  ;;  %v4546_v20 = vld [vmem:[%s4791_s18 + $0x210] sm:$0xff]  }
  0x97   : > { %4663 = vst [vmem:[%s4830_s25 + $0x1c0] sm:$0xff] %v4124_v34   ;;  %v4129_v44 = vpack.c.bf16 %v1327_v36, %v1326_v29  ;;  %v1329_v45 = vmax.f32 %v1073_v37, 0.0  ;;  %v1075_v46 = vadd.f32 %v5102_v43, %v812_v38  ;;  %v3575_v47 = vunpack.c.l.bf16 %v4541_v33  ;;  %v4547_v29 = vld [vmem:[%s4791_s18 + $0x218] sm:$0xff]  }
  0x98   : > { %v1330_v48 = vmax.f32 %v1074_v40, 0.0  ;;  %v814_v49 = vmul.f32 %v5093_v35, %v3572_v0  ;;  %v1076_v9 = vadd.f32 %v5102_v43, %v813_v41  ;;  %v3576_v50 = vunpack.c.h.bf16 %v4541_v33 }
  0x99   : > { %4664 = vst [vmem:[%s4830_s25 + $0x1c8] sm:$0xff] %v4129_v44   ;;  %v4134_v52 = vpack.c.bf16 %v1329_v45, %v1328_v39  ;;  %v1331_v53 = vmax.f32 %v1075_v46, 0.0  ;;  %v815_v54 = vmul.f32 %v5093_v35, %v3575_v47  ;;  %v3579_v55 = vunpack.c.l.bf16 %v4542_v42  ;;  %v4548_v39 = vld [vmem:[%s4791_s18 + $0x220] sm:$0xff]  }
  0x9a   : > { %v1077_v56 = vadd.f32 %v5102_v43, %v814_v49  ;;  %v1332_v57 = vmax.f32 %v1076_v9, 0.0  ;;  %v816_v58 = vmul.f32 %v5093_v35, %v3576_v50  ;;  %v3580_v59 = vunpack.c.h.bf16 %v4542_v42 }
  0x9b   : > { %4665 = vst [vmem:[%s4830_s25 + $0x1d0] sm:$0xff] %v4134_v52   ;;  %v4139_v61 = vpack.c.bf16 %v1331_v53, %v1330_v48  ;;  %v1078_v62 = vadd.f32 %v5102_v43, %v815_v54  ;;  %v817_v63 = vmul.f32 %v5093_v35, %v3579_v55  ;;  %v3583_v1 = vunpack.c.l.bf16 %v4543_v51 }
  0x9c   : > { %v1333_v2 = vmax.f32 %v1077_v56, 0.0  ;;  %v1079_v3 = vadd.f32 %v5102_v43, %v816_v58  ;;  %v818_v4 = vmul.f32 %v5093_v35, %v3580_v59  ;;  %v3584_v5 = vunpack.c.h.bf16 %v4543_v51  ;;  %v4549_v51 = vld [vmem:[%s4791_s18 + $0x228] sm:$0xff]  }
  0x9d   : > { %4666 = vst [vmem:[%s4830_s25 + $0x1d8] sm:$0xff] %v4139_v61   ;;  %v1334_v6 = vmax.f32 %v1078_v62, 0.0  ;;  %v1080_v7 = vadd.f32 %v5102_v43, %v817_v63  ;;  %v819_v8 = vmul.f32 %v5093_v35, %v3583_v1  ;;  %v3587_v10 = vunpack.c.l.bf16 %v4544_v60 }
  0x9e   : > { %v4144_v12 = vpack.c.bf16 %v1333_v2, %v1332_v57  ;;  %v1335_v13 = vmax.f32 %v1079_v3, 0.0  ;;  %v1081_v14 = vadd.f32 %v5102_v43, %v818_v4  ;;  %v820_v15 = vmul.f32 %v5093_v35, %v3584_v5 }
  0x9f   : > { %v1336_v16 = vmax.f32 %v1080_v7, 0.0  ;;  %v1082_v17 = vadd.f32 %v5102_v43, %v819_v8  ;;  %v3588_v18 = vunpack.c.h.bf16 %v4544_v60  ;;  %v821_v19 = vmul.f32 %v5093_v35, %v3587_v10  ;;  %v4550_v60 = vld [vmem:[%s4791_s18 + $0x230] sm:$0xff]  }
  0xa0   : > { %4667 = vst [vmem:[%s4830_s25 + $0x1e0] sm:$0xff] %v4144_v12   ;;  %v4149_v21 = vpack.c.bf16 %v1335_v13, %v1334_v6  ;;  %v1337_v22 = vmax.f32 %v1081_v14, 0.0  ;;  %v1083_v23 = vadd.f32 %v5102_v43, %v820_v15  ;;  %v3591_v24 = vunpack.c.l.bf16 %v4545_v11  ;;  %v4551_v6 = vld [vmem:[%s4791_s18 + $0x238] sm:$0xff]  }
  0xa1   : > { %v1338_v25 = vmax.f32 %v1082_v17, 0.0  ;;  %v822_v26 = vmul.f32 %v5093_v35, %v3588_v18  ;;  %v1084_v27 = vadd.f32 %v5102_v43, %v821_v19  ;;  %v3592_v28 = vunpack.c.h.bf16 %v4545_v11 }
  0xa2   : > { %4668 = vst [vmem:[%s4830_s25 + $0x1e8] sm:$0xff] %v4149_v21   ;;  %v4154_v30 = vpack.c.bf16 %v1337_v22, %v1336_v16  ;;  %v1339_v31 = vmax.f32 %v1083_v23, 0.0  ;;  %v823_v32 = vmul.f32 %v5093_v35, %v3591_v24  ;;  %v3595_v33 = vunpack.c.l.bf16 %v4546_v20  ;;  %v4552_v16 = vld [vmem:[%s4791_s18 + $0x240] sm:$0xff]  }
  0xa3   : > { %v1085_v34 = vadd.f32 %v5102_v43, %v822_v26  ;;  %v1340_v36 = vmax.f32 %v1084_v27, 0.0  ;;  %v824_v37 = vmul.f32 %v5093_v35, %v3592_v28  ;;  %v3596_v38 = vunpack.c.h.bf16 %v4546_v20 }
  0xa4   : > { %4669 = vst [vmem:[%s4830_s25 + $0x1f0] sm:$0xff] %v4154_v30   ;;  %v4159_v40 = vpack.c.bf16 %v1339_v31, %v1338_v25  ;;  %v1086_v0 = vadd.f32 %v5102_v43, %v823_v32  ;;  %v825_v41 = vmul.f32 %v5093_v35, %v3595_v33  ;;  %v3599_v42 = vunpack.c.l.bf16 %v4547_v29 }
  0xa5   : > { %v1341_v44 = vmax.f32 %v1085_v34, 0.0  ;;  %v1087_v45 = vadd.f32 %v5102_v43, %v824_v37  ;;  %v826_v46 = vmul.f32 %v5093_v35, %v3596_v38  ;;  %v3600_v47 = vunpack.c.h.bf16 %v4547_v29  ;;  %v4553_v29 = vld [vmem:[%s4791_s18 + $0x248] sm:$0xff]  }
  0xa6   : > { %4670 = vst [vmem:[%s4830_s25 + $0x1f8] sm:$0xff] %v4159_v40   ;;  %v1342_v48 = vmax.f32 %v1086_v0, 0.0  ;;  %v1088_v49 = vadd.f32 %v5102_v43, %v825_v41  ;;  %v827_v9 = vmul.f32 %v5093_v35, %v3599_v42  ;;  %v3603_v50 = vunpack.c.l.bf16 %v4548_v39 }
  0xa7   : > { %v4164_v52 = vpack.c.bf16 %v1341_v44, %v1340_v36  ;;  %v1343_v53 = vmax.f32 %v1087_v45, 0.0  ;;  %v1089_v54 = vadd.f32 %v5102_v43, %v826_v46  ;;  %v828_v55 = vmul.f32 %v5093_v35, %v3600_v47 }
  0xa8   : > { %v1344_v56 = vmax.f32 %v1088_v49, 0.0  ;;  %v1090_v57 = vadd.f32 %v5102_v43, %v827_v9  ;;  %v3604_v58 = vunpack.c.h.bf16 %v4548_v39  ;;  %v829_v59 = vmul.f32 %v5093_v35, %v3603_v50  ;;  %v4554_v39 = vld [vmem:[%s4791_s18 + $0x250] sm:$0xff]  }
  0xa9   : > { %4671 = vst [vmem:[%s4830_s25 + $0x200] sm:$0xff] %v4164_v52   ;;  %v4169_v61 = vpack.c.bf16 %v1343_v53, %v1342_v48  ;;  %v1345_v62 = vmax.f32 %v1089_v54, 0.0  ;;  %v1091_v63 = vadd.f32 %v5102_v43, %v828_v55  ;;  %v3607_v1 = vunpack.c.l.bf16 %v4549_v51  ;;  %v4555_v48 = vld [vmem:[%s4791_s18 + $0x258] sm:$0xff]  }
  0xaa   : > { %v1346_v2 = vmax.f32 %v1090_v57, 0.0  ;;  %v830_v3 = vmul.f32 %v5093_v35, %v3604_v58  ;;  %v1092_v4 = vadd.f32 %v5102_v43, %v829_v59  ;;  %v3608_v5 = vunpack.c.h.bf16 %v4549_v51 }
  0xab   : > { %4672 = vst [vmem:[%s4830_s25 + $0x208] sm:$0xff] %v4169_v61   ;;  %v4174_v7 = vpack.c.bf16 %v1345_v62, %v1344_v56  ;;  %v1347_v8 = vmax.f32 %v1091_v63, 0.0  ;;  %v831_v10 = vmul.f32 %v5093_v35, %v3607_v1  ;;  %v3611_v11 = vunpack.c.l.bf16 %v4550_v60  ;;  %v4556_v56 = vld [vmem:[%s4791_s18 + $0x260] sm:$0xff]  }
  0xac   : > { %v1093_v12 = vadd.f32 %v5102_v43, %v830_v3  ;;  %v1348_v13 = vmax.f32 %v1092_v4, 0.0  ;;  %v832_v14 = vmul.f32 %v5093_v35, %v3608_v5  ;;  %v3612_v15 = vunpack.c.h.bf16 %v4550_v60 }
  0xad   : > { %4673 = vst [vmem:[%s4830_s25 + $0x210] sm:$0xff] %v4174_v7   ;;  %v4179_v17 = vpack.c.bf16 %v1347_v8, %v1346_v2  ;;  %v1094_v18 = vadd.f32 %v5102_v43, %v831_v10  ;;  %v833_v19 = vmul.f32 %v5093_v35, %v3611_v11  ;;  %v3615_v20 = vunpack.c.l.bf16 %v4551_v6 }
  0xae   : > { %v1349_v21 = vmax.f32 %v1093_v12, 0.0  ;;  %v1095_v22 = vadd.f32 %v5102_v43, %v832_v14  ;;  %v834_v23 = vmul.f32 %v5093_v35, %v3612_v15  ;;  %v3616_v24 = vunpack.c.h.bf16 %v4551_v6  ;;  %v4557_v6 = vld [vmem:[%s4791_s18 + $0x268] sm:$0xff]  }
  0xaf   : > { %4674 = vst [vmem:[%s4830_s25 + $0x218] sm:$0xff] %v4179_v17   ;;  %v1350_v25 = vmax.f32 %v1094_v18, 0.0  ;;  %v1096_v26 = vadd.f32 %v5102_v43, %v833_v19  ;;  %v835_v27 = vmul.f32 %v5093_v35, %v3615_v20  ;;  %v3619_v28 = vunpack.c.l.bf16 %v4552_v16 }
  0xb0   : > { %v4184_v30 = vpack.c.bf16 %v1349_v21, %v1348_v13  ;;  %v1351_v31 = vmax.f32 %v1095_v22, 0.0  ;;  %v1097_v32 = vadd.f32 %v5102_v43, %v834_v23  ;;  %v836_v33 = vmul.f32 %v5093_v35, %v3616_v24 }
  0xb1   : > { %v1352_v34 = vmax.f32 %v1096_v26, 0.0  ;;  %v1098_v36 = vadd.f32 %v5102_v43, %v835_v27  ;;  %v3620_v37 = vunpack.c.h.bf16 %v4552_v16  ;;  %v837_v38 = vmul.f32 %v5093_v35, %v3619_v28  ;;  %v4558_v16 = vld [vmem:[%s4791_s18 + $0x270] sm:$0xff]  }
  0xb2   : > { %4675 = vst [vmem:[%s4830_s25 + $0x220] sm:$0xff] %v4184_v30   ;;  %v4189_v40 = vpack.c.bf16 %v1351_v31, %v1350_v25  ;;  %v1353_v0 = vmax.f32 %v1097_v32, 0.0  ;;  %v1099_v41 = vadd.f32 %v5102_v43, %v836_v33  ;;  %v3623_v42 = vunpack.c.l.bf16 %v4553_v29  ;;  %v4559_v25 = vld [vmem:[%s4791_s18 + $0x278] sm:$0xff]  }
  0xb3   : > { %v1354_v44 = vmax.f32 %v1098_v36, 0.0  ;;  %v838_v45 = vmul.f32 %v5093_v35, %v3620_v37  ;;  %v1100_v46 = vadd.f32 %v5102_v43, %v837_v38  ;;  %v3624_v47 = vunpack.c.h.bf16 %v4553_v29 }
  0xb4   : > { %4676 = vst [vmem:[%s4830_s25 + $0x228] sm:$0xff] %v4189_v40   ;;  %v4194_v49 = vpack.c.bf16 %v1353_v0, %v1352_v34  ;;  %v1355_v9 = vmax.f32 %v1099_v41, 0.0  ;;  %v839_v50 = vmul.f32 %v5093_v35, %v3623_v42  ;;  %v3627_v51 = vunpack.c.l.bf16 %v4554_v39  ;;  %v4560_v34 = vld [vmem:[%s4791_s18 + $0x280] sm:$0xff]  }
  0xb5   : > { %v1101_v52 = vadd.f32 %v5102_v43, %v838_v45  ;;  %v1356_v53 = vmax.f32 %v1100_v46, 0.0  ;;  %v840_v54 = vmul.f32 %v5093_v35, %v3624_v47  ;;  %v3628_v55 = vunpack.c.h.bf16 %v4554_v39 }
  0xb6   : > { %4677 = vst [vmem:[%s4830_s25 + $0x230] sm:$0xff] %v4194_v49   ;;  %v4199_v57 = vpack.c.bf16 %v1355_v9, %v1354_v44  ;;  %v1102_v58 = vadd.f32 %v5102_v43, %v839_v50  ;;  %v841_v59 = vmul.f32 %v5093_v35, %v3627_v51  ;;  %v3631_v60 = vunpack.c.l.bf16 %v4555_v48 }
  0xb7   : > { %v1357_v61 = vmax.f32 %v1101_v52, 0.0  ;;  %v1103_v62 = vadd.f32 %v5102_v43, %v840_v54  ;;  %v842_v63 = vmul.f32 %v5093_v35, %v3628_v55  ;;  %v3632_v1 = vunpack.c.h.bf16 %v4555_v48  ;;  %v4561_v48 = vld [vmem:[%s4791_s18 + $0x288] sm:$0xff]  }
  0xb8   : > { %4678 = vst [vmem:[%s4830_s25 + $0x238] sm:$0xff] %v4199_v57   ;;  %v1358_v2 = vmax.f32 %v1102_v58, 0.0  ;;  %v1104_v3 = vadd.f32 %v5102_v43, %v841_v59  ;;  %v843_v4 = vmul.f32 %v5093_v35, %v3631_v60  ;;  %v3635_v5 = vunpack.c.l.bf16 %v4556_v56 }
  0xb9   : > { %v4204_v7 = vpack.c.bf16 %v1357_v61, %v1356_v53  ;;  %v1359_v8 = vmax.f32 %v1103_v62, 0.0  ;;  %v1105_v10 = vadd.f32 %v5102_v43, %v842_v63  ;;  %v844_v11 = vmul.f32 %v5093_v35, %v3632_v1 }
  0xba   : > { %v1360_v12 = vmax.f32 %v1104_v3, 0.0  ;;  %v1106_v13 = vadd.f32 %v5102_v43, %v843_v4  ;;  %v3636_v14 = vunpack.c.h.bf16 %v4556_v56  ;;  %v845_v15 = vmul.f32 %v5093_v35, %v3635_v5  ;;  %v4562_v56 = vld [vmem:[%s4791_s18 + $0x290] sm:$0xff]  }
  0xbb   : > { %4679 = vst [vmem:[%s4830_s25 + $0x240] sm:$0xff] %v4204_v7   ;;  %v4209_v17 = vpack.c.bf16 %v1359_v8, %v1358_v2  ;;  %v1361_v18 = vmax.f32 %v1105_v10, 0.0  ;;  %v1107_v19 = vadd.f32 %v5102_v43, %v844_v11  ;;  %v3639_v20 = vunpack.c.l.bf16 %v4557_v6  ;;  %v4563_v2 = vld [vmem:[%s4791_s18 + $0x298] sm:$0xff]  }
  0xbc   : > { %v1362_v21 = vmax.f32 %v1106_v13, 0.0  ;;  %v846_v22 = vmul.f32 %v5093_v35, %v3636_v14  ;;  %v1108_v23 = vadd.f32 %v5102_v43, %v845_v15  ;;  %v3640_v24 = vunpack.c.h.bf16 %v4557_v6 }
  0xbd   : > { %4680 = vst [vmem:[%s4830_s25 + $0x248] sm:$0xff] %v4209_v17   ;;  %v4214_v26 = vpack.c.bf16 %v1361_v18, %v1360_v12  ;;  %v1363_v27 = vmax.f32 %v1107_v19, 0.0  ;;  %v847_v28 = vmul.f32 %v5093_v35, %v3639_v20  ;;  %v3643_v29 = vunpack.c.l.bf16 %v4558_v16  ;;  %v4564_v12 = vld [vmem:[%s4791_s18 + $0x2a0] sm:$0xff]  }
  0xbe   : > { %v1109_v30 = vadd.f32 %v5102_v43, %v846_v22  ;;  %v1364_v31 = vmax.f32 %v1108_v23, 0.0  ;;  %v848_v32 = vmul.f32 %v5093_v35, %v3640_v24  ;;  %v3644_v33 = vunpack.c.h.bf16 %v4558_v16 }
  0xbf   : > { %4681 = vst [vmem:[%s4830_s25 + $0x250] sm:$0xff] %v4214_v26   ;;  %v4219_v36 = vpack.c.bf16 %v1363_v27, %v1362_v21  ;;  %v1110_v37 = vadd.f32 %v5102_v43, %v847_v28  ;;  %v849_v38 = vmul.f32 %v5093_v35, %v3643_v29  ;;  %v3647_v39 = vunpack.c.l.bf16 %v4559_v25 }
  0xc0   : > { %v1365_v40 = vmax.f32 %v1109_v30, 0.0  ;;  %v1111_v0 = vadd.f32 %v5102_v43, %v848_v32  ;;  %v850_v41 = vmul.f32 %v5093_v35, %v3644_v33  ;;  %v3648_v42 = vunpack.c.h.bf16 %v4559_v25  ;;  %v4565_v25 = vld [vmem:[%s4791_s18 + $0x2a8] sm:$0xff]  }
  0xc1   : > { %4682 = vst [vmem:[%s4830_s25 + $0x258] sm:$0xff] %v4219_v36   ;;  %v1366_v44 = vmax.f32 %v1110_v37, 0.0  ;;  %v1112_v45 = vadd.f32 %v5102_v43, %v849_v38  ;;  %v851_v46 = vmul.f32 %v5093_v35, %v3647_v39  ;;  %v3651_v47 = vunpack.c.l.bf16 %v4560_v34 }
  0xc2   : > { %v4224_v49 = vpack.c.bf16 %v1365_v40, %v1364_v31  ;;  %v1367_v9 = vmax.f32 %v1111_v0, 0.0  ;;  %v1113_v50 = vadd.f32 %v5102_v43, %v850_v41  ;;  %v852_v51 = vmul.f32 %v5093_v35, %v3648_v42 }
  0xc3   : > { %v1368_v52 = vmax.f32 %v1112_v45, 0.0  ;;  %v1114_v53 = vadd.f32 %v5102_v43, %v851_v46  ;;  %v3652_v54 = vunpack.c.h.bf16 %v4560_v34  ;;  %v853_v55 = vmul.f32 %v5093_v35, %v3651_v47  ;;  %v4566_v34 = vld [vmem:[%s4791_s18 + $0x2b0] sm:$0xff]  }
  0xc4   : > { %4683 = vst [vmem:[%s4830_s25 + $0x260] sm:$0xff] %v4224_v49   ;;  %v4229_v57 = vpack.c.bf16 %v1367_v9, %v1366_v44  ;;  %v1369_v58 = vmax.f32 %v1113_v50, 0.0  ;;  %v1115_v59 = vadd.f32 %v5102_v43, %v852_v51  ;;  %v3655_v60 = vunpack.c.l.bf16 %v4561_v48  ;;  %v4567_v44 = vld [vmem:[%s4791_s18 + $0x2b8] sm:$0xff]  }
  0xc5   : > { %v1370_v61 = vmax.f32 %v1114_v53, 0.0  ;;  %v854_v62 = vmul.f32 %v5093_v35, %v3652_v54  ;;  %v1116_v63 = vadd.f32 %v5102_v43, %v853_v55  ;;  %v3656_v1 = vunpack.c.h.bf16 %v4561_v48 }
  0xc6   : > { %4684 = vst [vmem:[%s4830_s25 + $0x268] sm:$0xff] %v4229_v57   ;;  %v4234_v3 = vpack.c.bf16 %v1369_v58, %v1368_v52  ;;  %v1371_v4 = vmax.f32 %v1115_v59, 0.0  ;;  %v855_v5 = vmul.f32 %v5093_v35, %v3655_v60  ;;  %v3659_v6 = vunpack.c.l.bf16 %v4562_v56  ;;  %v4568_v52 = vld [vmem:[%s4791_s18 + $0x2c0] sm:$0xff]  }
  0xc7   : > { %v1117_v7 = vadd.f32 %v5102_v43, %v854_v62  ;;  %v1372_v8 = vmax.f32 %v1116_v63, 0.0  ;;  %v856_v10 = vmul.f32 %v5093_v35, %v3656_v1  ;;  %v3660_v11 = vunpack.c.h.bf16 %v4562_v56 }
  0xc8   : > { %4685 = vst [vmem:[%s4830_s25 + $0x270] sm:$0xff] %v4234_v3   ;;  %v4239_v13 = vpack.c.bf16 %v1371_v4, %v1370_v61  ;;  %v1118_v14 = vadd.f32 %v5102_v43, %v855_v5  ;;  %v857_v15 = vmul.f32 %v5093_v35, %v3659_v6  ;;  %v3663_v16 = vunpack.c.l.bf16 %v4563_v2 }
  0xc9   : > { %v1373_v17 = vmax.f32 %v1117_v7, 0.0  ;;  %v1119_v18 = vadd.f32 %v5102_v43, %v856_v10  ;;  %v858_v19 = vmul.f32 %v5093_v35, %v3660_v11  ;;  %v3664_v20 = vunpack.c.h.bf16 %v4563_v2  ;;  %v4569_v2 = vld [vmem:[%s4791_s18 + $0x2c8] sm:$0xff]  }
  0xca   : > { %4686 = vst [vmem:[%s4830_s25 + $0x278] sm:$0xff] %v4239_v13   ;;  %v1374_v21 = vmax.f32 %v1118_v14, 0.0  ;;  %v1120_v22 = vadd.f32 %v5102_v43, %v857_v15  ;;  %v859_v23 = vmul.f32 %v5093_v35, %v3663_v16  ;;  %v3667_v24 = vunpack.c.l.bf16 %v4564_v12 }
  0xcb   : > { %v4244_v26 = vpack.c.bf16 %v1373_v17, %v1372_v8  ;;  %v1375_v27 = vmax.f32 %v1119_v18, 0.0  ;;  %v1121_v28 = vadd.f32 %v5102_v43, %v858_v19  ;;  %v860_v29 = vmul.f32 %v5093_v35, %v3664_v20 }
  0xcc   : > { %v1376_v30 = vmax.f32 %v1120_v22, 0.0  ;;  %v1122_v31 = vadd.f32 %v5102_v43, %v859_v23  ;;  %v3668_v32 = vunpack.c.h.bf16 %v4564_v12  ;;  %v861_v33 = vmul.f32 %v5093_v35, %v3667_v24  ;;  %v4570_v12 = vld [vmem:[%s4791_s18 + $0x2d0] sm:$0xff]  }
  0xcd   : > { %4687 = vst [vmem:[%s4830_s25 + $0x280] sm:$0xff] %v4244_v26   ;;  %v4249_v36 = vpack.c.bf16 %v1375_v27, %v1374_v21  ;;  %v1377_v37 = vmax.f32 %v1121_v28, 0.0  ;;  %v1123_v38 = vadd.f32 %v5102_v43, %v860_v29  ;;  %v3671_v39 = vunpack.c.l.bf16 %v4565_v25  ;;  %v4571_v21 = vld [vmem:[%s4791_s18 + $0x2d8] sm:$0xff]  }
  0xce   : > { %v1378_v40 = vmax.f32 %v1122_v31, 0.0  ;;  %v862_v0 = vmul.f32 %v5093_v35, %v3668_v32  ;;  %v1124_v41 = vadd.f32 %v5102_v43, %v861_v33  ;;  %v3672_v42 = vunpack.c.h.bf16 %v4565_v25 }
  0xcf   : > { %4688 = vst [vmem:[%s4830_s25 + $0x288] sm:$0xff] %v4249_v36   ;;  %v4254_v45 = vpack.c.bf16 %v1377_v37, %v1376_v30  ;;  %v1379_v46 = vmax.f32 %v1123_v38, 0.0  ;;  %v863_v47 = vmul.f32 %v5093_v35, %v3671_v39  ;;  %v3675_v48 = vunpack.c.l.bf16 %v4566_v34  ;;  %v4572_v30 = vld [vmem:[%s4791_s18 + $0x2e0] sm:$0xff]  }
  0xd0   : > { %v1125_v49 = vadd.f32 %v5102_v43, %v862_v0  ;;  %v1380_v9 = vmax.f32 %v1124_v41, 0.0  ;;  %v864_v50 = vmul.f32 %v5093_v35, %v3672_v42  ;;  %v3676_v51 = vunpack.c.h.bf16 %v4566_v34 }
  0xd1   : > { %4689 = vst [vmem:[%s4830_s25 + $0x290] sm:$0xff] %v4254_v45   ;;  %v4259_v53 = vpack.c.bf16 %v1379_v46, %v1378_v40  ;;  %v1126_v54 = vadd.f32 %v5102_v43, %v863_v47  ;;  %v865_v55 = vmul.f32 %v5093_v35, %v3675_v48  ;;  %v3679_v56 = vunpack.c.l.bf16 %v4567_v44 }
  0xd2   : > { %v1381_v57 = vmax.f32 %v1125_v49, 0.0  ;;  %v1127_v58 = vadd.f32 %v5102_v43, %v864_v50  ;;  %v866_v59 = vmul.f32 %v5093_v35, %v3676_v51  ;;  %v3680_v60 = vunpack.c.h.bf16 %v4567_v44  ;;  %v4573_v44 = vld [vmem:[%s4791_s18 + $0x2e8] sm:$0xff]  }
  0xd3   : > { %4690 = vst [vmem:[%s4830_s25 + $0x298] sm:$0xff] %v4259_v53   ;;  %v1382_v61 = vmax.f32 %v1126_v54, 0.0  ;;  %v1128_v62 = vadd.f32 %v5102_v43, %v865_v55  ;;  %v867_v63 = vmul.f32 %v5093_v35, %v3679_v56  ;;  %v3683_v1 = vunpack.c.l.bf16 %v4568_v52 }
  0xd4   : > { %v4264_v3 = vpack.c.bf16 %v1381_v57, %v1380_v9  ;;  %v1383_v4 = vmax.f32 %v1127_v58, 0.0  ;;  %v1129_v5 = vadd.f32 %v5102_v43, %v866_v59  ;;  %v868_v6 = vmul.f32 %v5093_v35, %v3680_v60 }
  0xd5   : > { %v1384_v7 = vmax.f32 %v1128_v62, 0.0  ;;  %v1130_v8 = vadd.f32 %v5102_v43, %v867_v63  ;;  %v3684_v10 = vunpack.c.h.bf16 %v4568_v52  ;;  %v869_v11 = vmul.f32 %v5093_v35, %v3683_v1  ;;  %v4574_v52 = vld [vmem:[%s4791_s18 + $0x2f0] sm:$0xff]  }
  0xd6   : > { %4691 = vst [vmem:[%s4830_s25 + $0x2a0] sm:$0xff] %v4264_v3   ;;  %v4269_v13 = vpack.c.bf16 %v1383_v4, %v1382_v61  ;;  %v1385_v14 = vmax.f32 %v1129_v5, 0.0  ;;  %v1131_v15 = vadd.f32 %v5102_v43, %v868_v6  ;;  %v3687_v16 = vunpack.c.l.bf16 %v4569_v2  ;;  %v4575_v61 = vld [vmem:[%s4791_s18 + $0x2f8] sm:$0xff]   ;;  %v5382_v5 = vld [vmem:[%s5602_s1] ss:$0 sm:$0xff] }
  0xd7   : > { %v1386_v17 = vmax.f32 %v1130_v8, 0.0  ;;  %v870_v18 = vmul.f32 %v5093_v35, %v3684_v10  ;;  %v1132_v19 = vadd.f32 %v5102_v43, %v869_v11  ;;  %v3688_v20 = vunpack.c.h.bf16 %v4569_v2  ;;  %v4576_v8 = vld [vmem:[%s4791_s18 + $0x300] sm:$0xff]  }
  0xd8   : > { %4692 = vst [vmem:[%s4830_s25 + $0x2a8] sm:$0xff] %v4269_v13   ;;  %v4274_v22 = vpack.c.bf16 %v1385_v14, %v1384_v7  ;;  %v1387_v23 = vmax.f32 %v1131_v15, 0.0  ;;  %v871_v24 = vmul.f32 %v5093_v35, %v3687_v16  ;;  %v3691_v25 = vunpack.c.l.bf16 %v4570_v12  ;;  %v5392_v14 = vld [vmem:[%s5603_s2] ss:$0 sm:$0xff] }
  0xd9   : > { %v1133_v26 = vadd.f32 %v5102_v43, %v870_v18  ;;  %v1388_v27 = vmax.f32 %v1132_v19, 0.0  ;;  %v872_v28 = vmul.f32 %v5093_v35, %v3688_v20  ;;  %v3692_v29 = vunpack.c.h.bf16 %v4570_v12 }
  0xda   : > { %4693 = vst [vmem:[%s4830_s25 + $0x2b0] sm:$0xff] %v4274_v22   ;;  %v4279_v31 = vpack.c.bf16 %v1387_v23, %v1386_v17  ;;  %v1134_v32 = vadd.f32 %v5102_v43, %v871_v24  ;;  %v873_v33 = vmul.f32 %v5093_v35, %v3691_v25  ;;  %v3695_v34 = vunpack.c.l.bf16 %v4571_v21 }
  0xdb   : > { %v1389_v36 = vmax.f32 %v1133_v26, 0.0  ;;  %v1135_v37 = vadd.f32 %v5102_v43, %v872_v28  ;;  %v874_v38 = vmul.f32 %v5093_v35, %v3692_v29  ;;  %v3696_v39 = vunpack.c.h.bf16 %v4571_v21  ;;  %v4577_v21 = vld [vmem:[%s4791_s18 + $0x308] sm:$0xff]  }
  0xdc   : > { %4694 = vst [vmem:[%s4830_s25 + $0x2b8] sm:$0xff] %v4279_v31   ;;  %v1390_v40 = vmax.f32 %v1134_v32, 0.0  ;;  %v1136_v0 = vadd.f32 %v5102_v43, %v873_v33  ;;  %v875_v41 = vmul.f32 %v5093_v35, %v3695_v34  ;;  %v3699_v42 = vunpack.c.l.bf16 %v4572_v30 }
  0xdd   : > { %v4284_v45 = vpack.c.bf16 %v1389_v36, %v1388_v27  ;;  %v1391_v46 = vmax.f32 %v1135_v37, 0.0  ;;  %v1137_v47 = vadd.f32 %v5102_v43, %v874_v38  ;;  %v876_v48 = vmul.f32 %v5093_v35, %v3696_v39 }
  0xde   : > { %v1392_v49 = vmax.f32 %v1136_v0, 0.0  ;;  %v1138_v9 = vadd.f32 %v5102_v43, %v875_v41  ;;  %v3700_v50 = vunpack.c.h.bf16 %v4572_v30  ;;  %v877_v51 = vmul.f32 %v5093_v35, %v3699_v42  ;;  %v4578_v30 = vld [vmem:[%s4791_s18 + $0x310] sm:$0xff]  }
  0xdf   : > { %4695 = vst [vmem:[%s4830_s25 + $0x2c0] sm:$0xff] %v4284_v45   ;;  %v4289_v53 = vpack.c.bf16 %v1391_v46, %v1390_v40  ;;  %v1393_v54 = vmax.f32 %v1137_v47, 0.0  ;;  %v1139_v55 = vadd.f32 %v5102_v43, %v876_v48  ;;  %v3703_v56 = vunpack.c.l.bf16 %v4573_v44  ;;  %v4579_v40 = vld [vmem:[%s4791_s18 + $0x318] sm:$0xff]  }
  0xe0   : > { %v1394_v57 = vmax.f32 %v1138_v9, 0.0  ;;  %v878_v58 = vmul.f32 %v5093_v35, %v3700_v50  ;;  %v1140_v59 = vadd.f32 %v5102_v43, %v877_v51  ;;  %v3704_v60 = vunpack.c.h.bf16 %v4573_v44 }
  0xe1   : > { %4696 = vst [vmem:[%s4830_s25 + $0x2c8] sm:$0xff] %v4289_v53   ;;  %v4294_v62 = vpack.c.bf16 %v1393_v54, %v1392_v49  ;;  %v1395_v63 = vmax.f32 %v1139_v55, 0.0  ;;  %v879_v1 = vmul.f32 %v5093_v35, %v3703_v56  ;;  %v3707_v2 = vunpack.c.l.bf16 %v4574_v52  ;;  %v4580_v49 = vld [vmem:[%s4791_s18 + $0x320] sm:$0xff]  }
  0xe2   : > { %v1141_v3 = vadd.f32 %v5102_v43, %v878_v58  ;;  %v1396_v4 = vmax.f32 %v1140_v59, 0.0  ;;  %v880_v6 = vmul.f32 %v5382_v5, %v3704_v60  ;;  %v3708_v7 = vunpack.c.h.bf16 %v4574_v52 }
  0xe3   : > { %4697 = vst [vmem:[%s4830_s25 + $0x2d0] sm:$0xff] %v4294_v62   ;;  %v4299_v10 = vpack.c.bf16 %v1395_v63, %v1394_v57  ;;  %v1142_v11 = vadd.f32 %v5102_v43, %v879_v1  ;;  %v881_v35 = vmul.f32 %v5382_v5, %v3707_v2  ;;  %v3711_v12 = vunpack.c.l.bf16 %v4575_v61 }
  0xe4   : > { %v1397_v13 = vmax.f32 %v1141_v3, 0.0  ;;  %v1143_v15 = vadd.f32 %v5392_v14, %v880_v6  ;;  %v882_v16 = vmul.f32 %v5382_v5, %v3708_v7  ;;  %v3712_v17 = vunpack.c.h.bf16 %v4575_v61  ;;  %v4581_v61 = vld [vmem:[%s4791_s18 + $0x328] sm:$0xff]  }
  0xe5   : > { %4698 = vst [vmem:[%s4830_s25 + $0x2d8] sm:$0xff] %v4299_v10   ;;  %v1398_v18 = vmax.f32 %v1142_v11, 0.0  ;;  %v1144_v43 = vadd.f32 %v5392_v14, %v881_v35  ;;  %v883_v19 = vmul.f32 %v5382_v5, %v3711_v12  ;;  %v3715_v20 = vunpack.c.l.bf16 %v4576_v8 }
  0xe6   : > { %v4304_v22 = vpack.c.bf16 %v1397_v13, %v1396_v4  ;;  %v1399_v23 = vmax.f32 %v1143_v15, 0.0  ;;  %v1145_v24 = vadd.f32 %v5392_v14, %v882_v16  ;;  %v884_v25 = vmul.f32 %v5382_v5, %v3712_v17 }
  0xe7   : > { %v1400_v26 = vmax.f32 %v1144_v43, 0.0  ;;  %v1146_v27 = vadd.f32 %v5392_v14, %v883_v19  ;;  %v3716_v28 = vunpack.c.h.bf16 %v4576_v8  ;;  %v885_v29 = vmul.f32 %v5382_v5, %v3715_v20  ;;  %v4582_v8 = vld [vmem:[%s4791_s18 + $0x330] sm:$0xff]  }
  0xe8   : > { %4699 = vst [vmem:[%s4830_s25 + $0x2e0] sm:$0xff] %v4304_v22   ;;  %v4309_v31 = vpack.c.bf16 %v1399_v23, %v1398_v18  ;;  %v1401_v32 = vmax.f32 %v1145_v24, 0.0  ;;  %v1147_v33 = vadd.f32 %v5392_v14, %v884_v25  ;;  %v3719_v34 = vunpack.c.l.bf16 %v4577_v21  ;;  %v4583_v18 = vld [vmem:[%s4791_s18 + $0x338] sm:$0xff]  }
  0xe9   : > { %v1402_v36 = vmax.f32 %v1146_v27, 0.0  ;;  %v886_v37 = vmul.f32 %v5382_v5, %v3716_v28  ;;  %v1148_v38 = vadd.f32 %v5392_v14, %v885_v29  ;;  %v3720_v39 = vunpack.c.h.bf16 %v4577_v21 }
  0xea   : > { %4700 = vst [vmem:[%s4830_s25 + $0x2e8] sm:$0xff] %v4309_v31   ;;  %v4314_v0 = vpack.c.bf16 %v1401_v32, %v1400_v26  ;;  %v1403_v41 = vmax.f32 %v1147_v33, 0.0  ;;  %v887_v42 = vmul.f32 %v5382_v5, %v3719_v34  ;;  %v3723_v44 = vunpack.c.l.bf16 %v4578_v30  ;;  %v4584_v26 = vld [vmem:[%s4791_s18 + $0x340] sm:$0xff]  }
  0xeb   : > { %v1149_v45 = vadd.f32 %v5392_v14, %v886_v37  ;;  %v1404_v46 = vmax.f32 %v1148_v38, 0.0  ;;  %v888_v47 = vmul.f32 %v5382_v5, %v3720_v39  ;;  %v3724_v48 = vunpack.c.h.bf16 %v4578_v30 }
  0xec   : > { %4701 = vst [vmem:[%s4830_s25 + $0x2f0] sm:$0xff] %v4314_v0   ;;  %v4319_v9 = vpack.c.bf16 %v1403_v41, %v1402_v36  ;;  %v1150_v50 = vadd.f32 %v5392_v14, %v887_v42  ;;  %v889_v51 = vmul.f32 %v5382_v5, %v3723_v44  ;;  %v3727_v52 = vunpack.c.l.bf16 %v4579_v40 }
  0xed   : > { %v1405_v53 = vmax.f32 %v1149_v45, 0.0  ;;  %v1151_v54 = vadd.f32 %v5392_v14, %v888_v47  ;;  %v890_v55 = vmul.f32 %v5382_v5, %v3724_v48  ;;  %v3728_v56 = vunpack.c.h.bf16 %v4579_v40  ;;  %v4585_v40 = vld [vmem:[%s4791_s18 + $0x348] sm:$0xff]  }
  0xee   : > { %4702 = vst [vmem:[%s4830_s25 + $0x2f8] sm:$0xff] %v4319_v9   ;;  %v1406_v57 = vmax.f32 %v1150_v50, 0.0  ;;  %v1152_v58 = vadd.f32 %v5392_v14, %v889_v51  ;;  %v891_v59 = vmul.f32 %v5382_v5, %v3727_v52  ;;  %v3731_v60 = vunpack.c.l.bf16 %v4580_v49 }
  0xef   : > { %v4324_v62 = vpack.c.bf16 %v1405_v53, %v1404_v46  ;;  %v1407_v63 = vmax.f32 %v1151_v54, 0.0  ;;  %v1153_v1 = vadd.f32 %v5392_v14, %v890_v55  ;;  %v892_v2 = vmul.f32 %v5382_v5, %v3728_v56 }
  0xf0   : > { %v1408_v3 = vmax.f32 %v1152_v58, 0.0  ;;  %v1154_v4 = vadd.f32 %v5392_v14, %v891_v59  ;;  %v3732_v6 = vunpack.c.h.bf16 %v4580_v49  ;;  %v893_v7 = vmul.f32 %v5382_v5, %v3731_v60  ;;  %v4586_v49 = vld [vmem:[%s4791_s18 + $0x350] sm:$0xff]  }
  0xf1   : > { %4703 = vst [vmem:[%s4830_s25 + $0x300] sm:$0xff] %v4324_v62   ;;  %v4329_v10 = vpack.c.bf16 %v1407_v63, %v1406_v57  ;;  %v1409_v11 = vmax.f32 %v1153_v1, 0.0  ;;  %v1155_v35 = vadd.f32 %v5392_v14, %v892_v2  ;;  %v3735_v12 = vunpack.c.l.bf16 %v4581_v61  ;;  %v4587_v57 = vld [vmem:[%s4791_s18 + $0x358] sm:$0xff]  }
  0xf2   : > { %v1410_v13 = vmax.f32 %v1154_v4, 0.0  ;;  %v894_v15 = vmul.f32 %v5382_v5, %v3732_v6  ;;  %v1156_v16 = vadd.f32 %v5392_v14, %v893_v7  ;;  %v3736_v17 = vunpack.c.h.bf16 %v4581_v61 }
  0xf3   : > { %4704 = vst [vmem:[%s4830_s25 + $0x308] sm:$0xff] %v4329_v10   ;;  %v4334_v43 = vpack.c.bf16 %v1409_v11, %v1408_v3  ;;  %v1411_v19 = vmax.f32 %v1155_v35, 0.0  ;;  %v895_v20 = vmul.f32 %v5382_v5, %v3735_v12  ;;  %v3739_v21 = vunpack.c.l.bf16 %v4582_v8  ;;  %v4588_v3 = vld [vmem:[%s4791_s18 + $0x360] sm:$0xff]  }
  0xf4   : > { %v1157_v22 = vadd.f32 %v5392_v14, %v894_v15  ;;  %v1412_v23 = vmax.f32 %v1156_v16, 0.0  ;;  %v896_v24 = vmul.f32 %v5382_v5, %v3736_v17  ;;  %v3740_v25 = vunpack.c.h.bf16 %v4582_v8 }
  0xf5   : > { %4705 = vst [vmem:[%s4830_s25 + $0x310] sm:$0xff] %v4334_v43   ;;  %v4339_v27 = vpack.c.bf16 %v1411_v19, %v1410_v13  ;;  %v1158_v28 = vadd.f32 %v5392_v14, %v895_v20  ;;  %v897_v29 = vmul.f32 %v5382_v5, %v3739_v21  ;;  %v3743_v30 = vunpack.c.l.bf16 %v4583_v18 }
  0xf6   : > { %v1413_v31 = vmax.f32 %v1157_v22, 0.0  ;;  %v1159_v32 = vadd.f32 %v5392_v14, %v896_v24  ;;  %v898_v33 = vmul.f32 %v5382_v5, %v3740_v25  ;;  %v3744_v34 = vunpack.c.h.bf16 %v4583_v18  ;;  %v4589_v18 = vld [vmem:[%s4791_s18 + $0x368] sm:$0xff]  }
  0xf7   : > { %4706 = vst [vmem:[%s4830_s25 + $0x318] sm:$0xff] %v4339_v27   ;;  %v1414_v36 = vmax.f32 %v1158_v28, 0.0  ;;  %v1160_v37 = vadd.f32 %v5392_v14, %v897_v29  ;;  %v899_v38 = vmul.f32 %v5382_v5, %v3743_v30  ;;  %v3747_v39 = vunpack.c.l.bf16 %v4584_v26 }
  0xf8   : > { %v4344_v0 = vpack.c.bf16 %v1413_v31, %v1412_v23  ;;  %v1415_v41 = vmax.f32 %v1159_v32, 0.0  ;;  %v1161_v42 = vadd.f32 %v5392_v14, %v898_v33  ;;  %v900_v44 = vmul.f32 %v5382_v5, %v3744_v34 }
  0xf9   : > { %v1416_v45 = vmax.f32 %v1160_v37, 0.0  ;;  %v1162_v46 = vadd.f32 %v5392_v14, %v899_v38  ;;  %v3748_v47 = vunpack.c.h.bf16 %v4584_v26  ;;  %v901_v48 = vmul.f32 %v5382_v5, %v3747_v39  ;;  %v4590_v26 = vld [vmem:[%s4791_s18 + $0x370] sm:$0xff]  }
  0xfa   : > { %4707 = vst [vmem:[%s4830_s25 + $0x320] sm:$0xff] %v4344_v0   ;;  %v4349_v9 = vpack.c.bf16 %v1415_v41, %v1414_v36  ;;  %v1417_v50 = vmax.f32 %v1161_v42, 0.0  ;;  %v1163_v51 = vadd.f32 %v5392_v14, %v900_v44  ;;  %v3751_v52 = vunpack.c.l.bf16 %v4585_v40  ;;  %v4591_v36 = vld [vmem:[%s4791_s18 + $0x378] sm:$0xff]  }
  0xfb   : > { %v1418_v53 = vmax.f32 %v1162_v46, 0.0  ;;  %v902_v54 = vmul.f32 %v5382_v5, %v3748_v47  ;;  %v1164_v55 = vadd.f32 %v5392_v14, %v901_v48  ;;  %v3752_v56 = vunpack.c.h.bf16 %v4585_v40 }
  0xfc   : > { %4708 = vst [vmem:[%s4830_s25 + $0x328] sm:$0xff] %v4349_v9   ;;  %v4354_v58 = vpack.c.bf16 %v1417_v50, %v1416_v45  ;;  %v1419_v59 = vmax.f32 %v1163_v51, 0.0  ;;  %v903_v60 = vmul.f32 %v5382_v5, %v3751_v52  ;;  %v3755_v61 = vunpack.c.l.bf16 %v4586_v49  ;;  %v4592_v45 = vld [vmem:[%s4791_s18 + $0x380] sm:$0xff]  }
  0xfd   : > { %v1165_v62 = vadd.f32 %v5392_v14, %v902_v54  ;;  %v1420_v63 = vmax.f32 %v1164_v55, 0.0  ;;  %v904_v1 = vmul.f32 %v5382_v5, %v3752_v56  ;;  %v3756_v2 = vunpack.c.h.bf16 %v4586_v49 }
  0xfe   : > { %4709 = vst [vmem:[%s4830_s25 + $0x330] sm:$0xff] %v4354_v58   ;;  %v4359_v4 = vpack.c.bf16 %v1419_v59, %v1418_v53  ;;  %v1166_v6 = vadd.f32 %v5392_v14, %v903_v60  ;;  %v905_v7 = vmul.f32 %v5382_v5, %v3755_v61  ;;  %v3759_v8 = vunpack.c.l.bf16 %v4587_v57 }
  0xff   : > { %v1421_v10 = vmax.f32 %v1165_v62, 0.0  ;;  %v1167_v11 = vadd.f32 %v5392_v14, %v904_v1  ;;  %v906_v35 = vmul.f32 %v5382_v5, %v3756_v2  ;;  %v3760_v12 = vunpack.c.h.bf16 %v4587_v57  ;;  %v4593_v57 = vld [vmem:[%s4791_s18 + $0x388] sm:$0xff]  }
 0x100   : > { %4710 = vst [vmem:[%s4830_s25 + $0x338] sm:$0xff] %v4359_v4   ;;  %v1422_v13 = vmax.f32 %v1166_v6, 0.0  ;;  %v1168_v15 = vadd.f32 %v5392_v14, %v905_v7  ;;  %v907_v16 = vmul.f32 %v5382_v5, %v3759_v8  ;;  %v3763_v17 = vunpack.c.l.bf16 %v4588_v3 }
 0x101   : > { %v4364_v43 = vpack.c.bf16 %v1421_v10, %v1420_v63  ;;  %v1423_v19 = vmax.f32 %v1167_v11, 0.0  ;;  %v1169_v20 = vadd.f32 %v5392_v14, %v906_v35  ;;  %v908_v21 = vmul.f32 %v5382_v5, %v3760_v12 }
 0x102   : > { %v1424_v22 = vmax.f32 %v1168_v15, 0.0  ;;  %v1170_v23 = vadd.f32 %v5392_v14, %v907_v16  ;;  %v3764_v24 = vunpack.c.h.bf16 %v4588_v3  ;;  %v909_v25 = vmul.f32 %v5382_v5, %v3763_v17  ;;  %v4594_v3 = vld [vmem:[%s4791_s18 + $0x390] sm:$0xff]  }
 0x103   : > { %4711 = vst [vmem:[%s4830_s25 + $0x340] sm:$0xff] %v4364_v43   ;;  %v4369_v27 = vpack.c.bf16 %v1423_v19, %v1422_v13  ;;  %v1425_v28 = vmax.f32 %v1169_v20, 0.0  ;;  %v1171_v29 = vadd.f32 %v5392_v14, %v908_v21  ;;  %v3767_v30 = vunpack.c.l.bf16 %v4589_v18  ;;  %v4595_v13 = vld [vmem:[%s4791_s18 + $0x398] sm:$0xff]  }
 0x104   : > { %v1426_v31 = vmax.f32 %v1170_v23, 0.0  ;;  %v910_v32 = vmul.f32 %v5382_v5, %v3764_v24  ;;  %v1172_v33 = vadd.f32 %v5392_v14, %v909_v25  ;;  %v3768_v34 = vunpack.c.h.bf16 %v4589_v18 }
 0x105   : > { %4712 = vst [vmem:[%s4830_s25 + $0x348] sm:$0xff] %v4369_v27   ;;  %v4374_v37 = vpack.c.bf16 %v1425_v28, %v1424_v22  ;;  %v1427_v38 = vmax.f32 %v1171_v29, 0.0  ;;  %v911_v39 = vmul.f32 %v5382_v5, %v3767_v30  ;;  %v3771_v40 = vunpack.c.l.bf16 %v4590_v26  ;;  %v4596_v22 = vld [vmem:[%s4791_s18 + $0x3a0] sm:$0xff]  }
 0x106   : > { %v1173_v0 = vadd.f32 %v5392_v14, %v910_v32  ;;  %v1428_v41 = vmax.f32 %v1172_v33, 0.0  ;;  %v912_v42 = vmul.f32 %v5382_v5, %v3768_v34  ;;  %v3772_v44 = vunpack.c.h.bf16 %v4590_v26 }
 0x107   : > { %4713 = vst [vmem:[%s4830_s25 + $0x350] sm:$0xff] %v4374_v37   ;;  %v4379_v46 = vpack.c.bf16 %v1427_v38, %v1426_v31  ;;  %v1174_v47 = vadd.f32 %v5392_v14, %v911_v39  ;;  %v913_v48 = vmul.f32 %v5382_v5, %v3771_v40  ;;  %v3775_v49 = vunpack.c.l.bf16 %v4591_v36 }
 0x108   : > { %v1429_v9 = vmax.f32 %v1173_v0, 0.0  ;;  %v1175_v50 = vadd.f32 %v5392_v14, %v912_v42  ;;  %v914_v51 = vmul.f32 %v5382_v5, %v3772_v44  ;;  %v3776_v52 = vunpack.c.h.bf16 %v4591_v36  ;;  %v4597_v36 = vld [vmem:[%s4791_s18 + $0x3a8] sm:$0xff]  }
 0x109   : > { %4714 = vst [vmem:[%s4830_s25 + $0x358] sm:$0xff] %v4379_v46   ;;  %v1430_v53 = vmax.f32 %v1174_v47, 0.0  ;;  %v1176_v54 = vadd.f32 %v5392_v14, %v913_v48  ;;  %v915_v55 = vmul.f32 %v5382_v5, %v3775_v49  ;;  %v3779_v56 = vunpack.c.l.bf16 %v4592_v45 }
 0x10a   : > { %v4384_v58 = vpack.c.bf16 %v1429_v9, %v1428_v41  ;;  %v1431_v59 = vmax.f32 %v1175_v50, 0.0  ;;  %v1177_v60 = vadd.f32 %v5392_v14, %v914_v51  ;;  %v916_v61 = vmul.f32 %v5382_v5, %v3776_v52 }
 0x10b   : > { %v1432_v62 = vmax.f32 %v1176_v54, 0.0  ;;  %v1178_v63 = vadd.f32 %v5392_v14, %v915_v55  ;;  %v3780_v1 = vunpack.c.h.bf16 %v4592_v45  ;;  %v917_v2 = vmul.f32 %v5382_v5, %v3779_v56  ;;  %v4598_v45 = vld [vmem:[%s4791_s18 + $0x3b0] sm:$0xff]  }
 0x10c   : > { %4715 = vst [vmem:[%s4830_s25 + $0x360] sm:$0xff] %v4384_v58   ;;  %v4389_v4 = vpack.c.bf16 %v1431_v59, %v1430_v53  ;;  %v1433_v6 = vmax.f32 %v1177_v60, 0.0  ;;  %v1179_v7 = vadd.f32 %v5392_v14, %v916_v61  ;;  %v3783_v8 = vunpack.c.l.bf16 %v4593_v57  ;;  %v4599_v53 = vld [vmem:[%s4791_s18 + $0x3b8] sm:$0xff]  }
 0x10d   : > { %v1434_v10 = vmax.f32 %v1178_v63, 0.0  ;;  %v918_v11 = vmul.f32 %v5382_v5, %v3780_v1  ;;  %v1180_v35 = vadd.f32 %v5392_v14, %v917_v2  ;;  %v3784_v12 = vunpack.c.h.bf16 %v4593_v57 }
 0x10e   : > { %4716 = vst [vmem:[%s4830_s25 + $0x368] sm:$0xff] %v4389_v4   ;;  %v4394_v15 = vpack.c.bf16 %v1433_v6, %v1432_v62  ;;  %v1435_v16 = vmax.f32 %v1179_v7, 0.0  ;;  %v919_v17 = vmul.f32 %v5382_v5, %v3783_v8  ;;  %v3787_v18 = vunpack.c.l.bf16 %v4594_v3  ;;  %v4600_v62 = vld [vmem:[%s4791_s18 + $0x3c0] sm:$0xff]  }
 0x10f   : > { %v1181_v43 = vadd.f32 %v5392_v14, %v918_v11  ;;  %v1436_v19 = vmax.f32 %v1180_v35, 0.0  ;;  %v920_v20 = vmul.f32 %v5382_v5, %v3784_v12  ;;  %v3788_v21 = vunpack.c.h.bf16 %v4594_v3 }
 0x110   : > { %4717 = vst [vmem:[%s4830_s25 + $0x370] sm:$0xff] %v4394_v15   ;;  %v4399_v23 = vpack.c.bf16 %v1435_v16, %v1434_v10  ;;  %v1182_v24 = vadd.f32 %v5392_v14, %v919_v17  ;;  %v921_v25 = vmul.f32 %v5382_v5, %v3787_v18  ;;  %v3791_v26 = vunpack.c.l.bf16 %v4595_v13 }
 0x111   : > { %v1437_v27 = vmax.f32 %v1181_v43, 0.0  ;;  %v1183_v28 = vadd.f32 %v5392_v14, %v920_v20  ;;  %v922_v29 = vmul.f32 %v5382_v5, %v3788_v21  ;;  %v3792_v30 = vunpack.c.h.bf16 %v4595_v13  ;;  %v4601_v13 = vld [vmem:[%s4791_s18 + $0x3c8] sm:$0xff]  }
 0x112   : > { %4718 = vst [vmem:[%s4830_s25 + $0x378] sm:$0xff] %v4399_v23   ;;  %v1438_v31 = vmax.f32 %v1182_v24, 0.0  ;;  %v1184_v32 = vadd.f32 %v5392_v14, %v921_v25  ;;  %v923_v33 = vmul.f32 %v5382_v5, %v3791_v26  ;;  %v3795_v34 = vunpack.c.l.bf16 %v4596_v22 }
 0x113   : > { %v4404_v37 = vpack.c.bf16 %v1437_v27, %v1436_v19  ;;  %v1439_v38 = vmax.f32 %v1183_v28, 0.0  ;;  %v1185_v39 = vadd.f32 %v5392_v14, %v922_v29  ;;  %v924_v40 = vmul.f32 %v5382_v5, %v3792_v30 }
 0x114   : > { %v1440_v0 = vmax.f32 %v1184_v32, 0.0  ;;  %v1186_v41 = vadd.f32 %v5392_v14, %v923_v33  ;;  %v3796_v42 = vunpack.c.h.bf16 %v4596_v22  ;;  %v925_v44 = vmul.f32 %v5382_v5, %v3795_v34  ;;  %v4602_v22 = vld [vmem:[%s4791_s18 + $0x3d0] sm:$0xff]  }
 0x115   : > { %4719 = vst [vmem:[%s4830_s25 + $0x380] sm:$0xff] %v4404_v37   ;;  %v4409_v46 = vpack.c.bf16 %v1439_v38, %v1438_v31  ;;  %v1441_v47 = vmax.f32 %v1185_v39, 0.0  ;;  %v1187_v48 = vadd.f32 %v5392_v14, %v924_v40  ;;  %v3799_v49 = vunpack.c.l.bf16 %v4597_v36  ;;  %v4603_v31 = vld [vmem:[%s4791_s18 + $0x3d8] sm:$0xff]  }
 0x116   : > { %v1442_v9 = vmax.f32 %v1186_v41, 0.0  ;;  %v926_v50 = vmul.f32 %v5382_v5, %v3796_v42  ;;  %v1188_v51 = vadd.f32 %v5392_v14, %v925_v44  ;;  %v3800_v52 = vunpack.c.h.bf16 %v4597_v36 }
 0x117   : > { %4720 = vst [vmem:[%s4830_s25 + $0x388] sm:$0xff] %v4409_v46   ;;  %v4414_v54 = vpack.c.bf16 %v1441_v47, %v1440_v0  ;;  %v1443_v55 = vmax.f32 %v1187_v48, 0.0  ;;  %v927_v56 = vmul.f32 %v5382_v5, %v3799_v49  ;;  %v3803_v57 = vunpack.c.l.bf16 %v4598_v45  ;;  %v4604_v0 = vld [vmem:[%s4791_s18 + $0x3e0] sm:$0xff]  }
 0x118   : > { %v1189_v58 = vadd.f32 %v5392_v14, %v926_v50  ;;  %v1444_v59 = vmax.f32 %v1188_v51, 0.0  ;;  %v928_v60 = vmul.f32 %v5382_v5, %v3800_v52  ;;  %v3804_v61 = vunpack.c.h.bf16 %v4598_v45 }
 0x119   : > { %4721 = vst [vmem:[%s4830_s25 + $0x390] sm:$0xff] %v4414_v54   ;;  %v4419_v63 = vpack.c.bf16 %v1443_v55, %v1442_v9  ;;  %v1190_v1 = vadd.f32 %v5392_v14, %v927_v56  ;;  %v929_v2 = vmul.f32 %v5382_v5, %v3803_v57  ;;  %v3807_v3 = vunpack.c.l.bf16 %v4599_v53 }
 0x11a   : > { %v1445_v4 = vmax.f32 %v1189_v58, 0.0  ;;  %v1191_v6 = vadd.f32 %v5392_v14, %v928_v60  ;;  %v930_v7 = vmul.f32 %v5382_v5, %v3804_v61  ;;  %v3808_v8 = vunpack.c.h.bf16 %v4599_v53  ;;  %v4605_v53 = vld [vmem:[%s4791_s18 + $0x3e8] sm:$0xff]  }
 0x11b   : > { %4722 = vst [vmem:[%s4830_s25 + $0x398] sm:$0xff] %v4419_v63   ;;  %v1446_v10 = vmax.f32 %v1190_v1, 0.0  ;;  %v1192_v11 = vadd.f32 %v5392_v14, %v929_v2  ;;  %v931_v35 = vmul.f32 %v5382_v5, %v3807_v3  ;;  %v3811_v12 = vunpack.c.l.bf16 %v4600_v62 }
 0x11c   : > { %v4424_v15 = vpack.c.bf16 %v1445_v4, %v1444_v59  ;;  %v1447_v16 = vmax.f32 %v1191_v6, 0.0  ;;  %v1193_v17 = vadd.f32 %v5392_v14, %v930_v7  ;;  %v932_v18 = vmul.f32 %v5382_v5, %v3808_v8 }
 0x11d   : > { %v1448_v43 = vmax.f32 %v1192_v11, 0.0  ;;  %v1194_v19 = vadd.f32 %v5392_v14, %v931_v35  ;;  %v3812_v20 = vunpack.c.h.bf16 %v4600_v62  ;;  %v933_v21 = vmul.f32 %v5382_v5, %v3811_v12  ;;  %v4606_v62 = vld [vmem:[%s4791_s18 + $0x3f0] sm:$0xff]  }
 0x11e   : > { %4723 = vst [vmem:[%s4830_s25 + $0x3a0] sm:$0xff] %v4424_v15   ;;  %v4429_v23 = vpack.c.bf16 %v1447_v16, %v1446_v10  ;;  %v1449_v24 = vmax.f32 %v1193_v17, 0.0  ;;  %v1195_v25 = vadd.f32 %v5392_v14, %v932_v18  ;;  %v3815_v26 = vunpack.c.l.bf16 %v4601_v13  ;;  %v4607_v10 = vld [vmem:[%s4791_s18 + $0x3f8] sm:$0xff]  }
 0x11f   : > { %v1450_v27 = vmax.f32 %v1194_v19, 0.0  ;;  %v934_v28 = vmul.f32 %v5382_v5, %v3812_v20  ;;  %v1196_v29 = vadd.f32 %v5392_v14, %v933_v21  ;;  %v3816_v30 = vunpack.c.h.bf16 %v4601_v13 }
 0x120   : > { %4724 = vst [vmem:[%s4830_s25 + $0x3a8] sm:$0xff] %v4429_v23   ;;  %v4434_v32 = vpack.c.bf16 %v1449_v24, %v1448_v43  ;;  %v1451_v33 = vmax.f32 %v1195_v25, 0.0  ;;  %v935_v34 = vmul.f32 %v5382_v5, %v3815_v26  ;;  %v3819_v36 = vunpack.c.l.bf16 %v4602_v22 }
 0x121   : > { %v1197_v37 = vadd.f32 %v5392_v14, %v934_v28  ;;  %v1452_v38 = vmax.f32 %v1196_v29, 0.0  ;;  %v936_v39 = vmul.f32 %v5382_v5, %v3816_v30  ;;  %v3820_v40 = vunpack.c.h.bf16 %v4602_v22 }
 0x122   : > { %4725 = vst [vmem:[%s4830_s25 + $0x3b0] sm:$0xff] %v4434_v32   ;;  %v4439_v41 = vpack.c.bf16 %v1451_v33, %v1450_v27  ;;  %v1198_v42 = vadd.f32 %v5392_v14, %v935_v34  ;;  %v937_v44 = vmul.f32 %v5382_v5, %v3819_v36  ;;  %v3823_v45 = vunpack.c.l.bf16 %v4603_v31 }
 0x123   : > { %v1453_v46 = vmax.f32 %v1197_v37, 0.0  ;;  %v1199_v47 = vadd.f32 %v5392_v14, %v936_v39  ;;  %v938_v48 = vmul.f32 %v5382_v5, %v3820_v40  ;;  %v3824_v49 = vunpack.c.h.bf16 %v4603_v31 }
 0x124   : > { %4726 = vst [vmem:[%s4830_s25 + $0x3b8] sm:$0xff] %v4439_v41   ;;  %v1454_v9 = vmax.f32 %v1198_v42, 0.0  ;;  %v1200_v50 = vadd.f32 %v5392_v14, %v937_v44  ;;  %v939_v51 = vmul.f32 %v5382_v5, %v3823_v45  ;;  %v3827_v52 = vunpack.c.l.bf16 %v4604_v0 }
 0x125   : > { %v4444_v54 = vpack.c.bf16 %v1453_v46, %v1452_v38  ;;  %v1455_v55 = vmax.f32 %v1199_v47, 0.0  ;;  %v1201_v56 = vadd.f32 %v5392_v14, %v938_v48  ;;  %v940_v57 = vmul.f32 %v5382_v5, %v3824_v49 }
 0x126   : > { %v1456_v58 = vmax.f32 %v1200_v50, 0.0  ;;  %v1202_v59 = vadd.f32 %v5392_v14, %v939_v51  ;;  %v3828_v60 = vunpack.c.h.bf16 %v4604_v0  ;;  %v941_v61 = vmul.f32 %v5382_v5, %v3827_v52 }
 0x127   : > { %4727 = vst [vmem:[%s4830_s25 + $0x3c0] sm:$0xff] %v4444_v54   ;;  %v4449_v63 = vpack.c.bf16 %v1455_v55, %v1454_v9  ;;  %v1457_v1 = vmax.f32 %v1201_v56, 0.0  ;;  %v1203_v2 = vadd.f32 %v5392_v14, %v940_v57  ;;  %v3831_v3 = vunpack.c.l.bf16 %v4605_v53 }
 0x128   : > { %v1458_v4 = vmax.f32 %v1202_v59, 0.0  ;;  %v942_v6 = vmul.f32 %v5382_v5, %v3828_v60  ;;  %v1204_v7 = vadd.f32 %v5392_v14, %v941_v61  ;;  %v3832_v8 = vunpack.c.h.bf16 %v4605_v53 }
 0x129   : > { %4728 = vst [vmem:[%s4830_s25 + $0x3c8] sm:$0xff] %v4449_v63   ;;  %v4454_v11 = vpack.c.bf16 %v1457_v1, %v1456_v58  ;;  %v1459_v35 = vmax.f32 %v1203_v2, 0.0  ;;  %v943_v12 = vmul.f32 %v5382_v5, %v3831_v3  ;;  %v3835_v13 = vunpack.c.l.bf16 %v4606_v62 }
 0x12a   : > { %v1205_v15 = vadd.f32 %v5392_v14, %v942_v6  ;;  %v1460_v16 = vmax.f32 %v1204_v7, 0.0  ;;  %v944_v17 = vmul.f32 %v5382_v5, %v3832_v8  ;;  %v3836_v18 = vunpack.c.h.bf16 %v4606_v62 }
 0x12b   : > { %4729 = vst [vmem:[%s4830_s25 + $0x3d0] sm:$0xff] %v4454_v11   ;;  %v4459_v43 = vpack.c.bf16 %v1459_v35, %v1458_v4  ;;  %v1206_v19 = vadd.f32 %v5392_v14, %v943_v12  ;;  %v945_v20 = vmul.f32 %v5382_v5, %v3835_v13  ;;  %v3839_v21 = vunpack.c.l.bf16 %v4607_v10 }
 0x12c   : > { %v1461_v22 = vmax.f32 %v1205_v15, 0.0  ;;  %v1207_v23 = vadd.f32 %v5392_v14, %v944_v17  ;;  %v946_v24 = vmul.f32 %v5382_v5, %v3836_v18  ;;  %v3840_v25 = vunpack.c.h.bf16 %v4607_v10 }
 0x12d   : > { %4730 = vst [vmem:[%s4830_s25 + $0x3d8] sm:$0xff] %v4459_v43   ;;  %v1462_v26 = vmax.f32 %v1206_v19, 0.0  ;;  %v1208_v27 = vadd.f32 %v5392_v14, %v945_v20  ;;  %v947_v28 = vmul.f32 %v5382_v5, %v3839_v21 }
 0x12e   : > { %v4464_v29 = vpack.c.bf16 %v1461_v22, %v1460_v16  ;;  %v1463_v30 = vmax.f32 %v1207_v23, 0.0  ;;  %v1209_v31 = vadd.f32 %v5392_v14, %v946_v24  ;;  %v948_v32 = vmul.f32 %v5382_v5, %v3840_v25 }
 0x12f   : > { %v1464_v33 = vmax.f32 %v1208_v27, 0.0  ;;  %v1210_v34 = vadd.f32 %v5392_v14, %v947_v28 }
 0x130   : > { %4731 = vst [vmem:[%s4830_s25 + $0x3e0] sm:$0xff] %v4464_v29   ;;  %v4469_v36 = vpack.c.bf16 %v1463_v30, %v1462_v26  ;;  %v1465_v37 = vmax.f32 %v1209_v31, 0.0  ;;  %v1211_v38 = vadd.f32 %v5392_v14, %v948_v32 }
 0x131   : > { %v1466_v39 = vmax.f32 %v1210_v34, 0.0 }
 0x132   : > { %4732 = vst [vmem:[%s4830_s25 + $0x3e8] sm:$0xff] %v4469_v36   ;;  %v4474_v40 = vpack.c.bf16 %v1465_v37, %v1464_v33  ;;  %v1467_v0 = vmax.f32 %v1211_v38, 0.0 }
 0x134   : > { %4733 = vst [vmem:[%s4830_s25 + $0x3f0] sm:$0xff] %v4474_v40   ;;  %v4479_v41 = vpack.c.bf16 %v1467_v0, %v1466_v39 }
 0x136   : > { %4734 = vst [vmem:[%s4830_s25 + $0x3f8] sm:$0xff] %v4479_v41  }
 0x137 PF: > { %s13_s12 = sadd.s32 1, %s4753_s12  }
 0x138   : > { %p10_p4 = scmp.ge.s32.totalorder %s13_s12, 6  }
 0x13a   :  { %12 = sbr.rel (!%p10_p4) target bundleno = 1 (0x1), region = 62 }

</bundles_post_ra>
